<compile_context>
chip_gen: v7x
topology: tpu7x:2x2x1
jax: 0.10.0
libtpu: 0.0.40
codegen_flags: <defaults>
</compile_context>

<pallas_src>
import math

import jax
import jax.numpy as jnp
from jax.experimental import pallas as pl
from jax.experimental.pallas import tpu as pltpu


def make_gumbel_quantize(num_hiddens, n_embed, embedding_dim,
                         tau=1.0, row_tile=512):
    """Returns fn (x_rows, g_rows, Wp, bias, embed) -> (z_q_rows, kl_rows)."""

    inv_tau = 1.0 / float(tau)
    log_n = math.log(float(n_embed))

    def kernel(x_ref, g_ref, wp_ref, b_ref, emb_ref, zq_ref, kl_ref):
        # 1x1 conv == matmul over channels (MXU, bf16 in, f32 accumulate).
        logits = jnp.dot(x_ref[...], wp_ref[...],
                         preferred_element_type=jnp.float32) + b_ref[...]

        # --- hard gumbel-softmax forward value (dim = channel = last axis) ---
        # argmax((logits+g)/tau) does not change with tau>0, but keep the scale
        # for faithfulness; the forward value with hard=True is exactly the
        # one-hot of the argmax.
        y = (logits + g_ref[...].astype(jnp.float32)) * inv_tau
        y_max = jnp.max(y, axis=-1, keepdims=True)
        hard = (y == y_max).astype(jnp.float32)

        # --- z_q = einsum('b n h w, n d -> b d h w') == one_hot @ embed ------
        zq_ref[...] = jnp.dot(hard, emb_ref[...],
                              preferred_element_type=jnp.float32
                              ).astype(zq_ref.dtype)

        # --- per-row KL-to-uniform term of qy = softmax(logits) --------------
        # sum_c qy*log(qy*n) = sum_c qy*l_c - log(sum_c e^{l_c}) + log(n)
        # with l = logits - rowmax(logits); only ONE log per row.
        l = logits - jnp.max(logits, axis=-1, keepdims=True)
        el = jnp.exp(l)
        s_el = jnp.sum(el, axis=-1, keepdims=True)
        s_ell = jnp.sum(el * l, axis=-1, keepdims=True)
        kl_ref[...] = (s_ell * pl.reciprocal(s_el, approx=True)
                       - jnp.log(s_el) + log_n).astype(kl_ref.dtype)

    def run(x_rows, g_rows, wp, bias, embed):
        P = x_rows.shape[0]
        assert P % row_tile == 0, "wrapper must pad rows to a multiple of row_tile"
        grid = (P // row_tile,)

        zq, kl = pl.pallas_call(
            kernel,
            out_shape=(
                jax.ShapeDtypeStruct((P, embedding_dim), jnp.float32),
                jax.ShapeDtypeStruct((P, 1), jnp.float32),
            ),
            grid_spec=pltpu.PrefetchScalarGridSpec(
                num_scalar_prefetch=0,
                grid=grid,
                in_specs=[
                    pl.BlockSpec((row_tile, num_hiddens), lambda i: (i, 0)),
                    pl.BlockSpec((row_tile, n_embed), lambda i: (i, 0)),
                    pl.BlockSpec((num_hiddens, n_embed), lambda i: (0, 0)),
                    pl.BlockSpec((1, n_embed), lambda i: (0, 0)),
                    pl.BlockSpec((n_embed, embedding_dim), lambda i: (0, 0)),
                ],
                out_specs=[
                    pl.BlockSpec((row_tile, embedding_dim), lambda i: (i, 0)),
                    pl.BlockSpec((row_tile, 1), lambda i: (i, 0)),
                ],
            ),
            compiler_params=pltpu.CompilerParams(
                dimension_semantics=("parallel",)),
        )(x_rows, g_rows, wp, bias, embed)
        return zq, kl

    return run


def gumbel_quantize_forward(z, params, key, *, n_embed, embedding_dim,
                            num_hiddens, tau=1.0, kld_scale=0.0005,
                            row_tile=512):
    """z: (B, C=num_hiddens, H, W) NCHW, as in the PyTorch module."""
    B, C, H, W = z.shape
    assert C == num_hiddens
    P = B * H * W

    # NCHW -> (P, C), channels last.
    x_rows = jnp.transpose(z, (0, 2, 3, 1)).reshape(P, C)

    # Gumbel noise (same role as F.gumbel_softmax's internal sampling).
    g_rows = jax.random.gumbel(key, (P, n_embed), dtype=jnp.float32)

    # Pad rows up to a multiple of row_tile; padded rows are discarded below.
    P_pad = row_tile * pl.cdiv(P, row_tile)
    if P_pad != P:
        x_rows = jnp.pad(x_rows, ((0, P_pad - P), (0, 0)))
        g_rows = jnp.pad(g_rows, ((0, P_pad - P), (0, 0)))

    # bf16 streams for the dominant HBM traffic; f32 accumulation in-kernel.
    x_rows = x_rows.astype(jnp.bfloat16)
    g_rows = g_rows.astype(jnp.bfloat16)
    wp = params["proj_w"].astype(jnp.bfloat16)
    bias = params["proj_b"].astype(jnp.float32)
    embed = params["embed_w"].astype(jnp.float32)

    run = make_gumbel_quantize(num_hiddens, n_embed, embedding_dim,
                               tau=tau, row_tile=row_tile)
    zq_rows, kl_rows = run(x_rows, g_rows, wp, bias, embed)

    # Final KL reduction: sum over channels already done per row in-kernel;
    # mean over the real (b, h, w) rows, then scale.
    diff = kld_scale * jnp.sum(kl_rows[:P, 0]) / P

    # (P, D) -> (B, D, H, W) to match the PyTorch output layout.
    z_q = jnp.transpose(zq_rows[:P].reshape(B, H, W, embedding_dim),
                        (0, 3, 1, 2))
    return z_q, diff


if __name__ == "__main__":
    num_hiddens = 32
    n_embed = 64
    embedding_dim = 16
    B, H, W = 2, 16, 16

    key = jax.random.PRNGKey(0)
    k_x, k_w, k_b, k_e, k_g = jax.random.split(key, 5)

    # Deterministic synthetic parameters (shapes from nn.Conv2d / nn.Embedding).
    params = {
        # Conv2d(num_hiddens, n_embed, 1) weight, stored already transposed
        # for channels-last matmul: (num_hiddens, n_embed).
        "proj_w": (jax.random.normal(k_w, (num_hiddens, n_embed),
                                     dtype=jnp.float32) * 0.02),
        "proj_b": (jax.random.normal(k_b, (1, n_embed),
                                     dtype=jnp.float32) * 0.02),
        # nn.Embedding(n_embed, embedding_dim).weight
        "embed_w": jax.random.normal(k_e, (n_embed, embedding_dim),
                                     dtype=jnp.float32),
    }

    z = jax.random.normal(k_x, (B, num_hiddens, H, W), dtype=jnp.float32)

    z_q, diff = gumbel_quantize_forward(
        z, params, k_g, n_embed=n_embed, embedding_dim=embedding_dim,
        num_hiddens=num_hiddens, tau=1.0)
    jax.block_until_ready((z_q, diff))

    assert z_q.shape == (B, embedding_dim, H, W)
    assert diff.shape == ()
    assert bool(jnp.isfinite(diff))
    assert bool(jnp.all(jnp.isfinite(z_q)))
    print("KERNEL_OK")
</pallas_src>

<mosaic_0001>
module attributes {stable_mosaic.version = 11 : i64} {
  func.func @kernel(%arg0: i32, %arg1: memref<512x32xbf16, #tpu.memory_space<vmem>>, %arg2: memref<512x64xbf16, #tpu.memory_space<vmem>>, %arg3: memref<32x64xbf16, #tpu.memory_space<vmem>>, %arg4: memref<1x64xf32, #tpu.memory_space<vmem>>, %arg5: memref<64x16xf32, #tpu.memory_space<vmem>>, %arg6: memref<512x16xf32, #tpu.memory_space<vmem>>, %arg7: memref<512x1xf32, #tpu.memory_space<vmem>>) attributes {dimension_semantics = [#tpu.dimension_semantics<parallel>], iteration_bounds = array<i64: 1>, scalar_prefetch = 0 : i64, scratch_operands = 0 : i64, tpu.core_type = #tpu.core_type<tc>, window_params = [{transform_indices = @transform_0, window_bounds = array<i64: 512, 32>}, {transform_indices = @transform_1, window_bounds = array<i64: 512, 64>}, {pipeline_mode = #tpu.pipeline_mode<synchronous>, transform_indices = @transform_2, window_bounds = array<i64: 32, 64>}, {pipeline_mode = #tpu.pipeline_mode<synchronous>, transform_indices = @transform_3, window_bounds = array<i64: 1, 64>}, {pipeline_mode = #tpu.pipeline_mode<synchronous>, transform_indices = @transform_4, window_bounds = array<i64: 64, 16>}, {transform_indices = @transform_5, window_bounds = array<i64: 512, 16>}, {transform_indices = @transform_6, window_bounds = array<i64: 512, 1>}]} {
    %c0 = arith.constant 0 : index
    %c0_0 = arith.constant 0 : index
    %0 = vector.load %arg1[%c0, %c0_0] : memref<512x32xbf16, #tpu.memory_space<vmem>>, vector<512x32xbf16>
    %c0_1 = arith.constant 0 : index
    %c0_2 = arith.constant 0 : index
    %1 = vector.load %arg3[%c0_1, %c0_2] : memref<32x64xbf16, #tpu.memory_space<vmem>>, vector<32x64xbf16>
    %cst = arith.constant dense<0.000000e+00> : vector<512x64xf32>
    %2 = tpu.matmul %0, %1, %cst {dimension_numbers = #tpu.dot_dimension_numbers<[1], [0], [0], [1], [0, 0, 1, 1], [], []>} : vector<512x32xbf16>, vector<32x64xbf16>, vector<512x64xf32> -> vector<512x64xf32>
    %c0_3 = arith.constant 0 : index
    %c0_4 = arith.constant 0 : index
    %3 = vector.load %arg4[%c0_3, %c0_4] : memref<1x64xf32, #tpu.memory_space<vmem>>, vector<1x64xf32>
    %4 = vector.broadcast %3 : vector<1x64xf32> to vector<512x64xf32>
    %5 = arith.addf %2, %4 : vector<512x64xf32>
    %c0_5 = arith.constant 0 : index
    %c0_6 = arith.constant 0 : index
    %6 = vector.load %arg2[%c0_5, %c0_6] : memref<512x64xbf16, #tpu.memory_space<vmem>>, vector<512x64xbf16>
    %7 = arith.extf %6 : vector<512x64xbf16> to vector<512x64xf32>
    %8 = arith.addf %5, %7 : vector<512x64xf32>
    %cst_7 = arith.constant 1.000000e+00 : f32
    %9 = vector.broadcast %cst_7 : f32 to vector<512x64xf32>
    %10 = arith.mulf %8, %9 : vector<512x64xf32>
    %cst_8 = arith.constant dense<0xFF800000> : vector<512xf32>
    %11 = vector.multi_reduction <maximumf>, %10, %cst_8 [1] : vector<512x64xf32> to vector<512xf32>
    %12 = vector.shape_cast %11 : vector<512xf32> to vector<512x1xf32>
    %13 = vector.broadcast %12 : vector<512x1xf32> to vector<512x64xf32>
    %14 = arith.cmpf oeq, %10, %13 : vector<512x64xf32>
    %15 = arith.extui %14 : vector<512x64xi1> to vector<512x64xi32>
    %16 = arith.sitofp %15 : vector<512x64xi32> to vector<512x64xf32>
    %c0_9 = arith.constant 0 : index
    %c0_10 = arith.constant 0 : index
    %17 = vector.load %arg5[%c0_9, %c0_10] : memref<64x16xf32, #tpu.memory_space<vmem>>, vector<64x16xf32>
    %cst_11 = arith.constant dense<0.000000e+00> : vector<512x16xf32>
    %18 = tpu.matmul %16, %17, %cst_11 {dimension_numbers = #tpu.dot_dimension_numbers<[1], [0], [0], [1], [0, 0, 1, 1], [], []>} : vector<512x64xf32>, vector<64x16xf32>, vector<512x16xf32> -> vector<512x16xf32>
    %c0_12 = arith.constant 0 : index
    %c0_13 = arith.constant 0 : index
    %19 = vector.load %arg6[%c0_12, %c0_13] : memref<512x16xf32, #tpu.memory_space<vmem>>, vector<512x16xf32>
    tpu.vector_store %arg6[%c0_12, %c0_13], %18 {strides = array<i32>} : memref<512x16xf32, #tpu.memory_space<vmem>>, vector<512x16xf32>,
    %cst_14 = arith.constant dense<0xFF800000> : vector<512xf32>
    %20 = vector.multi_reduction <maximumf>, %5, %cst_14 [1] : vector<512x64xf32> to vector<512xf32>
    %21 = vector.shape_cast %20 : vector<512xf32> to vector<512x1xf32>
    %22 = vector.broadcast %21 : vector<512x1xf32> to vector<512x64xf32>
    %23 = arith.subf %5, %22 : vector<512x64xf32>
    %24 = math.exp %23 : vector<512x64xf32>
    %cst_15 = arith.constant dense<0.000000e+00> : vector<512xf32>
    %25 = vector.multi_reduction <add>, %24, %cst_15 [1] : vector<512x64xf32> to vector<512xf32>
    %26 = vector.shape_cast %25 : vector<512xf32> to vector<512x1xf32>
    %27 = arith.mulf %24, %23 : vector<512x64xf32>
    %cst_16 = arith.constant dense<0.000000e+00> : vector<512xf32>
    %28 = vector.multi_reduction <add>, %27, %cst_16 [1] : vector<512x64xf32> to vector<512xf32>
    %29 = vector.shape_cast %28 : vector<512xf32> to vector<512x1xf32>
    %30 = tpu.reciprocal %26 {approx = true} : vector<512x1xf32> -> vector<512x1xf32>
    %31 = arith.mulf %29, %30 : vector<512x1xf32>
    %32 = math.log %26 : vector<512x1xf32>
    %33 = arith.subf %31, %32 : vector<512x1xf32>
    %cst_17 = arith.constant 4.15888309 : f32
    %34 = vector.broadcast %cst_17 : f32 to vector<512x1xf32>
    %35 = arith.addf %33, %34 : vector<512x1xf32>
    %c0_18 = arith.constant 0 : index
    %c0_19 = arith.constant 0 : index
    %36 = vector.load %arg7[%c0_18, %c0_19] : memref<512x1xf32, #tpu.memory_space<vmem>>, vector<512x1xf32>
    tpu.vector_store %arg7[%c0_18, %c0_19], %35 {strides = array<i32>} : memref<512x1xf32, #tpu.memory_space<vmem>>, vector<512x1xf32>,
    return
  }
  func.func @transform_0(%arg0: i32) -> (i32, i32) {
    %c0_i32 = arith.constant 0 : i32
    %c0_i32_0 = arith.constant 0 : i32
    return %arg0, %c0_i32 : i32, i32
  }
  func.func @transform_1(%arg0: i32) -> (i32, i32) {
    %c0_i32 = arith.constant 0 : i32
    %c0_i32_0 = arith.constant 0 : i32
    return %arg0, %c0_i32 : i32, i32
  }
  func.func @transform_2(%arg0: i32) -> (i32, i32) {
    %c0_i32 = arith.constant 0 : i32
    %c0_i32_0 = arith.constant 0 : i32
    %c0_i32_1 = arith.constant 0 : i32
    return %c0_i32, %c0_i32_0 : i32, i32
  }
  func.func @transform_3(%arg0: i32) -> (i32, i32) {
    %c0_i32 = arith.constant 0 : i32
    %c0_i32_0 = arith.constant 0 : i32
    %c0_i32_1 = arith.constant 0 : i32
    return %c0_i32, %c0_i32_0 : i32, i32
  }
  func.func @transform_4(%arg0: i32) -> (i32, i32) {
    %c0_i32 = arith.constant 0 : i32
    %c0_i32_0 = arith.constant 0 : i32
    %c0_i32_1 = arith.constant 0 : i32
    return %c0_i32, %c0_i32_0 : i32, i32
  }
  func.func @transform_5(%arg0: i32) -> (i32, i32) {
    %c0_i32 = arith.constant 0 : i32
    %c0_i32_0 = arith.constant 0 : i32
    return %arg0, %c0_i32 : i32, i32
  }
  func.func @transform_6(%arg0: i32) -> (i32, i32) {
    %c0_i32 = arith.constant 0 : i32
    %c0_i32_0 = arith.constant 0 : i32
    return %arg0, %c0_i32 : i32, i32
  }
}

</mosaic_0001>

<bundles_post_ra>
// kernel: tpu_custom_call.1
= control target key start
LH: loop header
LB: loop body
LE: loop exit
PB: predicated region body
PF: predicated region fallthrough
CT: control target
= control target key end

     0   :  { %vm270_vm0 = vcmask 261120   ;;  %vm848_vm1 = vcmask 523264   ;;  %s6753_s2 = inlined_call_operand.vmem [shape: bf16[32,64], index: 2, kind: input, shape index: {}]   ;;  %s6754_s0 = inlined_call_operand.vmem [shape: bf16[512,32], index: 0, kind: input, shape index: {}]   ;;  %s6755_s1 = inlined_call_operand.vmem [shape: bf16[512,64], index: 1, kind: input, shape index: {}]   ;;  %s6756_s3 = inlined_call_operand.vmem [shape: f32[1,64], index: 3, kind: input, shape index: {}]   ;;  %s6757_s4 = inlined_call_operand.vmem [shape: f32[64,16], index: 4, kind: input, shape index: {}]   ;;  %s6758_s5 = inlined_call_operand.vmem [shape: f32[512,16], index: 5, kind: output, shape index: {0}]   ;;  %s6759_s6 = inlined_call_operand.vmem [shape: f32[512,1], index: 6, kind: output, shape index: {1}]  }
   0x1   :  { %v3837_v0 = vld [vmem:[%s6753_s2] sm:$0xff]   ;;  %v3838_v1 = vld [vmem:[%s6753_s2 + $0x8] sm:$0xff]   ;;  %v3841_v4 = vld [vmem:[%s6754_s0 + $0x10] sm:$0xff]  }
   0x2   :  { %3632 = vmatprep.subr.bf16.mxu0 %v3837_v0  ;;  %v3839_v2 = vld [vmem:[%s6754_s0] sm:$0xff]   ;;  %v3840_v3 = vld [vmem:[%s6754_s0 + $0x8] sm:$0xff]   ;;  %v3842_v5 = vld [vmem:[%s6754_s0 + $0x18] sm:$0xff]  }
   0x3   :  { %3633 = vmatpush3.bf16.msra.mxu0 %v3837_v0  ;;  %3636 = vmatprep.mubr.msk.bf16.mxu0 %vm270_vm0, %v3839_v2  ;;  %v3843_v6 = vld [vmem:[%s6754_s0 + $0x20] sm:$0xff]   ;;  %v3844_v7 = vld [vmem:[%s6754_s0 + $0x28] sm:$0xff]   ;;  %v3845_v8 = vld [vmem:[%s6754_s0 + $0x30] sm:$0xff]  }
   0x4   :  { %3634 = vmatprep.subr.bf16.mxu0 %v3838_v1  ;;  %v3846_v9 = vld [vmem:[%s6754_s0 + $0x38] sm:$0xff]   ;;  %v3847_v10 = vld [vmem:[%s6754_s0 + $0x40] sm:$0xff]   ;;  %v3848_v11 = vld [vmem:[%s6754_s0 + $0x48] sm:$0xff]  }
   0x5   :  { %v3849_v12 = vld [vmem:[%s6754_s0 + $0x50] sm:$0xff]   ;;  %v3850_v13 = vld [vmem:[%s6754_s0 + $0x58] sm:$0xff]   ;;  %v3851_v14 = vld [vmem:[%s6754_s0 + $0x60] sm:$0xff]  }
   0x6   :  { %v3852_v15 = vld [vmem:[%s6754_s0 + $0x68] sm:$0xff]   ;;  %v3853_v16 = vld [vmem:[%s6754_s0 + $0x70] sm:$0xff]   ;;  %v3854_v17 = vld [vmem:[%s6754_s0 + $0x78] sm:$0xff]  }
   0x7   :  { %3635 = vmatpush3.bf16.msra.mxu0 %v3838_v1  ;;  %v3855_v18 = vld [vmem:[%s6754_s0 + $0x80] sm:$0xff]   ;;  %v3856_v19 = vld [vmem:[%s6754_s0 + $0x88] sm:$0xff]   ;;  %v3857_v20 = vld [vmem:[%s6754_s0 + $0x90] sm:$0xff]  }
   0x8   :  { %v3858_v21 = vld [vmem:[%s6754_s0 + $0x98] sm:$0xff]   ;;  %v3859_v22 = vld [vmem:[%s6754_s0 + $0xa0] sm:$0xff]   ;;  %v3860_v23 = vld [vmem:[%s6754_s0 + $0xa8] sm:$0xff]  }
   0x9   :  { %v3861_v24 = vld [vmem:[%s6754_s0 + $0xb0] sm:$0xff]   ;;  %v3862_v25 = vld [vmem:[%s6754_s0 + $0xb8] sm:$0xff]   ;;  %v3863_v26 = vld [vmem:[%s6754_s0 + $0xc0] sm:$0xff]  }
   0xa   :  { %3637 = vmatmul.mubr.msk.bf16.vlgmr.msra.gmra.mrb[0].mxu0 %vm270_vm0, %v3840_v3  ;;  %v3864_v27 = vld [vmem:[%s6754_s0 + $0xc8] sm:$0xff]   ;;  %v3865_v28 = vld [vmem:[%s6754_s0 + $0xd0] sm:$0xff]   ;;  %v3866_v29 = vld [vmem:[%s6754_s0 + $0xd8] sm:$0xff]  }
   0xb   :  { %3640 = vmatprep.mubr.msk.bf16.mxu0 %vm270_vm0, %v3841_v4  ;;  %v3867_v30 = vld [vmem:[%s6754_s0 + $0xe0] sm:$0xff]   ;;  %v3868_v31 = vld [vmem:[%s6754_s0 + $0xe8] sm:$0xff]   ;;  %v3869_v32 = vld [vmem:[%s6754_s0 + $0xf0] sm:$0xff]  }
   0xc   :  { %v3870_v33 = vld [vmem:[%s6754_s0 + $0xf8] sm:$0xff]   ;;  %v3495_v34 = vld [vmem:[%s6755_s1 + $0x8] sm:$0xff]   ;;  %v4432_v35 = vld [vmem:[%s6756_s3] ss:$0 sm:$0xff] }
   0xd   :  { %v3373_v36 = vunpack.c.l.bf16 %v3495_v34  ;;  %v3368_v38 = vld [vmem:[%s6755_s1] sm:$0xff]   ;;  %v3374_v56 = vunpack.c.h.bf16 %v3495_v34  ;;  %v1234_v1 = vld [vmem:[%s6757_s4 + $0x8] sm:$0xff]  ;;  %v3497_v4 = vld [vmem:[%s6755_s1 + $0x18] sm:$0xff]  }
   0xe   :  { %v3369_v46 = vunpack.c.l.bf16 %v3368_v38  ;;  %v3370_v52 = vunpack.c.h.bf16 %v3368_v38  ;;  %v1233_v0 = vld [vmem:[%s6757_s4] sm:$0xff] }
   0xf   :  { %v3812_v2 = vpack.c.bf16 %v1234_v1, %v1233_v0 }
  0x11   :  { %3813 = vmatprep.subr.bf16.mxu0 %v3812_v2  ;;  %3828 = vmatprep.subr.bf16.mxu1 %v3812_v2 }
  0x12   :  { %3641 = vmatmul.mubr.msk.bf16.gmra.mrb[4].mxu0 %vm270_vm0, %v3842_v5  ;;  %3832 = vmatpush3.bf16.msra.mxu1 %v3812_v2 }
  0x13   :  { %3644 = vmatprep.mubr.msk.bf16.mxu0 %vm270_vm0, %v3843_v6  ;;  %3815 = vmatpush3.bf16.msra.mxu0 %v3812_v2 }
  0x1a   :  { %3645 = vmatmul.mubr.msk.bf16.gmra.mrb[8].mxu0 %vm270_vm0, %v3844_v7 }
  0x1b   :  { %3648 = vmatprep.mubr.msk.bf16.mxu0 %vm270_vm0, %v3845_v8 }
  0x22   :  { %3649 = vmatmul.mubr.msk.bf16.gmra.mrb[12].mxu0 %vm270_vm0, %v3846_v9 }
  0x23   :  { %3652 = vmatprep.mubr.msk.bf16.mxu0 %vm270_vm0, %v3847_v10  ;;  %v1235_v10 = vld [vmem:[%s6757_s4 + $0x10] sm:$0xff] }
  0x2a   :  { %3653 = vmatmul.mubr.msk.bf16.gmra.mrb[16].mxu0 %vm270_vm0, %v3848_v11  ;;  %v1236_v11 = vld [vmem:[%s6757_s4 + $0x18] sm:$0xff] }
  0x2b   :  { %3656 = vmatprep.mubr.msk.bf16.mxu0 %vm270_vm0, %v3849_v12 }
  0x32   :  { %3657 = vmatmul.mubr.msk.bf16.gmra.mrb[20].mxu0 %vm270_vm0, %v3850_v13  ;;  %v3816_v13 = vpack.c.bf16 %v1236_v11, %v1235_v10 }
  0x33   :  { %3660 = vmatprep.mubr.msk.bf16.mxu0 %vm270_vm0, %v3851_v14 }
  0x34   :  { %3817 = vmatprep.subr.bf16.mxu0 %v3816_v13  ;;  %3829 = vmatprep.subr.bf16.mxu1 %v3816_v13 }
  0x35   :  { %3819 = vmatpush3.bf16.msra.mxu0 %v3816_v13  ;;  %3833 = vmatpush3.bf16.msra.mxu1 %v3816_v13 }
  0x3a   :  { %3661 = vmatmul.mubr.msk.bf16.gmra.mrb[24].mxu0 %vm270_vm0, %v3852_v15  ;;  %v3381_v15 = vunpack.c.l.bf16 %v3497_v4 }
  0x3b   :  { %3664 = vmatprep.mubr.msk.bf16.mxu0 %vm270_vm0, %v3853_v16 }
  0x42   :  { %3665 = vmatmul.mubr.msk.bf16.gmra.mrb[28].mxu0 %vm270_vm0, %v3854_v17  ;;  %v3496_v17 = vld [vmem:[%s6755_s1 + $0x10] sm:$0xff]  }
  0x43   :  { %3668 = vmatprep.mubr.msk.bf16.mxu0 %vm270_vm0, %v3855_v18 }
  0x4a   :  { %3669 = vmatmul.mubr.msk.bf16.gmra.mrb[32].mxu0 %vm270_vm0, %v3856_v19 }
  0x4b   :  { %3672 = vmatprep.mubr.msk.bf16.mxu0 %vm270_vm0, %v3857_v20  ;;  %v3382_v20 = vunpack.c.h.bf16 %v3497_v4 }
  0x52   :  { %3673 = vmatmul.mubr.msk.bf16.gmra.mrb[36].mxu0 %vm270_vm0, %v3858_v21  ;;  %v1237_v21 = vld [vmem:[%s6757_s4 + $0x20] sm:$0xff] }
  0x53   :  { %3676 = vmatprep.mubr.msk.bf16.mxu0 %vm270_vm0, %v3859_v22  ;;  %v1238_v22 = vld [vmem:[%s6757_s4 + $0x28] sm:$0xff] }
  0x5a   :  { %3677 = vmatmul.mubr.msk.bf16.gmra.mrb[40].mxu0 %vm270_vm0, %v3860_v23  ;;  %v3820_v23 = vpack.c.bf16 %v1238_v22, %v1237_v21  ;;  %v3501_v22 = vld [vmem:[%s6755_s1 + $0x38] sm:$0xff]  }
  0x5b   :  { %3680 = vmatprep.mubr.msk.bf16.mxu0 %vm270_vm0, %v3861_v24 }
  0x5c   :  { %3821 = vmatprep.subr.bf16.mxu0 %v3820_v23  ;;  %3830 = vmatprep.subr.bf16.mxu1 %v3820_v23 }
  0x5d   :  { %3823 = vmatpush3.bf16.msra.mxu0 %v3820_v23  ;;  %3834 = vmatpush3.bf16.msra.mxu1 %v3820_v23 }
  0x62   :  { %3681 = vmatmul.mubr.msk.bf16.gmra.mrb[44].mxu0 %vm270_vm0, %v3862_v25 }
  0x63   :  { %3684 = vmatprep.mubr.msk.bf16.mxu0 %vm270_vm0, %v3863_v26  ;;  %v3377_v26 = vunpack.c.l.bf16 %v3496_v17 }
  0x6a   :  { %3685 = vmatmul.mubr.msk.bf16.gmra.mrb[48].mxu0 %vm270_vm0, %v3864_v27 }
  0x6b   :  { %3688 = vmatprep.mubr.msk.bf16.mxu0 %vm270_vm0, %v3865_v28 }
  0x72   :  { %3689 = vmatmul.mubr.msk.bf16.gmra.mrb[52].mxu0 %vm270_vm0, %v3866_v29 }
  0x73   :  { %3692 = vmatprep.mubr.msk.bf16.mxu0 %vm270_vm0, %v3867_v30  ;;  %v3378_v30 = vunpack.c.h.bf16 %v3496_v17 }
  0x7a   :  { %3693 = vmatmul.mubr.msk.bf16.gmra.mrb[56].mxu0 %vm270_vm0, %v3868_v31 }
  0x7b   :  { %3696 = vmatprep.mubr.msk.bf16.mxu0 %vm270_vm0, %v3869_v32  ;;  %v1239_v32 = vld [vmem:[%s6757_s4 + $0x30] sm:$0xff] }
  0x82   :  { %3697 = vmatmul.mubr.msk.bf16.gmra.mrb[60].mxu0 %vm270_vm0, %v3870_v33  ;;  %v1240_v33 = vld [vmem:[%s6757_s4 + $0x38] sm:$0xff] }
  0xdd   :  { %v3638_v37 = vpop.f32.mrb[0].mxu0 }
  0xde   :  { %v4438_v39 = vadd.f32 %v3638_v37, %v4432_v35  ;;  %v401_v40 = vpop.f32.mrb[1].mxu0 }
  0xdf   :  { %v3639_v41 = vpop.f32.mrb[2].mxu0  ;;  %v4441_v42 = vadd.f32 %v4432_v35, %v401_v40 }
  0xe0   :  { %6857 = vst [vmem:[#allocation2_spill] sm:$0xff] %v4438_v39  ;;  %v404_v43 = vpop.f32.mrb[3].mxu0  ;;  %v1889_v44 = vsel %vm848_vm1, %v4438_v39, -inf  ;;  %v4446_v45 = vadd.f32 %v3373_v36, %v4438_v39  ;;  %v4449_v47 = vadd.f32 %v3639_v41, %v4432_v35  ;;  %v3824_v36 = vpack.c.bf16 %v1240_v33, %v1239_v32 }
  0xe1   :  { %6858 = vst [vmem:[#allocation3_spill] sm:$0xff] %v4441_v42  ;;  %1890 = vmax.xlane.f32.xlu0 %v1889_v44  ;;  %v4454_v49 = vadd.f32 %v4432_v35, %v404_v43  ;;  %v1883_v50 = vsel %vm848_vm1, %v4441_v42, -inf  ;;  %v4459_v51 = vadd.f32 %v3369_v46, %v4441_v42  ;;  %v3397_v33 = vunpack.c.l.bf16 %v3501_v22 }
  0xe2   :  { %6859 = vst [vmem:[#allocation4_spill] sm:$0xff] %v4449_v47  ;;  %v855_v48 = vsel %vm848_vm1, %v4446_v45, -inf  ;;  %v1892_v54 = vsel %vm848_vm1, %v4449_v47, -inf  ;;  %v4474_v63 = vadd.f32 %v3374_v56, %v4449_v47  ;;  %3825 = vmatprep.subr.bf16.mxu0 %v3824_v36  ;;  %3831 = vmatprep.subr.bf16.mxu1 %v3824_v36 }
  0xe3   :  { %856 = vmax.xlane.f32.xlu1 %v855_v48  ;;  %6860 = vst [vmem:[#allocation5_spill] sm:$0xff] %v4454_v49  ;;  %v849_v58 = vsel %vm848_vm1, %v4459_v51, -inf  ;;  %v4466_v60 = vadd.f32 %v3370_v52, %v4454_v49  ;;  %v1886_v62 = vsel %vm848_vm1, %v4454_v49, -inf  ;;  %3827 = vmatpush3.bf16.msra.mxu0 %v3824_v36  ;;  %v3499_v48 = vld [vmem:[%s6755_s1 + $0x28] sm:$0xff]  }
  0xe4   :  { %v858_v7 = vsel %vm848_vm1, %v4474_v63, -inf  ;;  %3835 = vmatpush3.bf16.msra.mxu1 %v3824_v36  ;;  %v3390_v2 = vunpack.c.h.bf16 %v3499_v48 }
  0xe5   :  { %1884 = vmax.xlane.f32.xlu0 %v1883_v50  ;;  %v3642_v53 = vpop.f32.mrb[4].mxu0  ;;  %v852_v3 = vsel %vm848_vm1, %v4466_v60, -inf }
  0xe6   :  { %v417_v55 = vpop.f32.mrb[5].mxu0  ;;  %v4469_v61 = vadd.f32 %v3642_v53, %v4432_v35 }
  0xe7   :  { %1893 = vmax.xlane.f32.xlu1 %v1892_v54  ;;  %v3643_v57 = vpop.f32.mrb[6].mxu0  ;;  %v4503_v14 = vadd.f32 %v4432_v35, %v417_v55 }
  0xe8   :  { %v420_v59 = vpop.f32.mrb[7].mxu0  ;;  %6861 = vst [vmem:[#allocation6_spill] sm:$0xff] %v4469_v61  ;;  %v4488_v6 = vadd.f32 %v3643_v57, %v4432_v35  ;;  %v1901_v8 = vsel %vm848_vm1, %v4469_v61, -inf  ;;  %v4522_v25 = vadd.f32 %v3381_v15, %v4469_v61 }
  0xe9   :  { %850 = vmax.xlane.f32.xlu0 %v849_v58  ;;  %6863 = vst [vmem:[#allocation8_spill] sm:$0xff] %v4503_v14  ;;  %v4509_v18 = vadd.f32 %v4432_v35, %v420_v59  ;;  %v1895_v24 = vsel %vm848_vm1, %v4503_v14, -inf  ;;  %v4540_v38 = vadd.f32 %v3377_v26, %v4503_v14  ;;  %v3389_v58 = vunpack.c.l.bf16 %v3499_v48 }
  0xea   :  { %6862 = vst [vmem:[#allocation7_spill] sm:$0xff] %v4488_v6  ;;  %v1904_v19 = vsel %vm848_vm1, %v4488_v6, -inf  ;;  %v4527_v29 = vadd.f32 %v3382_v20, %v4488_v6  ;;  %v867_v37 = vsel %vm848_vm1, %v4522_v25, -inf }
  0xeb   :  { %1887 = vmax.xlane.f32.xlu1 %v1886_v62  ;;  %6864 = vst [vmem:[#allocation9_spill] sm:$0xff] %v4509_v18  ;;  %v1898_v28 = vsel %vm848_vm1, %v4509_v18, -inf  ;;  %v4550_v44 = vadd.f32 %v3378_v30, %v4509_v18  ;;  %v861_v46 = vsel %vm848_vm1, %v4540_v38, -inf  ;;  %v3498_v62 = vld [vmem:[%s6755_s1 + $0x20] sm:$0xff]  }
  0xec   :  { %v870_v43 = vsel %vm848_vm1, %v4527_v29, -inf  ;;  %v3386_v10 = vunpack.c.h.bf16 %v3498_v62 }
  0xed   :  { %853 = vmax.xlane.f32.xlu0 %v852_v3  ;;  %v3646_v5 = vpop.f32.mrb[8].mxu0  ;;  %v864_v53 = vsel %vm848_vm1, %v4550_v44, -inf }
  0xee   :  { %v4494_v9 = vpop.f32.mrb[9].mxu0  ;;  %v4545_v41 = vadd.f32 %v3646_v5, %v4432_v35  ;;  %v3385_v5 = vunpack.c.l.bf16 %v3498_v62 }
  0xef   :  { %859 = vmax.xlane.f32.xlu1 %v858_v7  ;;  %v3647_v12 = vpop.f32.mrb[10].mxu0  ;;  %v4572_v57 = vadd.f32 %v4432_v35, %v4494_v9 }
  0xf0   :  { %v436_v16 = vpop.f32.mrb[11].mxu0  ;;  %6865 = vst [vmem:[#allocation10_spill] sm:$0xff] %v4545_v41  ;;  %v4560_v52 = vadd.f32 %v3647_v12, %v4432_v35  ;;  %v1913_v54 = vsel %vm848_vm1, %v4545_v41, -inf  ;;  %v4587_v4 = vadd.f32 %v3389_v58, %v4545_v41 }
  0xf1   :  { %1902 = vmax.xlane.f32.xlu0 %v1901_v8  ;;  %6867 = vst [vmem:[#allocation12_spill] sm:$0xff] %v4572_v57  ;;  %v4580_v0 = vadd.f32 %v4432_v35, %v436_v16  ;;  %v1907_v3 = vsel %vm848_vm1, %v4572_v57, -inf  ;;  %v4603_v15 = vadd.f32 %v3385_v5, %v4572_v57 }
  0xf2   :  { %6866 = vst [vmem:[#allocation11_spill] sm:$0xff] %v4560_v52  ;;  %v1916_v1 = vsel %vm848_vm1, %v4560_v52, -inf  ;;  %v4594_v9 = vadd.f32 %v3390_v2, %v4560_v52  ;;  %v879_v13 = vsel %vm848_vm1, %v4587_v4, -inf }
  0xf3   :  { %1905 = vmax.xlane.f32.xlu1 %v1904_v19  ;;  %6868 = vst [vmem:[#allocation13_spill] sm:$0xff] %v4580_v0  ;;  %v1910_v8 = vsel %vm848_vm1, %v4580_v0, -inf  ;;  %v4613_v20 = vadd.f32 %v3386_v10, %v4580_v0  ;;  %v873_v21 = vsel %vm848_vm1, %v4603_v15, -inf }
  0xf4   :  { %v882_v19 = vsel %vm848_vm1, %v4594_v9, -inf }
  0xf5   :  { %1896 = vmax.xlane.f32.xlu0 %v1895_v24  ;;  %v3650_v27 = vpop.f32.mrb[12].mxu0  ;;  %v876_v26 = vsel %vm848_vm1, %v4613_v20, -inf }
  0xf6   :  { %v4529_v31 = vpop.f32.mrb[13].mxu0  ;;  %v4608_v17 = vadd.f32 %v3650_v27, %v4432_v35 }
  0xf7   :  { %1899 = vmax.xlane.f32.xlu1 %v1898_v28  ;;  %v3651_v34 = vpop.f32.mrb[14].mxu0  ;;  %v4635_v32 = vadd.f32 %v4432_v35, %v4529_v31 }
  0xf8   :  { %v4542_v40 = vpop.f32.mrb[15].mxu0  ;;  %6869 = vst [vmem:[#allocation14_spill] sm:$0xff] %v4608_v17  ;;  %v4623_v24 = vadd.f32 %v3651_v34, %v4432_v35  ;;  %v1925_v27 = vsel %vm848_vm1, %v4608_v17, -inf  ;;  %v3500_v34 = vld [vmem:[%s6755_s1 + $0x30] sm:$0xff]   ;;  %v4651_v48 = vadd.f32 %v3397_v33, %v4608_v17 }
  0xf9   :  { %868 = vmax.xlane.f32.xlu0 %v867_v37  ;;  %6871 = vst [vmem:[#allocation16_spill] sm:$0xff] %v4635_v32  ;;  %v4644_v37 = vadd.f32 %v4432_v35, %v4542_v40  ;;  %v1919_v31 = vsel %vm848_vm1, %v4635_v32, -inf  ;;  %v3394_v62 = vunpack.c.h.bf16 %v3500_v34 }
  0xfa   :  { %6870 = vst [vmem:[#allocation15_spill] sm:$0xff] %v4623_v24 }
  0xfb   :  { %871 = vmax.xlane.f32.xlu1 %v870_v43  ;;  %6872 = vst [vmem:[#allocation17_spill] sm:$0xff] %v4644_v37  ;;  %v1928_v43 = vsel %vm848_vm1, %v4623_v24, -inf  ;;  %v1922_v58 = vsel %vm848_vm1, %v4644_v37, -inf }
  0xfd   :  { %862 = vmax.xlane.f32.xlu0 %v861_v46  ;;  %v4557_v50 = vpop.f32.mrb[16].mxu0  ;;  %v3398_v46 = vunpack.c.h.bf16 %v3501_v22  ;;  %v3503_v22 = vld [vmem:[%s6755_s1 + $0x48] sm:$0xff]  }
  0xfe   :  { %v4566_v55 = vpop.f32.mrb[17].mxu0  ;;  %v4673_v10 = vadd.f32 %v4557_v50, %v4432_v35 }
  0xff   :  { %865 = vmax.xlane.f32.xlu1 %v864_v53  ;;  %v4568_v56 = vpop.f32.mrb[18].mxu0  ;;  %v3393_v53 = vunpack.c.l.bf16 %v3500_v34  ;;  %v4658_v40 = vadd.f32 %v3398_v46, %v4623_v24  ;;  %v4701_v46 = vadd.f32 %v4432_v35, %v4566_v55 }
 0x100   :  { %v4574_v59 = vpop.f32.mrb[19].mxu0  ;;  %6873 = vst [vmem:[#allocation18_spill] sm:$0xff] %v4673_v10  ;;  %v4689_v50 = vadd.f32 %v4568_v56, %v4432_v35  ;;  %v1937_v33 = vsel %vm848_vm1, %v4673_v10, -inf  ;;  %v3502_v56 = vld [vmem:[%s6755_s1 + $0x40] sm:$0xff]  }
 0x101   :  { %1914 = vmax.xlane.f32.xlu0 %v1913_v54  ;;  %v4667_v5 = vadd.f32 %v3393_v53, %v4635_v32  ;;  %6875 = vst [vmem:[#allocation20_spill] sm:$0xff] %v4701_v46  ;;  %v1931_v55 = vsel %vm848_vm1, %v4701_v46, -inf }
 0x102   :  { %6874 = vst [vmem:[#allocation19_spill] sm:$0xff] %v4689_v50 }
 0x103   :  { %1917 = vmax.xlane.f32.xlu1 %v1916_v1 }
 0x105   :  { %1908 = vmax.xlane.f32.xlu0 %v1907_v3  ;;  %v4589_v7 = vpop.f32.mrb[20].mxu0  ;;  %v891_v3 = vsel %vm848_vm1, %v4651_v48, -inf }
 0x106   :  { %v4596_v11 = vpop.f32.mrb[21].mxu0 }
 0x107   :  { %1911 = vmax.xlane.f32.xlu1 %v1910_v8  ;;  %v4598_v12 = vpop.f32.mrb[22].mxu0 }
 0x108   :  { %v4605_v16 = vpop.f32.mrb[23].mxu0 }
 0x109   :  { %880 = vmax.xlane.f32.xlu0 %v879_v13  ;;  %v894_v13 = vsel %vm848_vm1, %v4658_v40, -inf  ;;  %v4776_v17 = vadd.f32 %v4432_v35, %v4605_v16 }
 0x10b   :  { %883 = vmax.xlane.f32.xlu1 %v882_v19  ;;  %v4678_v19 = vadd.f32 %v3394_v62, %v4644_v37  ;;  %v1940_v62 = vsel %vm848_vm1, %v4689_v50, -inf  ;;  %v3402_v37 = vunpack.c.h.bf16 %v3502_v56  ;;  %6880 = vst [vmem:[#allocation25_spill] sm:$0xff] %v4776_v17  ;;  %v1946_v41 = vsel %vm848_vm1, %v4776_v17, -inf }
 0x10d   :  { %874 = vmax.xlane.f32.xlu0 %v873_v21  ;;  %v4620_v23 = vpop.f32.mrb[24].mxu0  ;;  %v885_v21 = vsel %vm848_vm1, %v4667_v5, -inf }
 0x10e   :  { %v4629_v28 = vpop.f32.mrb[25].mxu0 }
 0x10f   :  { %877 = vmax.xlane.f32.xlu1 %v876_v26  ;;  %v4631_v30 = vpop.f32.mrb[26].mxu0 }
 0x110   :  { %v4637_v36 = vpop.f32.mrb[27].mxu0 }
 0x111   :  { %1926 = vmax.xlane.f32.xlu0 %v1925_v27  ;;  %v888_v27 = vsel %vm848_vm1, %v4678_v19, -inf  ;;  %v4842_v61 = vadd.f32 %v4432_v35, %v4637_v36 }
 0x113   :  { %1929 = vmax.xlane.f32.xlu1 %v1928_v43  ;;  %6888 = vst [vmem:[#allocation33_spill] sm:$0xff] %v4842_v61 }
 0x115   :  { %1920 = vmax.xlane.f32.xlu0 %v1919_v31  ;;  %v4653_v54 = vpop.f32.mrb[28].mxu0  ;;  %v3405_v31 = vunpack.c.l.bf16 %v3503_v22 }
 0x116   :  { %v4660_v1 = vpop.f32.mrb[29].mxu0 }
 0x117   :  { %1923 = vmax.xlane.f32.xlu1 %v1922_v58  ;;  %v4662_v2 = vpop.f32.mrb[30].mxu0  ;;  %v4710_v58 = vadd.f32 %v4432_v35, %v4574_v59 }
 0x118   :  { %v4669_v8 = vpop.f32.mrb[31].mxu0 }
 0x119   :  { %892 = vmax.xlane.f32.xlu0 %v891_v3  ;;  %6876 = vst [vmem:[#allocation21_spill] sm:$0xff] %v4710_v58  ;;  %v3406_v3 = vunpack.c.h.bf16 %v3503_v22 }
 0x11b   :  { %895 = vmax.xlane.f32.xlu1 %v894_v13  ;;  %v4717_v13 = vadd.f32 %v3405_v31, %v4673_v10  ;;  %v4724_v59 = vadd.f32 %v3406_v3, %v4689_v50  ;;  %v4739_v10 = vadd.f32 %v4589_v7, %v4432_v35  ;;  %v4744_v3 = vadd.f32 %v3402_v37, %v4710_v58 }
 0x11c   :  { %v4755_v7 = vadd.f32 %v4598_v12, %v4432_v35  ;;  %v3504_v12 = vld [vmem:[%s6755_s1 + $0x50] sm:$0xff]  }
 0x11d   :  { %886 = vmax.xlane.f32.xlu0 %v885_v21  ;;  %v4685_v26 = vpop.f32.mrb[32].mxu0  ;;  %v3401_v21 = vunpack.c.l.bf16 %v3502_v56  ;;  %v903_v31 = vsel %vm848_vm1, %v4717_v13, -inf  ;;  %6877 = vst [vmem:[#allocation22_spill] sm:$0xff] %v4739_v10  ;;  %v906_v56 = vsel %vm848_vm1, %v4724_v59, -inf  ;;  %v1949_v37 = vsel %vm848_vm1, %v4739_v10, -inf }
 0x11e   :  { %v4695_v34 = vpop.f32.mrb[33].mxu0  ;;  %6878 = vst [vmem:[#allocation23_spill] sm:$0xff] %v4755_v7  ;;  %v3410_v18 = vunpack.c.h.bf16 %v3504_v12 }
 0x11f   :  { %889 = vmax.xlane.f32.xlu1 %v888_v27  ;;  %v4697_v43 = vpop.f32.mrb[34].mxu0 }
 0x120   :  { %v4703_v53 = vpop.f32.mrb[35].mxu0 }
 0x121   :  { %1938 = vmax.xlane.f32.xlu0 %v1937_v33  ;;  %v1934_v33 = vsel %vm848_vm1, %v4710_v58, -inf  ;;  %v4767_v58 = vadd.f32 %v4432_v35, %v4596_v11 }
 0x123   :  { %1941 = vmax.xlane.f32.xlu1 %v1940_v62  ;;  %v4733_v62 = vadd.f32 %v3401_v21, %v4701_v46  ;;  %v3505_v21 = vld [vmem:[%s6755_s1 + $0x58] sm:$0xff]   ;;  %v900_v46 = vsel %vm848_vm1, %v4744_v3, -inf  ;;  %6879 = vst [vmem:[#allocation24_spill] sm:$0xff] %v4767_v58  ;;  %v1943_v11 = vsel %vm848_vm1, %v4767_v58, -inf }
 0x124   :  { %v3413_v50 = vunpack.c.l.bf16 %v3505_v21  ;;  %v3414_v0 = vunpack.c.h.bf16 %v3505_v21 }
 0x125   :  { %1932 = vmax.xlane.f32.xlu0 %v1931_v55  ;;  %v4719_v27 = vpop.f32.mrb[36].mxu0 }
 0x126   :  { %v4726_v32 = vpop.f32.mrb[37].mxu0  ;;  %v4783_v57 = vadd.f32 %v3413_v50, %v4739_v10  ;;  %v4790_v16 = vadd.f32 %v3414_v0, %v4755_v7  ;;  %v4805_v10 = vadd.f32 %v4620_v23, %v4432_v35  ;;  %v4821_v23 = vadd.f32 %v4631_v30, %v4432_v35  ;;  %v3506_v30 = vld [vmem:[%s6755_s1 + $0x60] sm:$0xff]  }
 0x127   :  { %1935 = vmax.xlane.f32.xlu1 %v1934_v33  ;;  %v4728_v22 = vpop.f32.mrb[38].mxu0  ;;  %v897_v33 = vsel %vm848_vm1, %v4733_v62, -inf  ;;  %v3418_v47 = vunpack.c.h.bf16 %v3506_v30 }
 0x128   :  { %v4735_v55 = vpop.f32.mrb[39].mxu0  ;;  %6881 = vst [vmem:[#allocation26_spill] sm:$0xff] %v4783_v57  ;;  %6882 = vst [vmem:[#allocation27_spill] sm:$0xff] %v4790_v16  ;;  %v915_v50 = vsel %vm848_vm1, %v4783_v57, -inf  ;;  %v918_v0 = vsel %vm848_vm1, %v4790_v16, -inf }
 0x129   :  { %904 = vmax.xlane.f32.xlu0 %v903_v31  ;;  %6884 = vst [vmem:[#allocation29_spill] sm:$0xff] %v4805_v10  ;;  %6886 = vst [vmem:[#allocation31_spill] sm:$0xff] %v4821_v23 }
 0x12b   :  { %907 = vmax.xlane.f32.xlu1 %v906_v56 }
 0x12d   :  { %898 = vmax.xlane.f32.xlu0 %v897_v33  ;;  %v4751_v31 = vpop.f32.mrb[40].mxu0 }
 0x12e   :  { %v4761_v56 = vpop.f32.mrb[41].mxu0 }
 0x12f   :  { %901 = vmax.xlane.f32.xlu1 %v900_v46  ;;  %v4763_v33 = vpop.f32.mrb[42].mxu0  ;;  %v1952_v46 = vsel %vm848_vm1, %v4755_v7, -inf }
 0x130   :  { %v4769_v24 = vpop.f32.mrb[43].mxu0 }
 0x131   :  { %1950 = vmax.xlane.f32.xlu0 %v1949_v37  ;;  %v3409_v37 = vunpack.c.l.bf16 %v3504_v12 }
 0x133   :  { %1953 = vmax.xlane.f32.xlu1 %v1952_v46  ;;  %v4799_v46 = vadd.f32 %v3409_v37, %v4767_v58  ;;  %v3507_v37 = vld [vmem:[%s6755_s1 + $0x68] sm:$0xff]  }
 0x134   :  { %v3421_v7 = vunpack.c.l.bf16 %v3507_v37  ;;  %v3422_v49 = vunpack.c.h.bf16 %v3507_v37 }
 0x135   :  { %1944 = vmax.xlane.f32.xlu0 %v1943_v11  ;;  %v4785_v52 = vpop.f32.mrb[44].mxu0  ;;  %6883 = vst [vmem:[#allocation28_spill] sm:$0xff] %v4799_v46  ;;  %v909_v12 = vsel %vm848_vm1, %v4799_v46, -inf }
 0x136   :  { %v4792_v14 = vpop.f32.mrb[45].mxu0  ;;  %v4849_v16 = vadd.f32 %v3421_v7, %v4805_v10  ;;  %v4856_v36 = vadd.f32 %v3422_v49, %v4821_v23 }
 0x137   :  { %1947 = vmax.xlane.f32.xlu1 %v1946_v41  ;;  %v4794_v21 = vpop.f32.mrb[46].mxu0  ;;  %v4810_v41 = vadd.f32 %v3410_v18, %v4776_v17  ;;  %v1961_v18 = vsel %vm848_vm1, %v4805_v10, -inf  ;;  %v4833_v17 = vadd.f32 %v4432_v35, %v4629_v28  ;;  %v4871_v10 = vadd.f32 %v4653_v54, %v4432_v35 }
 0x138   :  { %v4801_v11 = vpop.f32.mrb[47].mxu0  ;;  %6889 = vst [vmem:[#allocation34_spill] sm:$0xff] %v4849_v16  ;;  %6890 = vst [vmem:[#allocation35_spill] sm:$0xff] %v4856_v36  ;;  %v927_v7 = vsel %vm848_vm1, %v4849_v16, -inf  ;;  %v930_v49 = vsel %vm848_vm1, %v4856_v36, -inf  ;;  %v4887_v54 = vadd.f32 %v4662_v2, %v4432_v35  ;;  %v3508_v2 = vld [vmem:[%s6755_s1 + $0x70] sm:$0xff]  }
 0x139   :  { %916 = vmax.xlane.f32.xlu0 %v915_v50  ;;  %6885 = vst [vmem:[#allocation30_spill] sm:$0xff] %v4810_v41  ;;  %v912_v58 = vsel %vm848_vm1, %v4810_v41, -inf  ;;  %6887 = vst [vmem:[#allocation32_spill] sm:$0xff] %v4833_v17  ;;  %v1955_v28 = vsel %vm848_vm1, %v4833_v17, -inf  ;;  %v1958_v41 = vsel %vm848_vm1, %v4842_v61, -inf }
 0x13a   :  { %6892 = vst [vmem:[#allocation37_spill] sm:$0xff] %v4871_v10  ;;  %6894 = vst [vmem:[#allocation39_spill] sm:$0xff] %v4887_v54 }
 0x13b   :  { %919 = vmax.xlane.f32.xlu1 %v918_v0 }
 0x13d   :  { %910 = vmax.xlane.f32.xlu0 %v909_v12  ;;  %v4817_v50 = vpop.f32.mrb[48].mxu0 }
 0x13e   :  { %v4827_v0 = vpop.f32.mrb[49].mxu0 }
 0x13f   :  { %913 = vmax.xlane.f32.xlu1 %v912_v58  ;;  %v4829_v12 = vpop.f32.mrb[50].mxu0  ;;  %v1964_v58 = vsel %vm848_vm1, %v4821_v23, -inf }
 0x140   :  { %v4835_v6 = vpop.f32.mrb[51].mxu0 }
 0x141   :  { %1962 = vmax.xlane.f32.xlu0 %v1961_v18  ;;  %v3417_v18 = vunpack.c.l.bf16 %v3506_v30 }
 0x143   :  { %1965 = vmax.xlane.f32.xlu1 %v1964_v58  ;;  %v4865_v58 = vadd.f32 %v3417_v18, %v4833_v17  ;;  %v3509_v18 = vld [vmem:[%s6755_s1 + $0x78] sm:$0xff]  }
 0x144   :  { %v3429_v23 = vunpack.c.l.bf16 %v3509_v18  ;;  %v3430_v16 = vunpack.c.h.bf16 %v3509_v18 }
 0x145   :  { %1956 = vmax.xlane.f32.xlu0 %v1955_v28  ;;  %v4851_v42 = vpop.f32.mrb[52].mxu0  ;;  %6891 = vst [vmem:[#allocation36_spill] sm:$0xff] %v4865_v58  ;;  %v921_v30 = vsel %vm848_vm1, %v4865_v58, -inf }
 0x146   :  { %v4858_v57 = vpop.f32.mrb[53].mxu0  ;;  %v4915_v58 = vadd.f32 %v3429_v23, %v4871_v10 }
 0x147   :  { %1959 = vmax.xlane.f32.xlu1 %v1958_v41  ;;  %v4860_v37 = vpop.f32.mrb[54].mxu0  ;;  %v4876_v41 = vadd.f32 %v3418_v47, %v4842_v61  ;;  %v1973_v47 = vsel %vm848_vm1, %v4871_v10, -inf  ;;  %v4899_v61 = vadd.f32 %v4432_v35, %v4660_v1  ;;  %v4937_v10 = vadd.f32 %v4685_v26, %v4432_v35 }
 0x148   :  { %v4867_v28 = vpop.f32.mrb[55].mxu0  ;;  %v939_v23 = vsel %vm848_vm1, %v4915_v58, -inf }
 0x149   :  { %928 = vmax.xlane.f32.xlu0 %v927_v7  ;;  %6893 = vst [vmem:[#allocation38_spill] sm:$0xff] %v4876_v41  ;;  %v924_v17 = vsel %vm848_vm1, %v4876_v41, -inf  ;;  %6896 = vst [vmem:[#allocation41_spill] sm:$0xff] %v4899_v61  ;;  %v4908_v41 = vadd.f32 %v4432_v35, %v4669_v8  ;;  %v1967_v1 = vsel %vm848_vm1, %v4899_v61, -inf  ;;  %v4922_v8 = vadd.f32 %v3430_v16, %v4887_v54 }
 0x14a   :  { %6900 = vst [vmem:[#allocation45_spill] sm:$0xff] %v4937_v10 }
 0x14b   :  { %931 = vmax.xlane.f32.xlu1 %v930_v49  ;;  %6898 = vst [vmem:[#allocation43_spill] sm:$0xff] %v4908_v41  ;;  %v1970_v39 = vsel %vm848_vm1, %v4908_v41, -inf  ;;  %6899 = vst [vmem:[#allocation44_spill] sm:$0xff] %v4922_v8  ;;  %v942_v16 = vsel %vm848_vm1, %v4922_v8, -inf }
 0x14d   :  { %922 = vmax.xlane.f32.xlu0 %v921_v30  ;;  %v4883_v7 = vpop.f32.mrb[56].mxu0 }
 0x14e   :  { %v4893_v49 = vpop.f32.mrb[57].mxu0 }
 0x14f   :  { %6895 = vst [vmem:[#allocation40_spill] sm:$0xff] %v4893_v49  ;;  %925 = vmax.xlane.f32.xlu1 %v924_v17  ;;  %v4895_v30 = vpop.f32.mrb[58].mxu0  ;;  %v1976_v17 = vsel %vm848_vm1, %v4887_v54, -inf }
 0x150   :  { %v4901_v36 = vpop.f32.mrb[59].mxu0 }
 0x151   :  { %6897 = vst [vmem:[#allocation42_spill] sm:$0xff] %v4901_v36  ;;  %1974 = vmax.xlane.f32.xlu0 %v1973_v47  ;;  %v3425_v47 = vunpack.c.l.bf16 %v3508_v2  ;;  %v3426_v36 = vunpack.c.h.bf16 %v3508_v2 }
 0x153   :  { %1977 = vmax.xlane.f32.xlu1 %v1976_v17  ;;  %v4931_v17 = vadd.f32 %v3425_v47, %v4899_v61  ;;  %v3511_v47 = vld [vmem:[%s6755_s1 + $0x88] sm:$0xff]  }
 0x154   :  { %v3438_v54 = vunpack.c.h.bf16 %v3511_v47 }
 0x155   :  { %1968 = vmax.xlane.f32.xlu0 %v1967_v1  ;;  %v4917_v46 = vpop.f32.mrb[60].mxu0  ;;  %v933_v2 = vsel %vm848_vm1, %v4931_v17, -inf }
 0x156   :  { %v4924_v49 = vpop.f32.mrb[61].mxu0 }
 0x157   :  { %1971 = vmax.xlane.f32.xlu1 %v1970_v39  ;;  %v4926_v18 = vpop.f32.mrb[62].mxu0  ;;  %v4942_v39 = vadd.f32 %v3426_v36, %v4908_v41  ;;  %v1985_v36 = vsel %vm848_vm1, %v4937_v10, -inf  ;;  %v3510_v41 = vld [vmem:[%s6755_s1 + $0x80] sm:$0xff]  }
 0x158   :  { %v4933_v1 = vpop.f32.mrb[63].mxu0 }
 0x159   :  { %940 = vmax.xlane.f32.xlu0 %v939_v23  ;;  %6901 = vst [vmem:[#allocation46_spill] sm:$0xff] %v4942_v39  ;;  %v4951_v23 = vadd.f32 %v4697_v43, %v4432_v35  ;;  %v936_v26 = vsel %vm848_vm1, %v4942_v39, -inf  ;;  %v4966_v43 = vadd.f32 %v4432_v35, %v4703_v53  ;;  %v3434_v53 = vunpack.c.h.bf16 %v3510_v41 }
 0x15b   :  { %943 = vmax.xlane.f32.xlu1 %v942_v16  ;;  %6902 = vst [vmem:[#allocation47_spill] sm:$0xff] %v4951_v23  ;;  %v4959_v16 = vadd.f32 %v4432_v35, %v4695_v34  ;;  %6904 = vst [vmem:[#allocation49_spill] sm:$0xff] %v4966_v43  ;;  %v1988_v61 = vsel %vm848_vm1, %v4951_v23, -inf  ;;  %v1982_v8 = vsel %vm848_vm1, %v4966_v43, -inf  ;;  %v4978_v39 = vadd.f32 %v3438_v54, %v4951_v23  ;;  %v3513_v54 = vld [vmem:[%s6755_s1 + $0x98] sm:$0xff]  }
 0x15d   :  { %934 = vmax.xlane.f32.xlu0 %v933_v2  ;;  %6903 = vst [vmem:[#allocation48_spill] sm:$0xff] %v4959_v16  ;;  %v3437_v2 = vunpack.c.l.bf16 %v3511_v47  ;;  %6906 = vst [vmem:[#allocation51_spill] sm:$0xff] %v4978_v39 }
 0x15f   :  { %937 = vmax.xlane.f32.xlu1 %v936_v26  ;;  %v1979_v26 = vsel %vm848_vm1, %v4959_v16, -inf  ;;  %v4973_v34 = vadd.f32 %v3437_v2, %v4937_v10  ;;  %v4987_v2 = vadd.f32 %v4719_v27, %v4432_v35  ;;  %v4992_v10 = vadd.f32 %v3434_v53, %v4966_v43 }
 0x160   :  { %v5019_v43 = vadd.f32 %v4432_v35, %v4735_v55 }
 0x161   :  { %1986 = vmax.xlane.f32.xlu0 %v1985_v36  ;;  %6905 = vst [vmem:[#allocation50_spill] sm:$0xff] %v4973_v34  ;;  %v3433_v36 = vunpack.c.l.bf16 %v3510_v41  ;;  %v951_v47 = vsel %vm848_vm1, %v4973_v34, -inf  ;;  %6908 = vst [vmem:[#allocation53_spill] sm:$0xff] %v4987_v2  ;;  %v1997_v53 = vsel %vm848_vm1, %v4987_v2, -inf }
 0x162   :  { %6909 = vst [vmem:[#allocation54_spill] sm:$0xff] %v4992_v10  ;;  %6912 = vst [vmem:[#allocation57_spill] sm:$0xff] %v5019_v43 }
 0x163   :  { %1989 = vmax.xlane.f32.xlu1 %v1988_v61  ;;  %v4983_v61 = vadd.f32 %v3433_v36, %v4959_v16  ;;  %v948_v36 = vsel %vm848_vm1, %v4992_v10, -inf }
 0x165   :  { %1980 = vmax.xlane.f32.xlu0 %v1979_v26  ;;  %6907 = vst [vmem:[#allocation52_spill] sm:$0xff] %v4983_v61  ;;  %v954_v26 = vsel %vm848_vm1, %v4978_v39, -inf  ;;  %v945_v41 = vsel %vm848_vm1, %v4983_v61, -inf  ;;  %v3446_v39 = vunpack.c.h.bf16 %v3513_v54 }
 0x167   :  { %1983 = vmax.xlane.f32.xlu1 %v1982_v8  ;;  %v5001_v8 = vadd.f32 %v4728_v22, %v4432_v35  ;;  %v3512_v22 = vld [vmem:[%s6755_s1 + $0x90] sm:$0xff]  }
 0x169   :  { %952 = vmax.xlane.f32.xlu0 %v951_v47  ;;  %6910 = vst [vmem:[#allocation55_spill] sm:$0xff] %v5001_v8  ;;  %v5011_v47 = vadd.f32 %v4432_v35, %v4726_v32  ;;  %v2000_v32 = vsel %vm848_vm1, %v5001_v8, -inf  ;;  %v5037_v34 = vadd.f32 %v3446_v39, %v5001_v8  ;;  %v5051_v39 = vadd.f32 %v4751_v31, %v4432_v35  ;;  %v3515_v31 = vld [vmem:[%s6755_s1 + $0xa8] sm:$0xff]  }
 0x16b   :  { %955 = vmax.xlane.f32.xlu1 %v954_v26  ;;  %6911 = vst [vmem:[#allocation56_spill] sm:$0xff] %v5011_v47  ;;  %6914 = vst [vmem:[#allocation59_spill] sm:$0xff] %v5037_v34 }
 0x16c   :  { %6916 = vst [vmem:[#allocation60_spill] sm:$0xff] %v5051_v39 }
 0x16d   :  { %946 = vmax.xlane.f32.xlu0 %v945_v41  ;;  %v3445_v41 = vunpack.c.l.bf16 %v3513_v54  ;;  %v3442_v54 = vunpack.c.h.bf16 %v3512_v22 }
 0x16e   :  { %v5003_v27 = vpop.xlane.xlu0 %1890 }
 0x16f   :  { %949 = vmax.xlane.f32.xlu1 %v948_v36  ;;  %v6809_v36 = vmov 0.0   ;;  %v5032_v55 = vadd.f32 %v3445_v41, %v4987_v2 }
 0x170   :  { %v857_v26 = vpop.xlane.xlu1 %856 }
 0x171   :  { %1998 = vmax.xlane.f32.xlu0 %v1997_v53  ;;  %vm1043_vm2 = vcmp.eq.f32.partialorder %v4446_v45, %v857_v26  ;;  %v1991_v53 = vsel %vm848_vm1, %v5011_v47, -inf  ;;  %6913 = vst [vmem:[#allocation58_spill] sm:$0xff] %v5032_v55  ;;  %v3441_v26 = vunpack.c.l.bf16 %v3512_v22  ;;  %v963_v41 = vsel %vm848_vm1, %v5032_v55, -inf }
 0x172   :  { %v5021_v16 = vpop.xlane.xlu0 %1884  ;;  %v3241_v23 = vsel %vm1043_vm2, 1.0, %v6809_v36  ;;  %v1994_v36 = vsel %vm848_vm1, %v5019_v43, -inf }
 0x173   :  { %3719 = vmatprep.mubr.msk.f32.mxu1 %vm848_vm1, %v3241_v23  ;;  %2001 = vmax.xlane.f32.xlu1 %v2000_v32  ;;  %v6915_v23 = vmov 0.0  }
 0x174   :  { %v5027_v45 = vpop.xlane.xlu1 %1893 }
 0x175   :  { %1992 = vmax.xlane.f32.xlu0 %v1991_v53  ;;  %v5046_v53 = vadd.f32 %v3441_v26, %v5011_v47 }
 0x176   :  { %v851_v10 = vpop.xlane.xlu0 %850 }
 0x177   :  { %vm1041_vm3 = vcmp.eq.f32.partialorder %v4459_v51, %v851_v10  ;;  %1995 = vmax.xlane.f32.xlu1 %v1994_v36  ;;  %v966_v51 = vsel %vm848_vm1, %v5037_v34, -inf  ;;  %v5056_v10 = vadd.f32 %v3442_v54, %v5019_v43  ;;  %v5069_v54 = vadd.f32 %v4763_v33, %v4432_v35 }
 0x178   :  { %v3239_v32 = vsel %vm1041_vm3, 1.0, %v6915_v23  ;;  %v5041_v61 = vpop.xlane.xlu1 %1887  ;;  %v3453_v33 = vunpack.c.l.bf16 %v3515_v31 }
 0x179   :  { %964 = vmax.xlane.f32.xlu0 %v963_v41  ;;  %3716 = vmatprep.mubr.msk.f32.mxu0 %vm848_vm1, %v3239_v32  ;;  %6917 = vst [vmem:[#allocation61_spill] sm:$0xff] %v5056_v10  ;;  %v957_v32 = vsel %vm848_vm1, %v5046_v53, -inf  ;;  %6918 = vst [vmem:[#allocation62_spill] sm:$0xff] %v5069_v54 }
 0x17a   :  { %v854_v22 = vpop.xlane.xlu0 %853  ;;  %v5101_v47 = vadd.f32 %v3453_v33, %v5051_v39  ;;  %v5115_v33 = vadd.f32 %v4785_v52, %v4432_v35  ;;  %v3517_v52 = vld [vmem:[%s6755_s1 + $0xb8] sm:$0xff]  }
 0x17b   :  { %vm1042_vm4 = vcmp.eq.f32.partialorder %v4466_v60, %v854_v22  ;;  %967 = vmax.xlane.f32.xlu1 %v966_v51  ;;  %v960_v22 = vsel %vm848_vm1, %v5056_v10, -inf  ;;  %v5081_v51 = vadd.f32 %v4432_v35, %v4761_v56 }
 0x17c   :  { %v3240_v36 = vsel %vm1042_vm4, 1.0, %v6915_v23  ;;  %v860_v26 = vpop.xlane.xlu1 %859  ;;  %6921 = vst [vmem:[#allocation65_spill] sm:$0xff] %v5115_v33 }
 0x17d   :  { %vm1044_vm5 = vcmp.eq.f32.partialorder %v4474_v63, %v860_v26  ;;  %958 = vmax.xlane.f32.xlu0 %v957_v32  ;;  %3717 = vmatmul.mubr.msk.f32.vlgmr.msra.gmra.mrb[64].mxu0 %vm848_vm1, %v3240_v36  ;;  %v2009_v63 = vsel %vm848_vm1, %v5051_v39, -inf  ;;  %6919 = vst [vmem:[#allocation63_spill] sm:$0xff] %v5081_v51  ;;  %v3514_v26 = vld [vmem:[%s6755_s1 + $0xa0] sm:$0xff]   ;;  %v5090_v32 = vadd.f32 %v4432_v35, %v4769_v24 }
 0x17e   :  { %v3242_v60 = vsel %vm1044_vm5, 1.0, %v6915_v23  ;;  %v5072_v41 = vpop.xlane.xlu0 %1902  ;;  %v3449_v8 = vunpack.c.l.bf16 %v3514_v26  ;;  %v3450_v10 = vunpack.c.h.bf16 %v3514_v26 }
 0x17f   :  { %961 = vmax.xlane.f32.xlu1 %v960_v22  ;;  %3720 = vmatmul.mubr.msk.f32.vlgmr.msra.gmra.mrb[0].mxu1 %vm848_vm1, %v3242_v60  ;;  %6920 = vst [vmem:[#allocation64_spill] sm:$0xff] %v5090_v32  ;;  %v2012_v60 = vsel %vm848_vm1, %v5069_v54, -inf  ;;  %v3454_v22 = vunpack.c.h.bf16 %v3515_v31  ;;  %v2006_v24 = vsel %vm848_vm1, %v5090_v32, -inf }
 0x180   :  { %v5083_v36 = vpop.xlane.xlu1 %1905  ;;  %v5111_v55 = vadd.f32 %v3449_v8, %v5081_v51 }
 0x181   :  { %2010 = vmax.xlane.f32.xlu0 %v2009_v63  ;;  %v2003_v63 = vsel %vm848_vm1, %v5081_v51, -inf  ;;  %v5106_v34 = vadd.f32 %v3454_v22, %v5069_v54  ;;  %v5120_v22 = vadd.f32 %v3450_v10, %v5090_v32 }
 0x182   :  { %v5092_v43 = vpop.xlane.xlu0 %1896 }
 0x183   :  { %2013 = vmax.xlane.f32.xlu1 %v2012_v60  ;;  %v975_v60 = vsel %vm848_vm1, %v5101_v47, -inf  ;;  %v978_v39 = vsel %vm848_vm1, %v5106_v34, -inf }
 0x184   :  { %v5096_v56 = vpop.xlane.xlu1 %1899 }
 0x185   :  { %2004 = vmax.xlane.f32.xlu0 %v2003_v63 }
 0x186   :  { %v869_v2 = vpop.xlane.xlu0 %868 }
 0x187   :  { %2007 = vmax.xlane.f32.xlu1 %v2006_v24  ;;  %vm1047_vm7 = vcmp.eq.f32.partialorder %v4522_v25, %v869_v2  ;;  %v969_v24 = vsel %vm848_vm1, %v5111_v55, -inf }
 0x188   :  { %v872_v31 = vpop.xlane.xlu1 %871  ;;  %v3245_v10 = vsel %vm1047_vm7, 1.0, %v6915_v23 }
 0x189   :  { %976 = vmax.xlane.f32.xlu0 %v975_v60  ;;  %vm1048_vm9 = vcmp.eq.f32.partialorder %v4527_v29, %v872_v31  ;;  %v5159_v29 = vadd.f32 %v4432_v35, %v4801_v11 }
 0x18a   :  { %v863_v63 = vpop.xlane.xlu0 %862 }
 0x18b   :  { %vm1045_vm6 = vcmp.eq.f32.partialorder %v4540_v38, %v863_v63  ;;  %979 = vmax.xlane.f32.xlu1 %v978_v39  ;;  %v5134_v38 = vadd.f32 %v4794_v21, %v4432_v35  ;;  %v972_v39 = vsel %vm848_vm1, %v5120_v22, -inf  ;;  %v5148_v21 = vadd.f32 %v4432_v35, %v4792_v14  ;;  %6924 = vst [vmem:[#allocation68_spill] sm:$0xff] %v5159_v29 }
 0x18c   :  { %v3243_v8 = vsel %vm1045_vm6, 1.0, %v6915_v23  ;;  %v866_v26 = vpop.xlane.xlu1 %865  ;;  %v3461_v63 = vunpack.c.l.bf16 %v3517_v52  ;;  %v2018_v32 = vsel %vm848_vm1, %v5159_v29, -inf }
 0x18d   :  { %vm1046_vm8 = vcmp.eq.f32.partialorder %v4550_v44, %v866_v26  ;;  %970 = vmax.xlane.f32.xlu0 %v969_v24  ;;  %3722 = vmatprep.mubr.msk.f32.mxu1 %vm848_vm1, %v3243_v8  ;;  %6922 = vst [vmem:[#allocation66_spill] sm:$0xff] %v5134_v38  ;;  %v2021_v44 = vsel %vm848_vm1, %v5115_v33, -inf  ;;  %6923 = vst [vmem:[#allocation67_spill] sm:$0xff] %v5148_v21  ;;  %v3516_v8 = vld [vmem:[%s6755_s1 + $0xb0] sm:$0xff]   ;;  %v3246_v26 = vsel %vm1048_vm9, 1.0, %v6915_v23  ;;  %v2024_v14 = vsel %vm848_vm1, %v5134_v38, -inf }
 0x18e   :  { %v3244_v25 = vsel %vm1046_vm8, 1.0, %v6915_v23  ;;  %v5137_v2 = vpop.xlane.xlu0 %1914  ;;  %v3462_v24 = vunpack.c.h.bf16 %v3517_v52  ;;  %v3458_v52 = vunpack.c.h.bf16 %v3516_v8 }
 0x18f   :  { %973 = vmax.xlane.f32.xlu1 %v972_v39  ;;  %3723 = vmatmul.mubr.msk.f32.gmra.mrb[2].mxu1 %vm848_vm1, %v3244_v25  ;;  %v2015_v39 = vsel %vm848_vm1, %v5148_v21, -inf }
 0x190   :  { %v5150_v60 = vpop.xlane.xlu1 %1917  ;;  %3725 = vmatprep.mubr.msk.f32.mxu1 %vm848_vm1, %v3245_v10  ;;  %v3457_v10 = vunpack.c.l.bf16 %v3516_v8  ;;  %v5176_v51 = vadd.f32 %v3462_v24, %v5134_v38  ;;  %v5190_v24 = vadd.f32 %v3458_v52, %v5159_v29 }
 0x191   :  { %2022 = vmax.xlane.f32.xlu0 %v2021_v44  ;;  %v5171_v44 = vadd.f32 %v3461_v63, %v5115_v33  ;;  %v5185_v63 = vadd.f32 %v4817_v50, %v4432_v35  ;;  %v3519_v50 = vld [vmem:[%s6755_s1 + $0xc8] sm:$0xff]  }
 0x192   :  { %v5161_v31 = vpop.xlane.xlu0 %1908  ;;  %v5181_v54 = vadd.f32 %v3457_v10, %v5148_v21  ;;  %v990_v33 = vsel %vm848_vm1, %v5176_v51, -inf }
 0x193   :  { %2025 = vmax.xlane.f32.xlu1 %v2024_v14  ;;  %3726 = vmatmul.mubr.msk.f32.gmra.mrb[4].mxu1 %vm848_vm1, %v3246_v26  ;;  %v987_v14 = vsel %vm848_vm1, %v5171_v44, -inf  ;;  %6925 = vst [vmem:[#allocation69_spill] sm:$0xff] %v5185_v63 }
 0x194   :  { %v5166_v25 = vpop.xlane.xlu1 %1911  ;;  %v981_v10 = vsel %vm848_vm1, %v5181_v54, -inf }
 0x195   :  { %2016 = vmax.xlane.f32.xlu0 %v2015_v39 }
 0x196   :  { %v881_v11 = vpop.xlane.xlu0 %880 }
 0x197   :  { %2019 = vmax.xlane.f32.xlu1 %v2018_v32  ;;  %vm1051_vm11 = vcmp.eq.f32.partialorder %v4587_v4, %v881_v11  ;;  %v984_v11 = vsel %vm848_vm1, %v5190_v24, -inf }
 0x198   :  { %v884_v26 = vpop.xlane.xlu1 %883  ;;  %v3249_v52 = vsel %vm1051_vm11, 1.0, %v6915_v23 }
 0x199   :  { %988 = vmax.xlane.f32.xlu0 %v987_v14  ;;  %vm1052_vm13 = vcmp.eq.f32.partialorder %v4594_v9, %v884_v26  ;;  %v3518_v9 = vld [vmem:[%s6755_s1 + $0xc0] sm:$0xff]  }
 0x19a   :  { %v875_v39 = vpop.xlane.xlu0 %874  ;;  %v3250_v26 = vsel %vm1052_vm13, 1.0, %v6915_v23 }
 0x19b   :  { %vm1049_vm10 = vcmp.eq.f32.partialorder %v4603_v15, %v875_v39  ;;  %991 = vmax.xlane.f32.xlu1 %v990_v33  ;;  %v5204_v15 = vadd.f32 %v4829_v12, %v4432_v35  ;;  %v5219_v35 = vld [vmem:[%s6756_s3] ss:$0 sm:$0xff]  ;;  %v3469_v39 = vunpack.c.l.bf16 %v3519_v50 }
 0x19c   :  { %v3247_v32 = vsel %vm1049_vm10, 1.0, %v6915_v23  ;;  %v878_v8 = vpop.xlane.xlu1 %877  ;;  %v5223_v12 = vadd.f32 %v5219_v35, %v4827_v0 }
 0x19d   :  { %vm1050_vm12 = vcmp.eq.f32.partialorder %v4613_v20, %v878_v8  ;;  %982 = vmax.xlane.f32.xlu0 %v981_v10  ;;  %3728 = vmatprep.mubr.msk.f32.mxu1 %vm848_vm1, %v3247_v32  ;;  %6926 = vst [vmem:[#allocation70_spill] sm:$0xff] %v5204_v15  ;;  %v2033_v20 = vsel %vm848_vm1, %v5185_v63, -inf  ;;  %v5234_v32 = vadd.f32 %v5219_v35, %v4835_v6  ;;  %v2036_v0 = vsel %vm848_vm1, %v5204_v15, -inf }
 0x19e   :  { %v3248_v4 = vsel %vm1050_vm12, 1.0, %v6915_v23  ;;  %v5207_v33 = vpop.xlane.xlu0 %1926  ;;  %6927 = vst [vmem:[#allocation71_spill] sm:$0xff] %v5223_v12  ;;  %v3470_v10 = vunpack.c.h.bf16 %v3519_v50  ;;  %v3466_v50 = vunpack.c.h.bf16 %v3518_v9 }
 0x19f   :  { %985 = vmax.xlane.f32.xlu1 %v984_v11  ;;  %3729 = vmatmul.mubr.msk.f32.gmra.mrb[6].mxu1 %vm848_vm1, %v3248_v4  ;;  %6928 = vst [vmem:[#allocation72_spill] sm:$0xff] %v5234_v32  ;;  %v2027_v11 = vsel %vm848_vm1, %v5223_v12, -inf  ;;  %v2030_v29 = vsel %vm848_vm1, %v5234_v32, -inf }
 0x1a0   :  { %v5225_v14 = vpop.xlane.xlu1 %1929  ;;  %3731 = vmatprep.mubr.msk.f32.mxu1 %vm848_vm1, %v3249_v52  ;;  %v3465_v52 = vunpack.c.l.bf16 %v3518_v9  ;;  %v5251_v21 = vadd.f32 %v3470_v10, %v5204_v15  ;;  %v5265_v10 = vadd.f32 %v3466_v50, %v5234_v32 }
 0x1a1   :  { %2034 = vmax.xlane.f32.xlu0 %v2033_v20  ;;  %v5246_v20 = vadd.f32 %v3469_v39, %v5185_v63  ;;  %v5260_v39 = vadd.f32 %v5219_v35, %v4851_v42  ;;  %v3521_v42 = vld [vmem:[%s6755_s1 + $0xd8] sm:$0xff]  }
 0x1a2   :  { %v5236_v8 = vpop.xlane.xlu0 %1920  ;;  %v5256_v38 = vadd.f32 %v3465_v52, %v5223_v12  ;;  %v1002_v63 = vsel %vm848_vm1, %v5251_v21, -inf }
 0x1a3   :  { %2037 = vmax.xlane.f32.xlu1 %v2036_v0  ;;  %3732 = vmatmul.mubr.msk.f32.gmra.mrb[8].mxu1 %vm848_vm1, %v3250_v26  ;;  %v999_v0 = vsel %vm848_vm1, %v5246_v20, -inf  ;;  %6929 = vst [vmem:[#allocation73_spill] sm:$0xff] %v5260_v39 }
 0x1a4   :  { %v5241_v4 = vpop.xlane.xlu1 %1923  ;;  %v993_v52 = vsel %vm848_vm1, %v5256_v38, -inf }
 0x1a5   :  { %2028 = vmax.xlane.f32.xlu0 %v2027_v11 }
 0x1a6   :  { %v893_v6 = vpop.xlane.xlu0 %892 }
 0x1a7   :  { %2031 = vmax.xlane.f32.xlu1 %v2030_v29  ;;  %vm1055_vm15 = vcmp.eq.f32.partialorder %v4651_v48, %v893_v6  ;;  %v996_v6 = vsel %vm848_vm1, %v5265_v10, -inf }
 0x1a8   :  { %v896_v26 = vpop.xlane.xlu1 %895  ;;  %v3253_v50 = vsel %vm1055_vm15, 1.0, %v6915_v23 }
 0x1a9   :  { %1000 = vmax.xlane.f32.xlu0 %v999_v0  ;;  %vm1056_vm2 = vcmp.eq.f32.partialorder %v4658_v40, %v896_v26  ;;  %v5304_v40 = vadd.f32 %v5219_v35, %v4867_v28 }
 0x1aa   :  { %v887_v11 = vpop.xlane.xlu0 %886 }
 0x1ab   :  { %vm1053_vm14 = vcmp.eq.f32.partialorder %v4667_v5, %v887_v11  ;;  %1003 = vmax.xlane.f32.xlu1 %v1002_v63  ;;  %v5279_v5 = vadd.f32 %v5219_v35, %v4860_v37  ;;  %v5293_v37 = vadd.f32 %v5219_v35, %v4858_v57  ;;  %v3477_v11 = vunpack.c.l.bf16 %v3521_v42  ;;  %6932 = vst [vmem:[#allocation76_spill] sm:$0xff] %v5304_v40 }
 0x1ac   :  { %v3251_v29 = vsel %vm1053_vm14, 1.0, %v6915_v23  ;;  %v890_v9 = vpop.xlane.xlu1 %889  ;;  %v2042_v32 = vsel %vm848_vm1, %v5304_v40, -inf }
 0x1ad   :  { %vm1054_vm0 = vcmp.eq.f32.partialorder %v4678_v19, %v890_v9  ;;  %994 = vmax.xlane.f32.xlu0 %v993_v52  ;;  %3734 = vmatprep.mubr.msk.f32.mxu1 %vm848_vm1, %v3251_v29  ;;  %6930 = vst [vmem:[#allocation74_spill] sm:$0xff] %v5279_v5  ;;  %v2045_v19 = vsel %vm848_vm1, %v5260_v39, -inf  ;;  %6931 = vst [vmem:[#allocation75_spill] sm:$0xff] %v5293_v37  ;;  %v3520_v29 = vld [vmem:[%s6755_s1 + $0xd0] sm:$0xff]   ;;  %v3254_v9 = vsel %vm1056_vm2, 1.0, %v6915_v23  ;;  %v2048_v57 = vsel %vm848_vm1, %v5279_v5, -inf }
 0x1ae   :  { %v3252_v48 = vsel %vm1054_vm0, 1.0, %v6915_v23  ;;  %v5282_v63 = vpop.xlane.xlu0 %1938  ;;  %v3478_v52 = vunpack.c.h.bf16 %v3521_v42  ;;  %v3474_v42 = vunpack.c.h.bf16 %v3520_v29 }
 0x1af   :  { %997 = vmax.xlane.f32.xlu1 %v996_v6  ;;  %3735 = vmatmul.mubr.msk.f32.gmra.mrb[10].mxu1 %vm848_vm1, %v3252_v48  ;;  %v2039_v6 = vsel %vm848_vm1, %v5293_v37, -inf }
 0x1b0   :  { %v5295_v0 = vpop.xlane.xlu1 %1941  ;;  %3737 = vmatprep.mubr.msk.f32.mxu1 %vm848_vm1, %v3253_v50  ;;  %v3473_v50 = vunpack.c.l.bf16 %v3520_v29  ;;  %v5321_v12 = vadd.f32 %v3478_v52, %v5279_v5  ;;  %v5335_v52 = vadd.f32 %v3474_v42, %v5304_v40 }
 0x1b1   :  { %2046 = vmax.xlane.f32.xlu0 %v2045_v19  ;;  %v5316_v19 = vadd.f32 %v3477_v11, %v5260_v39  ;;  %v5330_v11 = vadd.f32 %v5219_v35, %v4883_v7  ;;  %v3523_v7 = vld [vmem:[%s6755_s1 + $0xe8] sm:$0xff]  }
 0x1b2   :  { %v5306_v26 = vpop.xlane.xlu0 %1932  ;;  %6934 = vst [vmem:[#allocation78_spill] sm:$0xff] %v5321_v12  ;;  %v5326_v15 = vadd.f32 %v3473_v50, %v5293_v37  ;;  %v1014_v39 = vsel %vm848_vm1, %v5321_v12, -inf  ;;  %6937 = vst [vmem:[#allocation81_spill] sm:$0xff] %v5335_v52 }
 0x1b3   :  { %2049 = vmax.xlane.f32.xlu1 %v2048_v57  ;;  %3738 = vmatmul.mubr.msk.f32.gmra.mrb[12].mxu1 %vm848_vm1, %v3254_v9  ;;  %6933 = vst [vmem:[#allocation77_spill] sm:$0xff] %v5316_v19  ;;  %v1011_v57 = vsel %vm848_vm1, %v5316_v19, -inf  ;;  %6936 = vst [vmem:[#allocation80_spill] sm:$0xff] %v5330_v11 }
 0x1b4   :  { %v5311_v48 = vpop.xlane.xlu1 %1935  ;;  %6935 = vst [vmem:[#allocation79_spill] sm:$0xff] %v5326_v15  ;;  %v1005_v50 = vsel %vm848_vm1, %v5326_v15, -inf }
 0x1b5   :  { %2040 = vmax.xlane.f32.xlu0 %v2039_v6 }
 0x1b6   :  { %v905_v28 = vpop.xlane.xlu0 %904 }
 0x1b7   :  { %2043 = vmax.xlane.f32.xlu1 %v2042_v32  ;;  %vm1059_vm4 = vcmp.eq.f32.partialorder %v4717_v13, %v905_v28  ;;  %v1008_v28 = vsel %vm848_vm1, %v5335_v52, -inf }
 0x1b8   :  { %v908_v9 = vpop.xlane.xlu1 %907  ;;  %v3257_v42 = vsel %vm1059_vm4, 1.0, %v6915_v23 }
 0x1b9   :  { %1012 = vmax.xlane.f32.xlu0 %v1011_v57  ;;  %vm1060_vm6 = vcmp.eq.f32.partialorder %v4724_v59, %v908_v9  ;;  %v6939_v57 = vld [vmem:[#allocation40_spill] sm:$0xff]  ;;  %v6941_v59 = vld [vmem:[#allocation42_spill] sm:$0xff] }
 0x1ba   :  { %v899_v6 = vpop.xlane.xlu0 %898  ;;  %v5374_v9 = vadd.f32 %v5219_v35, %v6941_v59 }
 0x1bb   :  { %vm1057_vm3 = vcmp.eq.f32.partialorder %v4733_v62, %v899_v6  ;;  %1015 = vmax.xlane.f32.xlu1 %v1014_v39  ;;  %v5349_v62 = vadd.f32 %v5219_v35, %v4895_v30  ;;  %v5363_v30 = vadd.f32 %v5219_v35, %v6939_v57  ;;  %v3486_v57 = vunpack.c.h.bf16 %v3523_v7 }
 0x1bc   :  { %v3255_v32 = vsel %vm1057_vm3, 1.0, %v6915_v23  ;;  %v902_v29 = vpop.xlane.xlu1 %901  ;;  %6942 = vst [vmem:[#allocation42_spill] sm:$0xff] %v5374_v9  ;;  %v2054_v5 = vsel %vm848_vm1, %v5374_v9, -inf }
 0x1bd   :  { %vm1058_vm5 = vcmp.eq.f32.partialorder %v4744_v3, %v902_v29  ;;  %1006 = vmax.xlane.f32.xlu0 %v1005_v50  ;;  %3740 = vmatprep.mubr.msk.f32.mxu1 %vm848_vm1, %v3255_v32  ;;  %6938 = vst [vmem:[#allocation82_spill] sm:$0xff] %v5349_v62  ;;  %v2057_v3 = vsel %vm848_vm1, %v5330_v11, -inf  ;;  %6940 = vst [vmem:[#allocation40_spill] sm:$0xff] %v5363_v30  ;;  %v3485_v32 = vunpack.c.l.bf16 %v3523_v7  ;;  %v3522_v29 = vld [vmem:[%s6755_s1 + $0xe0] sm:$0xff]   ;;  %v3258_v50 = vsel %vm1060_vm6, 1.0, %v6915_v23 }
 0x1be   :  { %v3256_v13 = vsel %vm1058_vm5, 1.0, %v6915_v23  ;;  %v5352_v39 = vpop.xlane.xlu0 %1950  ;;  %v3481_v37 = vunpack.c.l.bf16 %v3522_v29  ;;  %v5391_v12 = vadd.f32 %v3486_v57, %v5349_v62  ;;  %v3482_v7 = vunpack.c.h.bf16 %v3522_v29 }
 0x1bf   :  { %1009 = vmax.xlane.f32.xlu1 %v1008_v28  ;;  %3741 = vmatmul.mubr.msk.f32.gmra.mrb[14].mxu1 %vm848_vm1, %v3256_v13  ;;  %v2060_v28 = vsel %vm848_vm1, %v5349_v62, -inf  ;;  %v5386_v40 = vadd.f32 %v3485_v32, %v5330_v11  ;;  %v5400_v32 = vadd.f32 %v5219_v35, %v4917_v46  ;;  %v6949_v62 = vld [vmem:[#allocation28_spill] sm:$0xff] }
 0x1c0   :  { %v5365_v6 = vpop.xlane.xlu1 %1953  ;;  %3743 = vmatprep.mubr.msk.f32.mxu1 %vm848_vm1, %v3257_v42  ;;  %v2051_v42 = vsel %vm848_vm1, %v5363_v30, -inf  ;;  %6944 = vst [vmem:[#allocation84_spill] sm:$0xff] %v5391_v12  ;;  %v5396_v52 = vadd.f32 %v3481_v37, %v5363_v30  ;;  %v1026_v11 = vsel %vm848_vm1, %v5391_v12, -inf  ;;  %v5405_v57 = vadd.f32 %v3482_v7, %v5374_v9  ;;  %v6950_v37 = vld [vmem:[#allocation26_spill] sm:$0xff]  ;;  %v6951_v12 = vld [vmem:[#allocation4_spill] sm:$0xff] }
 0x1c1   :  { %2058 = vmax.xlane.f32.xlu0 %v2057_v3  ;;  %6943 = vst [vmem:[#allocation83_spill] sm:$0xff] %v5386_v40  ;;  %6946 = vst [vmem:[#allocation86_spill] sm:$0xff] %v5400_v32  ;;  %v6952_v7 = vld [vmem:[#allocation30_spill] sm:$0xff] }
 0x1c2   :  { %v5376_v13 = vpop.xlane.xlu0 %1944  ;;  %6945 = vst [vmem:[#allocation85_spill] sm:$0xff] %v5396_v52  ;;  %6947 = vst [vmem:[#allocation87_spill] sm:$0xff] %v5405_v57  ;;  %v1017_v30 = vsel %vm848_vm1, %v5396_v52, -inf }
 0x1c3   :  { %2061 = vmax.xlane.f32.xlu1 %v2060_v28  ;;  %3744 = vmatmul.mubr.msk.f32.gmra.mrb[16].mxu1 %vm848_vm1, %v3258_v50  ;;  %v1023_v28 = vsel %vm848_vm1, %v5386_v40, -inf  ;;  %v5418_v40 = vsub.f32 %v6951_v12, %v5027_v45  ;;  %v1020_v45 = vsel %vm848_vm1, %v5405_v57, -inf  ;;  %v2069_v12 = vsel %vm848_vm1, %v5400_v32, -inf }
 0x1c4   :  { %v5381_v3 = vpop.xlane.xlu1 %1947 }
 0x1c5   :  { %2052 = vmax.xlane.f32.xlu0 %v2051_v42 }
 0x1c6   :  { %v917_v59 = vpop.xlane.xlu0 %916 }
 0x1c7   :  { %2055 = vmax.xlane.f32.xlu1 %v2054_v5  ;;  %v6948_v5 = vld [vmem:[#allocation2_spill] sm:$0xff]  ;;  %vm1063_vm8 = vcmp.eq.f32.partialorder %v6950_v37, %v917_v59 }
 0x1c8   :  { %v920_v50 = vpop.xlane.xlu1 %919  ;;  %v5409_v29 = vsub.f32 %v6948_v5, %v5003_v27  ;;  %v3525_v27 = vld [vmem:[%s6755_s1 + $0xf8] sm:$0xff]   ;;  %v6954_v5 = vld [vmem:[#allocation3_spill] sm:$0xff] }
 0x1c9   :  { %1024 = vmax.xlane.f32.xlu0 %v1023_v28  ;;  %v3493_v57 = vunpack.c.l.bf16 %v3525_v27 }
 0x1ca   :  { %v911_v42 = vpop.xlane.xlu0 %910 }
 0x1cb   :  { %vm1061_vm7 = vcmp.eq.f32.partialorder %v6949_v62, %v911_v42  ;;  %1027 = vmax.xlane.f32.xlu1 %v1026_v11  ;;  %v5427_v11 = vadd.f32 %v5219_v35, %v4926_v18  ;;  %v3261_v18 = vsel %vm1063_vm8, 1.0, %v6915_v23 }
 0x1cc   :  { %v3259_v28 = vsel %vm1061_vm7, 1.0, %v6915_v23  ;;  %v914_v46 = vpop.xlane.xlu1 %913 }
 0x1cd   :  { %vm1062_vm9 = vcmp.eq.f32.partialorder %v6952_v7, %v914_v46  ;;  %1018 = vmax.xlane.f32.xlu0 %v1017_v30  ;;  %3746 = vmatprep.mubr.msk.f32.mxu1 %vm848_vm1, %v3259_v28  ;;  %6953 = vst [vmem:[#allocation2_spill] sm:$0xff] %v5427_v11  ;;  %v2143_v30 = vmul.f32 1.442695, %v5409_v29  ;;  %v5439_v28 = vsub.f32 %v6954_v5, %v5021_v16  ;;  %v6955_v46 = vld [vmem:[#allocation27_spill] sm:$0xff]  ;;  %v2145_v16 = vmul.f32 1.442695, %v5418_v40 }
 0x1ce   :  { %v3260_v62 = vsel %vm1062_vm9, 1.0, %v6915_v23  ;;  %v5430_v42 = vpop.xlane.xlu0 %1962  ;;  %vm1064_vm10 = vcmp.eq.f32.partialorder %v6955_v46, %v920_v50  ;;  %v5448_v7 = vadd.f32 %v5219_v35, %v4924_v49  ;;  %v6957_v5 = vld [vmem:[#allocation5_spill] sm:$0xff]  ;;  %v3524_v50 = vld [vmem:[%s6755_s1 + $0xf0] sm:$0xff]   ;;  %v5464_v49 = vadd.f32 %v5219_v35, %v4933_v1 }
 0x1cf   :  { %1021 = vmax.xlane.f32.xlu1 %v1020_v45  ;;  %3747 = vmatmul.mubr.msk.f32.gmra.mrb[18].mxu1 %vm848_vm1, %v3260_v62  ;;  %v5456_v59 = vsub.f32 %v6957_v5, %v5041_v61  ;;  %v3262_v37 = vsel %vm1064_vm10, 1.0, %v6915_v23  ;;  %v2072_v45 = vsel %vm848_vm1, %v5427_v11, -inf  ;;  %3871 = vpow2.f32 %v2143_v30 }
 0x1d0   :  { %6956 = vst [vmem:[#allocation28_spill] sm:$0xff] %v5448_v7  ;;  %v5450_v9 = vpop.xlane.xlu1 %1965  ;;  %3749 = vmatprep.mubr.msk.f32.mxu1 %vm848_vm1, %v3261_v18  ;;  %6958 = vst [vmem:[#allocation26_spill] sm:$0xff] %v5464_v49  ;;  %v3494_v18 = vunpack.c.h.bf16 %v3525_v27  ;;  %v2139_v61 = vmul.f32 1.442695, %v5439_v28  ;;  %v2063_v46 = vsel %vm848_vm1, %v5448_v7, -inf  ;;  %v5477_v1 = vadd.f32 %v3493_v57, %v5400_v32 }
 0x1d1   :  { %2070 = vmax.xlane.f32.xlu0 %v2069_v12  ;;  %v3489_v35 = vunpack.c.l.bf16 %v3524_v50  ;;  %3873 = vpow2.f32 %v2145_v16  ;;  %v2141_v5 = vmul.f32 1.442695, %v5456_v59  ;;  %v2066_v30 = vsel %vm848_vm1, %v5464_v49, -inf }
 0x1d2   :  { %v5466_v62 = vpop.xlane.xlu0 %1956  ;;  %6959 = vst [vmem:[#allocation4_spill] sm:$0xff] %v5477_v1  ;;  %3875 = vpow2.f32 %v2139_v61  ;;  %v1035_v57 = vsel %vm848_vm1, %v5477_v1, -inf  ;;  %v6964_v61 = vld [vmem:[#allocation36_spill] sm:$0xff] }
 0x1d3   :  { %2073 = vmax.xlane.f32.xlu1 %v2072_v45  ;;  %3750 = vmatmul.mubr.msk.f32.gmra.mrb[20].mxu1 %vm848_vm1, %v3262_v37  ;;  %v5483_v45 = vadd.f32 %v3494_v18, %v5427_v11  ;;  %v3490_v37 = vunpack.c.h.bf16 %v3524_v50  ;;  %v5488_v32 = vadd.f32 %v3489_v35, %v5448_v7  ;;  %3877 = vpow2.f32 %v2141_v5  ;;  %v6963_v50 = vld [vmem:[#allocation6_spill] sm:$0xff]  ;;  %v6966_v11 = vld [vmem:[#allocation7_spill] sm:$0xff] }
 0x1d4   :  { %v5472_v12 = vpop.xlane.xlu1 %1959  ;;  %v5497_v18 = vsub.f32 %v6963_v50, %v5072_v41 }
 0x1d5   :  { %2064 = vmax.xlane.f32.xlu0 %v2063_v46  ;;  %6960 = vst [vmem:[#allocation30_spill] sm:$0xff] %v5483_v45  ;;  %6961 = vst [vmem:[#allocation3_spill] sm:$0xff] %v5488_v32  ;;  %v1038_v46 = vsel %vm848_vm1, %v5483_v45, -inf  ;;  %v5493_v19 = vadd.f32 %v3490_v37, %v5464_v49  ;;  %v5506_v37 = vsub.f32 %v6966_v11, %v5083_v36  ;;  %v6967_v49 = vld [vmem:[#allocation38_spill] sm:$0xff]  ;;  %v6969_v11 = vld [vmem:[#allocation35_spill] sm:$0xff] }
 0x1d6   :  { %v929_v27 = vpop.xlane.xlu0 %928  ;;  %v2151_v50 = vmul.f32 1.442695, %v5497_v18  ;;  %v6970_v45 = vld [vmem:[#allocation9_spill] sm:$0xff] }
 0x1d7   :  { %2067 = vmax.xlane.f32.xlu1 %v2066_v30  ;;  %6962 = vst [vmem:[#allocation27_spill] sm:$0xff] %v5493_v19  ;;  %v6965_v30 = vld [vmem:[#allocation34_spill] sm:$0xff] }
 0x1d8   :  { %v932_v52 = vpop.xlane.xlu1 %931  ;;  %vm1067_vm12 = vcmp.eq.f32.partialorder %v6965_v30, %v929_v27  ;;  %v1032_v27 = vsel %vm848_vm1, %v5493_v19, -inf  ;;  %3879 = vpow2.f32 %v2151_v50 }
 0x1d9   :  { %1036 = vmax.xlane.f32.xlu0 %v1035_v57  ;;  %v1029_v57 = vsel %vm848_vm1, %v5488_v32, -inf  ;;  %v3872_v7 = vpop.eup %3871  ;;  %v3265_v36 = vsel %vm1067_vm12, 1.0, %v6915_v23  ;;  %vm1068_vm14 = vcmp.eq.f32.partialorder %v6969_v11, %v932_v52 }
 0x1da   :  { %v923_v16 = vpop.xlane.xlu0 %922 }
 0x1db   :  { %vm1065_vm11 = vcmp.eq.f32.partialorder %v6964_v61, %v923_v16  ;;  %1039 = vmax.xlane.f32.xlu1 %v1038_v46  ;;  %v3874_v46 = vpop.eup %3873  ;;  %v6968_v61 = vld [vmem:[#allocation8_spill] sm:$0xff] }
 0x1dc   :  { %v3263_v35 = vsel %vm1065_vm11, 1.0, %v6915_v23  ;;  %v926_v5 = vpop.xlane.xlu1 %925  ;;  %v5518_v30 = vsub.f32 %v6968_v61, %v5092_v43  ;;  %v5530_v43 = vsub.f32 %v6970_v45, %v5096_v56  ;;  %v3266_v61 = vsel %vm1068_vm14, 1.0, %v6915_v23 }
 0x1dd   :  { %vm1066_vm13 = vcmp.eq.f32.partialorder %v6967_v49, %v926_v5  ;;  %1030 = vmax.xlane.f32.xlu0 %v1029_v57  ;;  %3752 = vmatprep.mubr.msk.f32.mxu1 %vm848_vm1, %v3263_v35  ;;  %v2273_v35 = vsel %vm848_vm1, %v3872_v7, 0.0  ;;  %v3876_v5 = vpop.eup %3875  ;;  %v2153_v57 = vmul.f32 1.442695, %v5506_v37  ;;  %v2461_v56 = vmul.f32 %v3872_v7, %v5409_v29 }
 0x1de   :  { %v3264_v41 = vsel %vm1066_vm13, 1.0, %v6915_v23  ;;  %v5511_v16 = vpop.xlane.xlu0 %1974  ;;  %v2267_v19 = vsel %vm848_vm1, %v3876_v5, 0.0  ;;  %v2149_v45 = vmul.f32 1.442695, %v5530_v43  ;;  %v2462_v50 = vmul.f32 %v3874_v46, %v5418_v40 }
 0x1df   :  { %1033 = vmax.xlane.f32.xlu1 %v1032_v27  ;;  %3753 = vmatmul.mubr.msk.f32.gmra.mrb[22].mxu1 %vm848_vm1, %v3264_v41  ;;  %v2276_v41 = vsel %vm848_vm1, %v3874_v46, 0.0  ;;  %v3878_v27 = vpop.eup %3877  ;;  %3881 = vpow2.f32 %v2153_v57  ;;  %v2459_v32 = vmul.f32 %v3876_v5, %v5439_v28  ;;  %v6972_v5 = vld [vmem:[#allocation11_spill] sm:$0xff] }
 0x1e0   :  { %v5523_v49 = vpop.xlane.xlu1 %1977  ;;  %3755 = vmatprep.mubr.msk.f32.mxu1 %vm848_vm1, %v3265_v36  ;;  %v2147_v36 = vmul.f32 1.442695, %v5518_v30  ;;  %v2270_v1 = vsel %vm848_vm1, %v3878_v27, 0.0  ;;  %v2532_v29 = vsel %vm848_vm1, %v2462_v50, 0.0  ;;  %v2460_v7 = vmul.f32 %v3878_v27, %v5456_v59  ;;  %v6973_v59 = vld [vmem:[#allocation46_spill] sm:$0xff] }
 0x1e1   :  { %2274 = vadd.xlane.f32.xlu0 %v2273_v35  ;;  %v2523_v28 = vsel %vm848_vm1, %v2459_v32, 0.0  ;;  %v6974_v32 = vld [vmem:[#allocation12_spill] sm:$0xff] }
 0x1e2   :  { %v5533_v52 = vpop.xlane.xlu0 %1968  ;;  %3883 = vpow2.f32 %v2147_v36  ;;  %v3880_v46 = vpop.eup %3879  ;;  %v5559_v36 = vsub.f32 %v6972_v5, %v5150_v60 }
 0x1e3   :  { %2277 = vadd.xlane.f32.xlu1 %v2276_v41  ;;  %3756 = vmatmul.mubr.msk.f32.gmra.mrb[24].mxu1 %vm848_vm1, %v3266_v61  ;;  %v2529_v61 = vsel %vm848_vm1, %v2461_v56, 0.0  ;;  %3885 = vpow2.f32 %v2149_v45  ;;  %v5570_v56 = vsub.f32 %v6974_v32, %v5161_v31  ;;  %v6975_v45 = vld [vmem:[#allocation44_spill] sm:$0xff]  ;;  %v2285_v50 = vsel %vm848_vm1, %v3880_v46, 0.0 }
 0x1e4   :  { %v5538_v11 = vpop.xlane.xlu1 %1971 }
 0x1e5   :  { %2268 = vadd.xlane.f32.xlu0 %v2267_v19  ;;  %v6971_v19 = vld [vmem:[#allocation10_spill] sm:$0xff] }
 0x1e6   :  { %v941_v35 = vpop.xlane.xlu0 %940  ;;  %v5551_v57 = vsub.f32 %v6971_v19, %v5137_v2 }
 0x1e7   :  { %2271 = vadd.xlane.f32.xlu1 %v2270_v1  ;;  %vm1071_vm0 = vcmp.eq.f32.partialorder %v4915_v58, %v941_v35  ;;  %v2526_v58 = vsel %vm848_vm1, %v2460_v7, 0.0  ;;  %v6976_v7 = vld [vmem:[#allocation13_spill] sm:$0xff] }
 0x1e8   :  { %v944_v41 = vpop.xlane.xlu1 %943  ;;  %v2159_v27 = vmul.f32 1.442695, %v5551_v57  ;;  %v3269_v60 = vsel %vm1071_vm0, 1.0, %v6915_v23  ;;  %v5582_v31 = vsub.f32 %v6976_v7, %v5166_v25  ;;  %v2465_v25 = vmul.f32 %v3880_v46, %v5497_v18 }
 0x1e9   :  { %2530 = vadd.xlane.f32.xlu0 %v2529_v61  ;;  %vm1072_vm3 = vcmp.eq.f32.partialorder %v6975_v45, %v944_v41 }
 0x1ea   :  { %v935_v15 = vpop.xlane.xlu0 %934  ;;  %v3270_v19 = vsel %vm1072_vm3, 1.0, %v6915_v23  ;;  %3887 = vpow2.f32 %v2159_v27  ;;  %v2541_v45 = vsel %vm848_vm1, %v2465_v25, 0.0 }
 0x1eb   :  { %vm1069_vm15 = vcmp.eq.f32.partialorder %v4931_v17, %v935_v15  ;;  %2533 = vadd.xlane.f32.xlu1 %v2532_v29  ;;  %v3882_v15 = vpop.eup %3881  ;;  %v2161_v29 = vmul.f32 1.442695, %v5559_v36 }
 0x1ec   :  { %v3267_v40 = vsel %vm1069_vm15, 1.0, %v6915_v23  ;;  %v938_v1 = vpop.xlane.xlu1 %937  ;;  %v3884_v61 = vpop.eup %3883  ;;  %v2466_v27 = vmul.f32 %v3882_v15, %v5506_v37  ;;  %v6979_v37 = vld [vmem:[#allocation50_spill] sm:$0xff] }
 0x1ed   :  { %vm1070_vm2 = vcmp.eq.f32.partialorder %v6973_v59, %v938_v1  ;;  %2524 = vadd.xlane.f32.xlu0 %v2523_v28  ;;  %3758 = vmatprep.mubr.msk.f32.mxu1 %vm848_vm1, %v3267_v40  ;;  %v2288_v40 = vsel %vm848_vm1, %v3882_v15, 0.0  ;;  %v3886_v1 = vpop.eup %3885  ;;  %v2155_v28 = vmul.f32 1.442695, %v5570_v56  ;;  %v2279_v59 = vsel %vm848_vm1, %v3884_v61, 0.0 }
 0x1ee   :  { %v3268_v17 = vsel %vm1070_vm2, 1.0, %v6915_v23  ;;  %v5564_v2 = vpop.xlane.xlu0 %1986  ;;  %3889 = vpow2.f32 %v2161_v29  ;;  %v2282_v32 = vsel %vm848_vm1, %v3886_v1, 0.0  ;;  %v2544_v18 = vsel %vm848_vm1, %v2466_v27, 0.0  ;;  %v6977_v29 = vld [vmem:[#allocation14_spill] sm:$0xff]  ;;  %v6982_v27 = vld [vmem:[#allocation16_spill] sm:$0xff] }
 0x1ef   :  { %2527 = vadd.xlane.f32.xlu1 %v2526_v58  ;;  %3759 = vmatmul.mubr.msk.f32.gmra.mrb[26].mxu1 %vm848_vm1, %v3268_v17  ;;  %v2157_v17 = vmul.f32 1.442695, %v5582_v31  ;;  %3891 = vpow2.f32 %v2155_v28  ;;  %v2464_v46 = vmul.f32 %v3886_v1, %v5530_v43  ;;  %v6981_v43 = vld [vmem:[#allocation54_spill] sm:$0xff] }
 0x1f0   :  { %v5575_v35 = vpop.xlane.xlu1 %1989  ;;  %3761 = vmatprep.mubr.msk.f32.mxu1 %vm848_vm1, %v3269_v60 }
 0x1f1   :  { %2286 = vadd.xlane.f32.xlu0 %v2285_v50  ;;  %v2463_v50 = vmul.f32 %v3884_v61, %v5518_v30  ;;  %3893 = vpow2.f32 %v2157_v17  ;;  %v2538_v17 = vsel %vm848_vm1, %v2464_v46, 0.0 }
 0x1f2   :  { %v5585_v41 = vpop.xlane.xlu0 %1980 }
 0x1f3   :  { %2289 = vadd.xlane.f32.xlu1 %v2288_v40  ;;  %3762 = vmatmul.mubr.msk.f32.gmra.mrb[28].mxu1 %vm848_vm1, %v3270_v19  ;;  %v5603_v19 = vsub.f32 %v6977_v29, %v5207_v33  ;;  %v6978_v40 = vld [vmem:[#allocation52_spill] sm:$0xff]  ;;  %v2535_v30 = vsel %vm848_vm1, %v2463_v50, 0.0  ;;  %v6983_v50 = vld [vmem:[#allocation51_spill] sm:$0xff] }
 0x1f4   :  { %v5590_v5 = vpop.xlane.xlu1 %1983  ;;  %v3888_v61 = vpop.eup %3887 }
 0x1f5   :  { %2280 = vadd.xlane.f32.xlu0 %v2279_v59  ;;  %v6980_v59 = vld [vmem:[#allocation15_spill] sm:$0xff] }
 0x1f6   :  { %v953_v58 = vpop.xlane.xlu0 %952  ;;  %v5611_v25 = vsub.f32 %v6980_v59, %v5225_v14 }
 0x1f7   :  { %2283 = vadd.xlane.f32.xlu1 %v2282_v32  ;;  %vm1075_vm5 = vcmp.eq.f32.partialorder %v6979_v37, %v953_v58  ;;  %v2167_v32 = vmul.f32 1.442695, %v5603_v19 }
 0x1f8   :  { %v956_v60 = vpop.xlane.xlu1 %955  ;;  %v3890_v58 = vpop.eup %3889  ;;  %v3273_v14 = vsel %vm1075_vm5, 1.0, %v6915_v23  ;;  %v2169_v29 = vmul.f32 1.442695, %v5611_v25 }
 0x1f9   :  { %2542 = vadd.xlane.f32.xlu0 %v2541_v45  ;;  %v5622_v45 = vsub.f32 %v6982_v27, %v5236_v8  ;;  %vm1076_vm7 = vcmp.eq.f32.partialorder %v6983_v50, %v956_v60  ;;  %v3892_v46 = vpop.eup %3891  ;;  %3895 = vpow2.f32 %v2167_v32  ;;  %v2470_v32 = vmul.f32 %v3890_v58, %v5559_v36  ;;  %v6986_v36 = vld [vmem:[#allocation58_spill] sm:$0xff] }
 0x1fa   :  { %v947_v7 = vpop.xlane.xlu0 %946  ;;  %v3274_v37 = vsel %vm1076_vm7, 1.0, %v6915_v23  ;;  %3897 = vpow2.f32 %v2169_v29  ;;  %v6985_v29 = vld [vmem:[#allocation18_spill] sm:$0xff] }
 0x1fb   :  { %vm1073_vm4 = vcmp.eq.f32.partialorder %v6978_v40, %v947_v7  ;;  %2545 = vadd.xlane.f32.xlu1 %v2544_v18  ;;  %v2297_v18 = vsel %vm848_vm1, %v3888_v61, 0.0  ;;  %v6984_v40 = vld [vmem:[#allocation17_spill] sm:$0xff] }
 0x1fc   :  { %v3271_v15 = vsel %vm1073_vm4, 1.0, %v6915_v23  ;;  %v950_v28 = vpop.xlane.xlu1 %949  ;;  %v5634_v8 = vsub.f32 %v6984_v40, %v5241_v4  ;;  %v2469_v4 = vmul.f32 %v3888_v61, %v5551_v57  ;;  %v2556_v57 = vsel %vm848_vm1, %v2470_v32, 0.0  ;;  %v6990_v32 = vld [vmem:[#allocation59_spill] sm:$0xff] }
 0x1fd   :  { %vm1074_vm6 = vcmp.eq.f32.partialorder %v6981_v43, %v950_v28  ;;  %2536 = vadd.xlane.f32.xlu0 %v2535_v30  ;;  %3764 = vmatprep.mubr.msk.f32.mxu1 %vm848_vm1, %v3271_v15  ;;  %v2300_v15 = vsel %vm848_vm1, %v3890_v58, 0.0  ;;  %v3894_v28 = vpop.eup %3893  ;;  %v2163_v30 = vmul.f32 1.442695, %v5622_v45  ;;  %v2291_v43 = vsel %vm848_vm1, %v3892_v46, 0.0 }
 0x1fe   :  { %v3272_v33 = vsel %vm1074_vm6, 1.0, %v6915_v23  ;;  %v5616_v1 = vpop.xlane.xlu0 %1998  ;;  %v2294_v27 = vsel %vm848_vm1, %v3894_v28, 0.0  ;;  %v2553_v50 = vsel %vm848_vm1, %v2469_v4, 0.0  ;;  %v2468_v61 = vmul.f32 %v3894_v28, %v5582_v31  ;;  %v6988_v31 = vld [vmem:[#allocation61_spill] sm:$0xff] }
 0x1ff   :  { %2539 = vadd.xlane.f32.xlu1 %v2538_v17  ;;  %3765 = vmatmul.mubr.msk.f32.gmra.mrb[30].mxu1 %vm848_vm1, %v3272_v33  ;;  %v2165_v33 = vmul.f32 1.442695, %v5634_v8  ;;  %3899 = vpow2.f32 %v2163_v30  ;;  %v6987_v30 = vld [vmem:[#allocation19_spill] sm:$0xff] }
 0x200   :  { %v5627_v7 = vpop.xlane.xlu1 %2001  ;;  %3767 = vmatprep.mubr.msk.f32.mxu1 %vm848_vm1, %v3273_v14  ;;  %v2550_v28 = vsel %vm848_vm1, %v2468_v61, 0.0  ;;  %v6991_v61 = vld [vmem:[#allocation21_spill] sm:$0xff] }
 0x201   :  { %2298 = vadd.xlane.f32.xlu0 %v2297_v18  ;;  %v2467_v18 = vmul.f32 %v3892_v46, %v5570_v56  ;;  %3901 = vpow2.f32 %v2165_v33 }
 0x202   :  { %v5637_v60 = vpop.xlane.xlu0 %1992 }
 0x203   :  { %2301 = vadd.xlane.f32.xlu1 %v2300_v15  ;;  %3768 = vmatmul.mubr.msk.f32.gmra.mrb[32].mxu1 %vm848_vm1, %v3274_v37  ;;  %v5655_v37 = vsub.f32 %v6985_v29, %v5282_v63  ;;  %v2547_v56 = vsel %vm848_vm1, %v2467_v18, 0.0  ;;  %v3896_v46 = vpop.eup %3895 }
 0x204   :  { %v5642_v59 = vpop.xlane.xlu1 %1995  ;;  %v3898_v4 = vpop.eup %3897  ;;  %v2309_v18 = vsel %vm848_vm1, %v3896_v46, 0.0 }
 0x205   :  { %2292 = vadd.xlane.f32.xlu0 %v2291_v43  ;;  %v5663_v43 = vsub.f32 %v6987_v30, %v5295_v0  ;;  %v2175_v33 = vmul.f32 1.442695, %v5655_v37 }
 0x206   :  { %v965_v17 = vpop.xlane.xlu0 %964 }
 0x207   :  { %2295 = vadd.xlane.f32.xlu1 %v2294_v27  ;;  %vm1079_vm9 = vcmp.eq.f32.partialorder %v6986_v36, %v965_v17  ;;  %v6989_v17 = vld [vmem:[#allocation20_spill] sm:$0xff]  ;;  %v2312_v36 = vsel %vm848_vm1, %v3898_v4, 0.0  ;;  %3903 = vpow2.f32 %v2175_v33  ;;  %v2474_v33 = vmul.f32 %v3898_v4, %v5611_v25 }
 0x208   :  { %v968_v14 = vpop.xlane.xlu1 %967  ;;  %v5674_v27 = vsub.f32 %v6989_v17, %v5306_v26  ;;  %v3277_v0 = vsel %vm1079_vm9, 1.0, %v6915_v23  ;;  %v5686_v26 = vsub.f32 %v6991_v61, %v5311_v48  ;;  %v2473_v48 = vmul.f32 %v3896_v46, %v5603_v19 }
 0x209   :  { %2554 = vadd.xlane.f32.xlu0 %v2553_v50  ;;  %vm1080_vm11 = vcmp.eq.f32.partialorder %v6990_v32, %v968_v14  ;;  %v2568_v19 = vsel %vm848_vm1, %v2474_v33, 0.0 }
 0x20a   :  { %v959_v40 = vpop.xlane.xlu0 %958  ;;  %v3278_v29 = vsel %vm1080_vm11, 1.0, %v6915_v23 }
 0x20b   :  { %vm1077_vm8 = vcmp.eq.f32.partialorder %v5046_v53, %v959_v40  ;;  %2557 = vadd.xlane.f32.xlu1 %v2556_v57  ;;  %v3900_v40 = vpop.eup %3899  ;;  %v2177_v57 = vmul.f32 1.442695, %v5663_v43 }
 0x20c   :  { %v3275_v58 = vsel %vm1077_vm8, 1.0, %v6915_v23  ;;  %v962_v15 = vpop.xlane.xlu1 %961  ;;  %v2303_v30 = vsel %vm848_vm1, %v3900_v40, 0.0  ;;  %v2471_v32 = vmul.f32 %v3900_v40, %v5622_v45 }
 0x20d   :  { %vm1078_vm10 = vcmp.eq.f32.partialorder %v6988_v31, %v962_v15  ;;  %2548 = vadd.xlane.f32.xlu0 %v2547_v56  ;;  %3770 = vmatprep.mubr.msk.f32.mxu1 %vm848_vm1, %v3275_v58  ;;  %v3902_v58 = vpop.eup %3901  ;;  %v2171_v15 = vmul.f32 1.442695, %v5674_v27  ;;  %3905 = vpow2.f32 %v2177_v57  ;;  %v2173_v31 = vmul.f32 1.442695, %v5686_v26  ;;  %v6992_v57 = vld [vmem:[#allocation22_spill] sm:$0xff] }
 0x20e   :  { %v3276_v53 = vsel %vm1078_vm10, 1.0, %v6915_v23  ;;  %v5668_v63 = vpop.xlane.xlu0 %2010  ;;  %v2472_v46 = vmul.f32 %v3902_v58, %v5634_v8  ;;  %v5707_v61 = vsub.f32 %v6992_v57, %v5352_v39  ;;  %v2559_v45 = vsel %vm848_vm1, %v2471_v32, 0.0 }
 0x20f   :  { %2551 = vadd.xlane.f32.xlu1 %v2550_v28  ;;  %3771 = vmatmul.mubr.msk.f32.gmra.mrb[34].mxu1 %vm848_vm1, %v3276_v53  ;;  %v2306_v28 = vsel %vm848_vm1, %v3902_v58, 0.0  ;;  %3907 = vpow2.f32 %v2171_v15  ;;  %v6994_v15 = vld [vmem:[#allocation24_spill] sm:$0xff] }
 0x210   :  { %v5679_v50 = vpop.xlane.xlu1 %2013  ;;  %3773 = vmatprep.mubr.msk.f32.mxu1 %vm848_vm1, %v3277_v0  ;;  %v2565_v0 = vsel %vm848_vm1, %v2473_v48, 0.0  ;;  %3909 = vpow2.f32 %v2173_v31  ;;  %v2183_v58 = vmul.f32 1.442695, %v5707_v61 }
 0x211   :  { %2310 = vadd.xlane.f32.xlu0 %v2309_v18  ;;  %v3904_v40 = vpop.eup %3903 }
 0x212   :  { %v5689_v14 = vpop.xlane.xlu0 %2004  ;;  %v2321_v48 = vsel %vm848_vm1, %v3904_v40, 0.0  ;;  %3911 = vpow2.f32 %v2183_v58  ;;  %v6996_v58 = vld [vmem:[#allocation29_spill] sm:$0xff] }
 0x213   :  { %2313 = vadd.xlane.f32.xlu1 %v2312_v36  ;;  %3774 = vmatmul.mubr.msk.f32.gmra.mrb[36].mxu1 %vm848_vm1, %v3278_v29  ;;  %v6993_v29 = vld [vmem:[#allocation23_spill] sm:$0xff] }
 0x214   :  { %v5694_v56 = vpop.xlane.xlu1 %2007  ;;  %v5715_v36 = vsub.f32 %v6993_v29, %v5365_v6 }
 0x215   :  { %2304 = vadd.xlane.f32.xlu0 %v2303_v30  ;;  %v5726_v30 = vsub.f32 %v6994_v15, %v5376_v13  ;;  %v5759_v15 = vsub.f32 %v6996_v58, %v5430_v42 }
 0x216   :  { %v977_v53 = vpop.xlane.xlu0 %976 }
 0x217   :  { %2307 = vadd.xlane.f32.xlu1 %v2306_v28  ;;  %vm1083_vm13 = vcmp.eq.f32.partialorder %v5101_v47, %v977_v53  ;;  %v2562_v47 = vsel %vm848_vm1, %v2472_v46, 0.0  ;;  %v3906_v8 = vpop.eup %3905  ;;  %v2185_v53 = vmul.f32 1.442695, %v5715_v36  ;;  %v6995_v28 = vld [vmem:[#allocation25_spill] sm:$0xff]  ;;  %v2179_v32 = vmul.f32 1.442695, %v5726_v30 }
 0x218   :  { %v980_v17 = vpop.xlane.xlu1 %979  ;;  %v3281_v6 = vsel %vm1083_vm13, 1.0, %v6915_v23  ;;  %v5738_v13 = vsub.f32 %v6995_v28, %v5381_v3  ;;  %v2477_v3 = vmul.f32 %v3904_v40, %v5655_v37  ;;  %v6998_v28 = vld [vmem:[#allocation32_spill] sm:$0xff] }
 0x219   :  { %2566 = vadd.xlane.f32.xlu0 %v2565_v0  ;;  %vm1084_vm15 = vcmp.eq.f32.partialorder %v5106_v34, %v980_v17  ;;  %v3908_v31 = vpop.eup %3907  ;;  %v2324_v17 = vsel %vm848_vm1, %v3906_v8, 0.0  ;;  %3913 = vpow2.f32 %v2185_v53  ;;  %v2191_v53 = vmul.f32 1.442695, %v5759_v15 }
 0x21a   :  { %v971_v18 = vpop.xlane.xlu0 %970  ;;  %v3282_v33 = vsel %vm1084_vm15, 1.0, %v6915_v23  ;;  %v3910_v0 = vpop.eup %3909  ;;  %v2181_v46 = vmul.f32 1.442695, %v5738_v13  ;;  %3915 = vpow2.f32 %v2179_v32  ;;  %v2577_v29 = vsel %vm848_vm1, %v2477_v3, 0.0 }
 0x21b   :  { %vm1081_vm12 = vcmp.eq.f32.partialorder %v5111_v55, %v971_v18  ;;  %2569 = vadd.xlane.f32.xlu1 %v2568_v19  ;;  %v2315_v19 = vsel %vm848_vm1, %v3908_v31, 0.0  ;;  %v2476_v40 = vmul.f32 %v3910_v0, %v5686_v26 }
 0x21c   :  { %v3279_v25 = vsel %vm1081_vm12, 1.0, %v6915_v23  ;;  %v974_v4 = vpop.xlane.xlu1 %973  ;;  %3917 = vpow2.f32 %v2181_v46  ;;  %vm1818_vm12 = vcmask 130048  }
 0x21d   :  { %vm1082_vm14 = vcmp.eq.f32.partialorder %v5120_v22, %v974_v4  ;;  %2560 = vadd.xlane.f32.xlu0 %v2559_v45  ;;  %3776 = vmatprep.mubr.msk.f32.mxu1 %vm848_vm1, %v3279_v25  ;;  %v2318_v25 = vsel %vm848_vm1, %v3910_v0, 0.0  ;;  %v2478_v4 = vmul.f32 %v3906_v8, %v5663_v43  ;;  %3919 = vpow2.f32 %v2191_v53 }
 0x21e   :  { %v3280_v55 = vsel %vm1082_vm14, 1.0, %v6915_v23  ;;  %v5720_v39 = vpop.xlane.xlu0 %2022 }
 0x21f   :  { %2563 = vadd.xlane.f32.xlu1 %v2562_v47  ;;  %3777 = vmatmul.mubr.msk.f32.gmra.mrb[38].mxu1 %vm848_vm1, %v3280_v55  ;;  %v2475_v55 = vmul.f32 %v3908_v31, %v5674_v27  ;;  %v2580_v37 = vsel %vm848_vm1, %v2478_v4, 0.0 }
 0x220   :  { %v5731_v22 = vpop.xlane.xlu1 %2025  ;;  %3779 = vmatprep.mubr.msk.f32.mxu1 %vm848_vm1, %v3281_v6  ;;  %v3912_v6 = vpop.eup %3911 }
 0x221   :  { %2322 = vadd.xlane.f32.xlu0 %v2321_v48  ;;  %v2571_v27 = vsel %vm848_vm1, %v2475_v55, 0.0  ;;  %v6997_v48 = vld [vmem:[#allocation31_spill] sm:$0xff] }
 0x222   :  { %v5741_v34 = vpop.xlane.xlu0 %2016  ;;  %v5767_v31 = vsub.f32 %v6997_v48, %v5450_v9 }
 0x223   :  { %2325 = vadd.xlane.f32.xlu1 %v2324_v17  ;;  %3780 = vmatmul.mubr.msk.f32.gmra.mrb[40].mxu1 %vm848_vm1, %v3282_v33  ;;  %v3914_v26 = vpop.eup %3913  ;;  %v5778_v33 = vsub.f32 %v6998_v28, %v5466_v62  ;;  %v2333_v17 = vsel %vm848_vm1, %v3912_v6, 0.0 }
 0x224   :  { %v5746_v18 = vpop.xlane.xlu1 %2019  ;;  %v3916_v0 = vpop.eup %3915  ;;  %v2193_v32 = vmul.f32 1.442695, %v5767_v31  ;;  %v2336_v46 = vsel %vm848_vm1, %v3914_v26, 0.0 }
 0x225   :  { %2316 = vadd.xlane.f32.xlu0 %v2315_v19  ;;  %v6999_v19 = vld [vmem:[#allocation33_spill] sm:$0xff] }
 0x226   :  { %v989_v57 = vpop.xlane.xlu0 %988  ;;  %v5790_v62 = vsub.f32 %v6999_v19, %v5472_v12  ;;  %v2481_v12 = vmul.f32 %v3912_v6, %v5707_v61  ;;  %3921 = vpow2.f32 %v2193_v32  ;;  %v7000_v6 = vld [vmem:[#allocation37_spill] sm:$0xff] }
 0x227   :  { %2319 = vadd.xlane.f32.xlu1 %v2318_v25  ;;  %vm1087_vm2 = vcmp.eq.f32.partialorder %v5171_v44, %v989_v57  ;;  %v2574_v44 = vsel %vm848_vm1, %v2476_v40, 0.0  ;;  %v3918_v57 = vpop.eup %3917  ;;  %v2187_v25 = vmul.f32 1.442695, %v5778_v33  ;;  %v5811_v48 = vsub.f32 %v7000_v6, %v5511_v16  ;;  %v7004_v6 = vld [vmem:[#allocation45_spill] sm:$0xff] }
 0x228   :  { %v992_v45 = vpop.xlane.xlu1 %991  ;;  %v3285_v9 = vsel %vm1087_vm2, 1.0, %v6915_v23  ;;  %v2589_v58 = vsel %vm848_vm1, %v2481_v12, 0.0 }
 0x229   :  { %2578 = vadd.xlane.f32.xlu0 %v2577_v29  ;;  %vm1088_vm4 = vcmp.eq.f32.partialorder %v5176_v51, %v992_v45  ;;  %v2327_v45 = vsel %vm848_vm1, %v3916_v0, 0.0  ;;  %v2189_v29 = vmul.f32 1.442695, %v5790_v62  ;;  %3923 = vpow2.f32 %v2187_v25 }
 0x22a   :  { %v983_v47 = vpop.xlane.xlu0 %982  ;;  %v3286_v3 = vsel %vm1088_vm4, 1.0, %v6915_v23  ;;  %v2199_v28 = vmul.f32 1.442695, %v5811_v48 }
 0x22b   :  { %vm1085_vm0 = vcmp.eq.f32.partialorder %v5181_v54, %v983_v47  ;;  %2581 = vadd.xlane.f32.xlu1 %v2580_v37  ;;  %v2330_v47 = vsel %vm848_vm1, %v3918_v57, 0.0  ;;  %v2482_v37 = vmul.f32 %v3914_v26, %v5715_v36  ;;  %3925 = vpow2.f32 %v2189_v29  ;;  %v7001_v26 = vld [vmem:[#allocation39_spill] sm:$0xff] }
 0x22c   :  { %v3283_v43 = vsel %vm1085_vm0, 1.0, %v6915_v23  ;;  %v986_v8 = vpop.xlane.xlu1 %985  ;;  %v5819_v53 = vsub.f32 %v7001_v26, %v5523_v49  ;;  %3927 = vpow2.f32 %v2199_v28 }
 0x22d   :  { %vm1086_vm3 = vcmp.eq.f32.partialorder %v5190_v24, %v986_v8  ;;  %2572 = vadd.xlane.f32.xlu0 %v2571_v27  ;;  %3782 = vmatprep.mubr.msk.f32.mxu1 %vm848_vm1, %v3283_v43  ;;  %v2479_v43 = vmul.f32 %v3916_v0, %v5726_v30  ;;  %v2592_v61 = vsel %vm848_vm1, %v2482_v37, 0.0  ;;  %v2480_v27 = vmul.f32 %v3918_v57, %v5738_v13 }
 0x22e   :  { %v3284_v54 = vsel %vm1086_vm3, 1.0, %v6915_v23  ;;  %v5772_v42 = vpop.xlane.xlu0 %2034  ;;  %v2201_v19 = vmul.f32 1.442695, %v5819_v53 }
 0x22f   :  { %2575 = vadd.xlane.f32.xlu1 %v2574_v44  ;;  %3783 = vmatmul.mubr.msk.f32.gmra.mrb[42].mxu1 %vm848_vm1, %v3284_v54  ;;  %v2583_v30 = vsel %vm848_vm1, %v2479_v43, 0.0  ;;  %v3920_v44 = vpop.eup %3919 }
 0x230   :  { %v5783_v24 = vpop.xlane.xlu1 %2037  ;;  %3785 = vmatprep.mubr.msk.f32.mxu1 %vm848_vm1, %v3285_v9  ;;  %v3922_v13 = vpop.eup %3921  ;;  %v7002_v9 = vld [vmem:[#allocation41_spill] sm:$0xff]  ;;  %v2345_v0 = vsel %vm848_vm1, %v3920_v44, 0.0  ;;  %3929 = vpow2.f32 %v2201_v19  ;;  %v7010_v19 = vld [vmem:[#allocation78_spill] sm:$0xff] }
 0x231   :  { %2334 = vadd.xlane.f32.xlu0 %v2333_v17  ;;  %v5830_v17 = vsub.f32 %v7002_v9, %v5533_v52  ;;  %v2348_v57 = vsel %vm848_vm1, %v3922_v13, 0.0 }
 0x232   :  { %v5793_v51 = vpop.xlane.xlu0 %2028 }
 0x233   :  { %2337 = vadd.xlane.f32.xlu1 %v2336_v46  ;;  %3786 = vmatmul.mubr.msk.f32.gmra.mrb[44].mxu1 %vm848_vm1, %v3286_v3  ;;  %v3924_v32 = vpop.eup %3923  ;;  %v7003_v3 = vld [vmem:[#allocation43_spill] sm:$0xff] }
 0x234   :  { %v5798_v4 = vpop.xlane.xlu1 %2031  ;;  %v5842_v52 = vsub.f32 %v7003_v3, %v5538_v11  ;;  %v2339_v29 = vsel %vm848_vm1, %v3924_v32, 0.0  ;;  %v2485_v11 = vmul.f32 %v3920_v44, %v5759_v15 }
 0x235   :  { %2328 = vadd.xlane.f32.xlu0 %v2327_v45  ;;  %v3926_v25 = vpop.eup %3925  ;;  %v2195_v45 = vmul.f32 1.442695, %v5830_v17 }
 0x236   :  { %v1001_v55 = vpop.xlane.xlu0 %1000  ;;  %v2342_v37 = vsel %vm848_vm1, %v3926_v25, 0.0  ;;  %v2601_v43 = vsel %vm848_vm1, %v2485_v11, 0.0  ;;  %v3928_v26 = vpop.eup %3927 }
 0x237   :  { %2331 = vadd.xlane.f32.xlu1 %v2330_v47  ;;  %vm1091_vm6 = vcmp.eq.f32.partialorder %v5246_v20, %v1001_v55  ;;  %v2586_v20 = vsel %vm848_vm1, %v2480_v27, 0.0  ;;  %v2197_v55 = vmul.f32 1.442695, %v5842_v52  ;;  %3931 = vpow2.f32 %v2195_v45  ;;  %v7011_v45 = vld [vmem:[#allocation49_spill] sm:$0xff] }
 0x238   :  { %v1004_v40 = vpop.xlane.xlu1 %1003  ;;  %v3289_v49 = vsel %vm1091_vm6, 1.0, %v6915_v23  ;;  %v2484_v27 = vmul.f32 %v3926_v25, %v5790_v62  ;;  %v7008_v62 = vld [vmem:[#allocation81_spill] sm:$0xff] }
 0x239   :  { %2590 = vadd.xlane.f32.xlu0 %v2589_v58  ;;  %vm1092_vm8 = vcmp.eq.f32.partialorder %v5251_v21, %v1004_v40  ;;  %v2486_v40 = vmul.f32 %v3922_v13, %v5767_v31  ;;  %3933 = vpow2.f32 %v2197_v55  ;;  %v7006_v31 = vld [vmem:[#allocation77_spill] sm:$0xff] }
 0x23a   :  { %v995_v8 = vpop.xlane.xlu0 %994  ;;  %v3290_v46 = vsel %vm1092_vm8, 1.0, %v6915_v23  ;;  %v2598_v28 = vsel %vm848_vm1, %v2484_v27, 0.0  ;;  %v3930_v9 = vpop.eup %3929 }
 0x23b   :  { %vm1089_vm5 = vcmp.eq.f32.partialorder %v5256_v38, %v995_v8  ;;  %2593 = vadd.xlane.f32.xlu1 %v2592_v61  ;;  %v2483_v8 = vmul.f32 %v3924_v32, %v5778_v33  ;;  %v2604_v15 = vsel %vm848_vm1, %v2486_v40, 0.0 }
 0x23c   :  { %v3287_v36 = vsel %vm1089_vm5, 1.0, %v6915_v23  ;;  %v998_v54 = vpop.xlane.xlu1 %997 }
 0x23d   :  { %vm1090_vm7 = vcmp.eq.f32.partialorder %v5265_v10, %v998_v54  ;;  %2584 = vadd.xlane.f32.xlu0 %v2583_v30  ;;  %3788 = vmatprep.mubr.msk.f32.mxu1 %vm848_vm1, %v3287_v36  ;;  %v5863_v36 = vsub.f32 %v7004_v6, %v5564_v2  ;;  %v7005_v54 = vld [vmem:[#allocation79_spill] sm:$0xff]  ;;  %v2595_v33 = vsel %vm848_vm1, %v2483_v8, 0.0 }
 0x23e   :  { %v3288_v38 = vsel %vm1090_vm7, 1.0, %v6915_v23  ;;  %v5824_v16 = vpop.xlane.xlu0 %2046  ;;  %vm3099_vm7 = vcmask 7168  }
 0x23f   :  { %2587 = vadd.xlane.f32.xlu1 %v2586_v20  ;;  %3789 = vmatmul.mubr.msk.f32.gmra.mrb[46].mxu1 %vm848_vm1, %v3288_v38  ;;  %v7007_v38 = vld [vmem:[#allocation47_spill] sm:$0xff] }
 0x240   :  { %v5835_v10 = vpop.xlane.xlu1 %2049  ;;  %3791 = vmatprep.mubr.msk.f32.mxu1 %vm848_vm1, %v3289_v49  ;;  %v5871_v20 = vsub.f32 %v7007_v38, %v5575_v35  ;;  %v2207_v49 = vmul.f32 1.442695, %v5863_v36 }
 0x241   :  { %2346 = vadd.xlane.f32.xlu0 %v2345_v0  ;;  %v7009_v0 = vld [vmem:[#allocation48_spill] sm:$0xff]  ;;  %v3932_v25 = vpop.eup %3931 }
 0x242   :  { %v5845_v21 = vpop.xlane.xlu0 %2040  ;;  %v5882_v32 = vsub.f32 %v7009_v0, %v5585_v41  ;;  %v2209_v41 = vmul.f32 1.442695, %v5871_v20  ;;  %3935 = vpow2.f32 %v2207_v49 }
 0x243   :  { %2349 = vadd.xlane.f32.xlu1 %v2348_v57  ;;  %3792 = vmatmul.mubr.msk.f32.gmra.mrb[48].mxu1 %vm848_vm1, %v3290_v46  ;;  %v2357_v57 = vsel %vm848_vm1, %v3928_v26, 0.0  ;;  %v3934_v40 = vpop.eup %3933 }
 0x244   :  { %v5850_v12 = vpop.xlane.xlu1 %2043  ;;  %3937 = vpow2.f32 %v2209_v41 }
 0x245   :  { %2340 = vadd.xlane.f32.xlu0 %v2339_v29  ;;  %v5896_v29 = vsub.f32 %v7011_v45, %v5590_v5  ;;  %v2360_v5 = vsel %vm848_vm1, %v3930_v9, 0.0  ;;  %v7017_v45 = vld [vmem:[#allocation56_spill] sm:$0xff] }
 0x246   :  { %v1013_v47 = vpop.xlane.xlu0 %1012 }
 0x247   :  { %2343 = vadd.xlane.f32.xlu1 %v2342_v37  ;;  %vm1095_vm10 = vcmp.eq.f32.partialorder %v7006_v31, %v1013_v47  ;;  %v2205_v27 = vmul.f32 1.442695, %v5896_v29  ;;  %v2490_v31 = vmul.f32 %v3930_v9, %v5819_v53  ;;  %v7014_v53 = vld [vmem:[#allocation83_spill] sm:$0xff] }
 0x248   :  { %v1016_v58 = vpop.xlane.xlu1 %1015  ;;  %v3293_v35 = vsel %vm1095_vm10, 1.0, %v6915_v23 }
 0x249   :  { %2602 = vadd.xlane.f32.xlu0 %v2601_v43  ;;  %vm1096_vm13 = vcmp.eq.f32.partialorder %v7010_v19, %v1016_v58  ;;  %v2203_v58 = vmul.f32 1.442695, %v5882_v32 }
 0x24a   :  { %v1007_v61 = vpop.xlane.xlu0 %1006  ;;  %v3294_v55 = vsel %vm1096_vm13, 1.0, %v6915_v23 }
 0x24b   :  { %vm1093_vm9 = vcmp.eq.f32.partialorder %v7005_v54, %v1007_v61  ;;  %2605 = vadd.xlane.f32.xlu1 %v2604_v15  ;;  %v2351_v61 = vsel %vm848_vm1, %v3932_v25, 0.0  ;;  %v2489_v15 = vmul.f32 %v3928_v26, %v5811_v48  ;;  %v2354_v54 = vsel %vm848_vm1, %v3934_v40, 0.0 }
 0x24c   :  { %v3291_v30 = vsel %vm1093_vm9, 1.0, %v6915_v23  ;;  %v1010_v44 = vpop.xlane.xlu1 %1009  ;;  %3939 = vpow2.f32 %v2203_v58  ;;  %v2616_v48 = vsel %vm848_vm1, %v2490_v31, 0.0  ;;  %v2488_v26 = vmul.f32 %v3934_v40, %v5842_v52  ;;  %v3936_v0 = vpop.eup %3935  ;;  %v7016_v52 = vld [vmem:[#allocation87_spill] sm:$0xff] }
 0x24d   :  { %vm1094_vm11 = vcmp.eq.f32.partialorder %v7008_v62, %v1010_v44  ;;  %2596 = vadd.xlane.f32.xlu0 %v2595_v33  ;;  %3794 = vmatprep.mubr.msk.f32.mxu1 %vm848_vm1, %v3291_v30  ;;  %v2613_v44 = vsel %vm848_vm1, %v2489_v15, 0.0  ;;  %v2487_v33 = vmul.f32 %v3932_v25, %v5830_v17  ;;  %3941 = vpow2.f32 %v2205_v27  ;;  %v7012_v62 = vld [vmem:[#allocation53_spill] sm:$0xff] }
 0x24e   :  { %v3292_v2 = vsel %vm1094_vm11, 1.0, %v6915_v23  ;;  %v5876_v13 = vpop.xlane.xlu0 %2058  ;;  %v3938_v25 = vpop.eup %3937 }
 0x24f   :  { %2599 = vadd.xlane.f32.xlu1 %v2598_v28  ;;  %3795 = vmatmul.mubr.msk.f32.gmra.mrb[50].mxu1 %vm848_vm1, %v3292_v2  ;;  %v5933_v2 = vsub.f32 %v7012_v62, %v5616_v1  ;;  %v7013_v28 = vld [vmem:[#allocation85_spill] sm:$0xff]  ;;  %v2607_v17 = vsel %vm848_vm1, %v2487_v33, 0.0  ;;  %v2493_v33 = vmul.f32 %v3936_v0, %v5863_v36  ;;  %v7021_v62 = vld [vmem:[#allocation62_spill] sm:$0xff] }
 0x250   :  { %v5889_v3 = vpop.xlane.xlu1 %2061  ;;  %v3718_v46 = vpop.f32.mrb[64].mxu0  ;;  %3797 = vmatprep.mubr.msk.f32.mxu1 %vm848_vm1, %v3293_v35  ;;  %v7015_v35 = vld [vmem:[#allocation55_spill] sm:$0xff] }
 0x251   :  { %1820 = vst.msk [vmem:[%s6758_s5 + $0x8] sm:$0xff] %vm1818_vm12, %v3718_v46  ;;  %v1499_v11 = vpop.f32.mrb[65].mxu0  ;;  %2358 = vadd.xlane.f32.xlu0 %v2357_v57  ;;  %v5941_v19 = vsub.f32 %v7015_v35, %v5627_v7  ;;  %v2610_v57 = vsel %vm848_vm1, %v2488_v26, 0.0  ;;  %v2215_v41 = vmul.f32 1.442695, %v5933_v2  ;;  %v2625_v36 = vsel %vm848_vm1, %v2493_v33, 0.0 }
 0x252   :  { %1819 = vst.msk [vmem:[%s6758_s5] sm:$0xff] %vm1818_vm12, %v1499_v11  ;;  %v3721_v47 = vpop.f32.mrb[0].mxu1  ;;  %v5907_v37 = vpop.xlane.xlu0 %2052  ;;  %v5952_v11 = vsub.f32 %v7017_v45, %v5637_v60  ;;  %v7027_v33 = vld [vmem:[#allocation64_spill] sm:$0xff] }
 0x253   :  { %1822 = vst.msk [vmem:[%s6758_s5 + $0x18] sm:$0xff] %vm1818_vm12, %v3721_v47  ;;  %v1509_v43 = vpop.f32.mrb[1].mxu1  ;;  %2361 = vadd.xlane.f32.xlu1 %v2360_v5  ;;  %3798 = vmatmul.mubr.msk.f32.gmra.mrb[52].mxu1 %vm848_vm1, %v3294_v55  ;;  %v7018_v55 = vld [vmem:[#allocation84_spill] sm:$0xff]  ;;  %v2369_v5 = vsel %vm848_vm1, %v3936_v0, 0.0  ;;  %v2217_v58 = vmul.f32 1.442695, %v5941_v19  ;;  %3943 = vpow2.f32 %v2215_v41 }
 0x254   :  { %1821 = vst.msk [vmem:[%s6758_s5 + $0x10] sm:$0xff] %vm1818_vm12, %v1509_v43  ;;  %v5920_v8 = vpop.xlane.xlu1 %2055  ;;  %v7019_v43 = vld [vmem:[#allocation57_spill] sm:$0xff]  ;;  %v2211_v31 = vmul.f32 1.442695, %v5952_v11  ;;  %v7023_v41 = vld [vmem:[#allocation4_spill] sm:$0xff] }
 0x255   :  { %2352 = vadd.xlane.f32.xlu0 %v2351_v61  ;;  %v5964_v60 = vsub.f32 %v7019_v43, %v5642_v59  ;;  %3945 = vpow2.f32 %v2217_v58 }
 0x256   :  { %v1025_v6 = vpop.xlane.xlu0 %1024  ;;  %v3940_v40 = vpop.eup %3939  ;;  %3947 = vpow2.f32 %v2211_v31 }
 0x257   :  { %2355 = vadd.xlane.f32.xlu1 %v2354_v54  ;;  %vm1099_vm15 = vcmp.eq.f32.partialorder %v7014_v53, %v1025_v6  ;;  %v2372_v6 = vsel %vm848_vm1, %v3938_v25, 0.0  ;;  %v3942_v54 = vpop.eup %3941  ;;  %v2491_v0 = vmul.f32 %v3940_v40, %v5882_v32 }
 0x258   :  { %v1028_v30 = vpop.xlane.xlu1 %1027  ;;  %v3297_v7 = vsel %vm1099_vm15, 1.0, %v6915_v23 }
 0x259   :  { %2614 = vadd.xlane.f32.xlu0 %v2613_v44  ;;  %vm1100_vm2 = vcmp.eq.f32.partialorder %v7018_v55, %v1028_v30  ;;  %v2363_v44 = vsel %vm848_vm1, %v3940_v40, 0.0  ;;  %v2619_v32 = vsel %vm848_vm1, %v2491_v0, 0.0 }
 0x25a   :  { %v1019_v38 = vpop.xlane.xlu0 %1018  ;;  %v3298_v61 = vsel %vm1100_vm2, 1.0, %v6915_v23 }
 0x25b   :  { %vm1097_vm14 = vcmp.eq.f32.partialorder %v7013_v28, %v1019_v38  ;;  %2617 = vadd.xlane.f32.xlu1 %v2616_v48  ;;  %v2213_v38 = vmul.f32 1.442695, %v5964_v60  ;;  %v7020_v48 = vld [vmem:[#allocation60_spill] sm:$0xff]  ;;  %v5991_v28 = vsub.f32 %v7021_v62, %v5679_v50 }
 0x25c   :  { %v3295_v9 = vsel %vm1097_vm14, 1.0, %v6915_v23  ;;  %v1022_v49 = vpop.xlane.xlu1 %1021  ;;  %v5987_v26 = vsub.f32 %v7020_v48, %v5668_v63 }
 0x25d   :  { %vm1098_vm0 = vcmp.eq.f32.partialorder %v7016_v52, %v1022_v49  ;;  %2608 = vadd.xlane.f32.xlu0 %v2607_v17  ;;  %3800 = vmatprep.mubr.msk.f32.mxu1 %vm848_vm1, %v3295_v9  ;;  %v2366_v49 = vsel %vm848_vm1, %v3942_v54, 0.0  ;;  %v2494_v17 = vmul.f32 %v3938_v25, %v5871_v20  ;;  %3949 = vpow2.f32 %v2213_v38  ;;  %v7022_v25 = vld [vmem:[#allocation3_spill] sm:$0xff]  ;;  %v3944_v55 = vpop.eup %3943 }
 0x25e   :  { %v3296_v1 = vsel %vm1098_vm0, 1.0, %v6915_v23  ;;  %v5946_v46 = vpop.xlane.xlu0 %2070  ;;  %v2223_v20 = vmul.f32 1.442695, %v5987_v26  ;;  %v2225_v35 = vmul.f32 1.442695, %v5991_v28  ;;  %v6028_v38 = vsub.f32 %v7027_v33, %v5694_v56 }
 0x25f   :  { %2611 = vadd.xlane.f32.xlu1 %v2610_v57  ;;  %3801 = vmatmul.mubr.msk.f32.gmra.mrb[54].mxu1 %vm848_vm1, %v3296_v1  ;;  %v2628_v1 = vsel %vm848_vm1, %v2494_v17, 0.0  ;;  %v2492_v57 = vmul.f32 %v3942_v54, %v5896_v29  ;;  %v3946_v43 = vpop.eup %3945  ;;  %v7026_v54 = vld [vmem:[#allocation30_spill] sm:$0xff] }
 0x260   :  { %v5957_v47 = vpop.xlane.xlu1 %2073  ;;  %3803 = vmatprep.mubr.msk.f32.mxu1 %vm848_vm1, %v3297_v7  ;;  %3951 = vpow2.f32 %v2223_v20  ;;  %v7029_v20 = vld [vmem:[#allocation66_spill] sm:$0xff] }
 0x261   :  { %2370 = vadd.xlane.f32.xlu0 %v2369_v5  ;;  %v7024_v5 = vld [vmem:[#allocation27_spill] sm:$0xff]  ;;  %3953 = vpow2.f32 %v2225_v35  ;;  %v2622_v58 = vsel %vm848_vm1, %v2492_v57, 0.0  ;;  %v6051_v35 = vsub.f32 %v7029_v20, %v5731_v22 }
 0x262   :  { %v3724_v15 = vpop.f32.mrb[2].mxu1  ;;  %v5967_v27 = vpop.xlane.xlu0 %2064 }
 0x263   :  { %1824 = vst.msk [vmem:[%s6758_s5 + $0x28] sm:$0xff] %vm1818_vm12, %v3724_v15  ;;  %2373 = vadd.xlane.f32.xlu1 %v2372_v6  ;;  %v1519_v59 = vpop.f32.mrb[3].mxu1  ;;  %3804 = vmatmul.mubr.msk.f32.gmra.mrb[56].mxu1 %vm848_vm1, %v3298_v61  ;;  %v7025_v61 = vld [vmem:[#allocation63_spill] sm:$0xff] }
 0x264   :  { %1823 = vst.msk [vmem:[%s6758_s5 + $0x20] sm:$0xff] %vm1818_vm12, %v1519_v59  ;;  %v5980_v30 = vpop.xlane.xlu1 %2067  ;;  %v6019_v15 = vsub.f32 %v7025_v61, %v5689_v14  ;;  %v2381_v59 = vsel %vm848_vm1, %v3944_v55, 0.0 }
 0x265   :  { %2364 = vadd.xlane.f32.xlu0 %v2363_v44  ;;  %v3948_v44 = vpop.eup %3947 }
 0x266   :  { %v3727_v53 = vpop.f32.mrb[4].mxu1  ;;  %v1037_v9 = vpop.xlane.xlu0 %1036  ;;  %v2375_v17 = vsel %vm848_vm1, %v3948_v44, 0.0 }
 0x267   :  { %1826 = vst.msk [vmem:[%s6758_s5 + $0x38] sm:$0xff] %vm1818_vm12, %v3727_v53  ;;  %2367 = vadd.xlane.f32.xlu1 %v2366_v49  ;;  %v1529_v63 = vpop.f32.mrb[5].mxu1  ;;  %vm1103_vm4 = vcmp.eq.f32.partialorder %v7023_v41, %v1037_v9  ;;  %v2384_v53 = vsel %vm848_vm1, %v3946_v43, 0.0  ;;  %v3950_v9 = vpop.eup %3949  ;;  %v2219_v49 = vmul.f32 1.442695, %v6019_v15 }
 0x268   :  { %1825 = vst.msk [vmem:[%s6758_s5 + $0x30] sm:$0xff] %vm1818_vm12, %v1529_v63  ;;  %v1040_v50 = vpop.xlane.xlu1 %1039  ;;  %v3301_v6 = vsel %vm1103_vm4, 1.0, %v6915_v23  ;;  %v2497_v63 = vmul.f32 %v3944_v55, %v5933_v2  ;;  %v2378_v57 = vsel %vm848_vm1, %v3950_v9, 0.0 }
 0x269   :  { %2626 = vadd.xlane.f32.xlu0 %v2625_v36  ;;  %vm1104_vm6 = vcmp.eq.f32.partialorder %v7026_v54, %v1040_v50  ;;  %v2221_v50 = vmul.f32 1.442695, %v6028_v38  ;;  %v7028_v36 = vld [vmem:[#allocation65_spill] sm:$0xff] }
 0x26a   :  { %v1031_v52 = vpop.xlane.xlu0 %1030  ;;  %v3302_v14 = vsel %vm1104_vm6, 1.0, %v6915_v23  ;;  %v6047_v0 = vsub.f32 %v7028_v36, %v5720_v39  ;;  %v6055_v2 = vpop.eup %3951  ;;  %v7031_v36 = vld [vmem:[#allocation68_spill] sm:$0xff] }
 0x26b   :  { %vm1101_vm3 = vcmp.eq.f32.partialorder %v7022_v25, %v1031_v52  ;;  %2629 = vadd.xlane.f32.xlu1 %v2628_v1  ;;  %v2498_v25 = vmul.f32 %v3946_v43, %v5941_v19  ;;  %v6061_v41 = vpop.eup %3953  ;;  %v2637_v19 = vsel %vm848_vm1, %v2497_v63, 0.0  ;;  %v2496_v43 = vmul.f32 %v3950_v9, %v5964_v60 }
 0x26c   :  { %v3299_v45 = vsel %vm1101_vm3, 1.0, %v6915_v23  ;;  %v1034_v7 = vpop.xlane.xlu1 %1033  ;;  %v6081_v20 = vsub.f32 %v7031_v36, %v5746_v18 }
 0x26d   :  { %vm1102_vm5 = vcmp.eq.f32.partialorder %v7024_v5, %v1034_v7  ;;  %2620 = vadd.xlane.f32.xlu0 %v2619_v32  ;;  %3806 = vmatprep.mubr.msk.f32.mxu1 %vm848_vm1, %v3299_v45  ;;  %v2495_v45 = vmul.f32 %v3948_v44, %v5952_v11  ;;  %v2231_v32 = vmul.f32 1.442695, %v6047_v0  ;;  %v2233_v5 = vmul.f32 1.442695, %v6051_v35 }
 0x26e   :  { %v3300_v29 = vsel %vm1102_vm5, 1.0, %v6915_v23  ;;  %v2275_v40 = vpop.xlane.xlu0 %2274 }
 0x26f   :  { %3955 = vrcp.f32 %v2275_v40  ;;  %2623 = vadd.xlane.f32.xlu1 %v2622_v58  ;;  %3807 = vmatmul.mubr.msk.f32.gmra.mrb[58].mxu1 %vm848_vm1, %v3300_v29  ;;  %v2640_v58 = vsel %vm848_vm1, %v2498_v25, 0.0 }
 0x270   :  { %3957 = vlog2.f32 %v2275_v40  ;;  %v2278_v31 = vpop.xlane.xlu1 %2277  ;;  %3809 = vmatprep.mubr.msk.f32.mxu1 %vm848_vm1, %v3301_v6 }
 0x271   :  { %3959 = vrcp.f32 %v2278_v31  ;;  %2382 = vadd.xlane.f32.xlu0 %v2381_v59  ;;  %v2631_v59 = vsel %vm848_vm1, %v2495_v45, 0.0  ;;  %v2396_v45 = vsel %vm848_vm1, %v6061_v41, 0.0 }
 0x272   :  { %3961 = vlog2.f32 %v2278_v31  ;;  %v3730_v48 = vpop.f32.mrb[6].mxu1  ;;  %v2269_v62 = vpop.xlane.xlu0 %2268 }
 0x273   :  { %1828 = vst.msk [vmem:[%s6758_s5 + $0x48] sm:$0xff] %vm1818_vm12, %v3730_v48  ;;  %3963 = vrcp.f32 %v2269_v62  ;;  %2385 = vadd.xlane.f32.xlu1 %v2384_v53  ;;  %v1539_v56 = vpop.f32.mrb[7].mxu1  ;;  %3810 = vmatmul.mubr.msk.f32.gmra.mrb[60].mxu1 %vm848_vm1, %v3302_v14 }
 0x274   :  { %3965 = vlog2.f32 %v2269_v62  ;;  %1827 = vst.msk [vmem:[%s6758_s5 + $0x40] sm:$0xff] %vm1818_vm12, %v1539_v56  ;;  %v2272_v23 = vpop.xlane.xlu1 %2271  ;;  %v7030_v62 = vld [vmem:[#allocation67_spill] sm:$0xff] }
 0x275   :  { %3967 = vrcp.f32 %v2272_v23  ;;  %2376 = vadd.xlane.f32.xlu0 %v2375_v17  ;;  %v6076_v53 = vsub.f32 %v7030_v62, %v5741_v34  ;;  %v2393_v34 = vsel %vm848_vm1, %v6055_v2, 0.0 }
 0x276   :  { %3969 = vlog2.f32 %v2272_v23  ;;  %v3733_v52 = vpop.f32.mrb[8].mxu1  ;;  %v2531_v1 = vpop.xlane.xlu0 %2530 }
 0x277   :  { %3971 = vpow2.f32 %v2219_v49  ;;  %1830 = vst.msk [vmem:[%s6758_s5 + $0x58] sm:$0xff] %vm1818_vm12, %v3733_v52  ;;  %2379 = vadd.xlane.f32.xlu1 %v2378_v57  ;;  %v1549_v39 = vpop.f32.mrb[9].mxu1  ;;  %v2634_v49 = vsel %vm848_vm1, %v2496_v43, 0.0  ;;  %v2501_v43 = vmul.f32 %v6055_v2, %v5987_v26 }
 0x278   :  { %1829 = vst.msk [vmem:[%s6758_s5 + $0x50] sm:$0xff] %vm1818_vm12, %v1549_v39  ;;  %v2534_v22 = vpop.xlane.xlu1 %2533  ;;  %3973 = vpow2.f32 %v2221_v50 }
 0x279   :  { %v3956_v7 = vpop.eup %3955  ;;  %2638 = vadd.xlane.f32.xlu0 %v2637_v19  ;;  %3975 = vpow2.f32 %v2231_v32  ;;  %v2227_v32 = vmul.f32 1.442695, %v6076_v53 }
 0x27a   :  { %v3958_v55 = vpop.eup %3957  ;;  %v2781_v29 = vmul.f32 %v3956_v7, %v2531_v1  ;;  %v2525_v40 = vpop.xlane.xlu0 %2524  ;;  %3977 = vpow2.f32 %v2233_v5 }
 0x27b   :  { %v3960_v61 = vpop.eup %3959  ;;  %v2848_v6 = vmul.f32 0.6931472, %v3958_v55  ;;  %2641 = vadd.xlane.f32.xlu1 %v2640_v58 }
 0x27c   :  { %v3962_v54 = vpop.eup %3961  ;;  %v2782_v31 = vmul.f32 %v3960_v61, %v2534_v22  ;;  %v2528_v11 = vpop.xlane.xlu1 %2527  ;;  %v2229_v61 = vmul.f32 1.442695, %v6081_v20 }
 0x27d   :  { %v3964_v44 = vpop.eup %3963  ;;  %v2973_v33 = vsub.f32 %v2781_v29, %v2848_v6  ;;  %v2850_v14 = vmul.f32 0.6931472, %v3962_v54  ;;  %2632 = vadd.xlane.f32.xlu0 %v2631_v59  ;;  %v7032_v6 = vld [vmem:[#allocation69_spill] sm:$0xff] }
 0x27e   :  { %v3966_v48 = vpop.eup %3965  ;;  %v2779_v60 = vmul.f32 %v3964_v44, %v2525_v40  ;;  %v2287_v9 = vpop.xlane.xlu0 %2286  ;;  %v6110_v54 = vsub.f32 %v7032_v6, %v5772_v42  ;;  %v2502_v42 = vmul.f32 %v6061_v41, %v5991_v28  ;;  %v2649_v41 = vsel %vm848_vm1, %v2501_v43, 0.0 }
 0x27f   :  { %v3968_v56 = vpop.eup %3967  ;;  %v3037_v23 = vadd.f32 4.158883, %v2973_v33  ;;  %v2974_v17 = vsub.f32 %v2782_v31, %v2850_v14  ;;  %v2844_v63 = vmul.f32 0.6931472, %v3966_v48  ;;  %3979 = vrcp.f32 %v2287_v9  ;;  %2635 = vadd.xlane.f32.xlu1 %v2634_v49 }
 0x280   :  { %v3970_v50 = vpop.eup %3969  ;;  %v2780_v52 = vmul.f32 %v3968_v56, %v2528_v11  ;;  %3981 = vlog2.f32 %v2287_v9  ;;  %v2290_v1 = vpop.xlane.xlu1 %2289  ;;  %v7033_v11 = vld [vmem:[#allocation70_spill] sm:$0xff] }
 0x281   :  { %v3972_v57 = vpop.eup %3971  ;;  %3102 = vst.msk [vmem:[%s6759_s6 + $0x10] sm:$0xff] %vm3099_vm7, %v3037_v23  ;;  %v3038_v25 = vadd.f32 4.158883, %v2974_v17  ;;  %v2971_v39 = vsub.f32 %v2779_v60, %v2844_v63  ;;  %v2846_v22 = vmul.f32 0.6931472, %v3970_v50  ;;  %3983 = vrcp.f32 %v2290_v1  ;;  %2394 = vadd.xlane.f32.xlu0 %v2393_v34 }
 0x282   :  { %3985 = vlog2.f32 %v2290_v1  ;;  %v3736_v18 = vpop.f32.mrb[10].mxu1  ;;  %v2281_v19 = vpop.xlane.xlu0 %2280  ;;  %v2387_v58 = vsel %vm848_vm1, %v3972_v57, 0.0  ;;  %v6118_v59 = vsub.f32 %v7033_v11, %v5783_v24  ;;  %v2499_v48 = vmul.f32 %v3972_v57, %v6019_v15 }
 0x283   :  { %v3974_v7 = vpop.eup %3973  ;;  %3103 = vst.msk [vmem:[%s6759_s6 + $0x18] sm:$0xff] %vm3099_vm7, %v3038_v25  ;;  %v3035_v55 = vadd.f32 4.158883, %v2971_v39  ;;  %v2972_v5 = vsub.f32 %v2780_v52, %v2846_v22  ;;  %3987 = vrcp.f32 %v2281_v19  ;;  %2397 = vadd.xlane.f32.xlu1 %v2396_v45  ;;  %v1559_v29 = vpop.f32.mrb[11].mxu1  ;;  %v2652_v17 = vsel %vm848_vm1, %v2502_v42, 0.0 }
 0x284   :  { %1832 = vst.msk [vmem:[%s6758_s5 + $0x68] sm:$0xff] %vm1818_vm12, %v3736_v18  ;;  %3989 = vlog2.f32 %v2281_v19  ;;  %1831 = vst.msk [vmem:[%s6758_s5 + $0x60] sm:$0xff] %vm1818_vm12, %v1559_v29  ;;  %v2284_v40 = vpop.xlane.xlu1 %2283  ;;  %v2390_v44 = vsel %vm848_vm1, %v3974_v7, 0.0  ;;  %v6123_v33 = vpop.eup %3975  ;;  %v2239_v60 = vmul.f32 1.442695, %v6110_v54  ;;  %v2500_v63 = vmul.f32 %v3974_v7, %v6028_v38  ;;  %v7034_v18 = vld [vmem:[#allocation71_spill] sm:$0xff] }
 0x285   :  { %3100 = vst.msk [vmem:[%s6759_s6] sm:$0xff] %vm3099_vm7, %v3035_v55  ;;  %v3036_v31 = vadd.f32 4.158883, %v2972_v5  ;;  %3991 = vrcp.f32 %v2284_v40  ;;  %2388 = vadd.xlane.f32.xlu0 %v2387_v58  ;;  %v6133_v14 = vpop.eup %3977  ;;  %v2241_v49 = vmul.f32 1.442695, %v6118_v59  ;;  %v2643_v34 = vsel %vm848_vm1, %v2499_v48, 0.0 }
 0x286   :  { %3993 = vlog2.f32 %v2284_v40  ;;  %v3739_v26 = vpop.f32.mrb[12].mxu1  ;;  %v2543_v2 = vpop.xlane.xlu0 %2542  ;;  %v6148_v19 = vsub.f32 %v7034_v18, %v5793_v51  ;;  %v2646_v7 = vsel %vm848_vm1, %v2500_v63, 0.0  ;;  %v7035_v58 = vld [vmem:[#allocation72_spill] sm:$0xff]  ;;  %v2405_v51 = vsel %vm848_vm1, %v6123_v33, 0.0 }
 0x287   :  { %3995 = vpow2.f32 %v2227_v32  ;;  %3101 = vst.msk [vmem:[%s6759_s6 + $0x8] sm:$0xff] %vm3099_vm7, %v3036_v31  ;;  %2391 = vadd.xlane.f32.xlu1 %v2390_v44  ;;  %v1569_v24 = vpop.f32.mrb[13].mxu1  ;;  %v6153_v43 = vsub.f32 %v7035_v58, %v5798_v4  ;;  %v2408_v42 = vsel %vm848_vm1, %v6133_v14, 0.0 }
 0x288   :  { %1834 = vst.msk [vmem:[%s6758_s5 + $0x78] sm:$0xff] %vm1818_vm12, %v3739_v26  ;;  %1833 = vst.msk [vmem:[%s6758_s5 + $0x70] sm:$0xff] %vm1818_vm12, %v1569_v24  ;;  %v2546_v28 = vpop.xlane.xlu1 %2545  ;;  %3997 = vpow2.f32 %v2229_v61 }
 0x289   :  { %v3980_v62 = vpop.eup %3979  ;;  %2650 = vadd.xlane.f32.xlu0 %v2649_v41  ;;  %3999 = vpow2.f32 %v2239_v60 }
 0x28a   :  { %v3982_v9 = vpop.eup %3981  ;;  %v2785_v56 = vmul.f32 %v3980_v62, %v2543_v2  ;;  %v2537_v23 = vpop.xlane.xlu0 %2536  ;;  %4001 = vpow2.f32 %v2241_v49  ;;  %v2505_v49 = vmul.f32 %v6123_v33, %v6047_v0 }
 0x28b   :  { %v3984_v50 = vpop.eup %3983  ;;  %v2856_v36 = vmul.f32 0.6931472, %v3982_v9  ;;  %2653 = vadd.xlane.f32.xlu1 %v2652_v17 }
 0x28c   :  { %v3986_v52 = vpop.eup %3985  ;;  %v2786_v1 = vmul.f32 %v3984_v50, %v2546_v28  ;;  %v2540_v15 = vpop.xlane.xlu1 %2539  ;;  %v2235_v28 = vmul.f32 1.442695, %v6148_v19  ;;  %v7037_v50 = vld [vmem:[#allocation74_spill] sm:$0xff] }
 0x28d   :  { %v3988_v57 = vpop.eup %3987  ;;  %v2977_v25 = vsub.f32 %v2785_v56, %v2856_v36  ;;  %v2858_v39 = vmul.f32 0.6931472, %v3986_v52  ;;  %2644 = vadd.xlane.f32.xlu0 %v2643_v34  ;;  %v2237_v56 = vmul.f32 1.442695, %v6153_v43  ;;  %v6190_v36 = vsub.f32 %v7037_v50, %v5835_v10 }
 0x28e   :  { %v3990_v22 = vpop.eup %3989  ;;  %v2783_v38 = vmul.f32 %v3988_v57, %v2537_v23  ;;  %v2299_v45 = vpop.xlane.xlu0 %2298  ;;  %v7036_v23 = vld [vmem:[#allocation73_spill] sm:$0xff] }
 0x28f   :  { %v3992_v32 = vpop.eup %3991  ;;  %v3041_v55 = vadd.f32 4.158883, %v2977_v25  ;;  %v2978_v5 = vsub.f32 %v2786_v1, %v2858_v39  ;;  %v2852_v29 = vmul.f32 0.6931472, %v3990_v22  ;;  %4003 = vrcp.f32 %v2299_v45  ;;  %2647 = vadd.xlane.f32.xlu1 %v2646_v7 }
 0x290   :  { %v3994_v40 = vpop.eup %3993  ;;  %v2784_v61 = vmul.f32 %v3992_v32, %v2540_v15  ;;  %4005 = vlog2.f32 %v2299_v45  ;;  %v2302_v6 = vpop.xlane.xlu1 %2301  ;;  %v6182_v17 = vsub.f32 %v7036_v23, %v5824_v16  ;;  %v2506_v16 = vmul.f32 %v6133_v14, %v6051_v35 }
 0x291   :  { %v3996_v31 = vpop.eup %3995  ;;  %3106 = vst.msk [vmem:[%s6759_s6 + $0x30] sm:$0xff] %vm3099_vm7, %v3041_v55  ;;  %v3042_v11 = vadd.f32 4.158883, %v2978_v5  ;;  %v2975_v26 = vsub.f32 %v2783_v38, %v2852_v29  ;;  %v2854_v2 = vmul.f32 0.6931472, %v3994_v40  ;;  %4007 = vrcp.f32 %v2302_v6  ;;  %2406 = vadd.xlane.f32.xlu0 %v2405_v51 }
 0x292   :  { %4009 = vlog2.f32 %v2302_v6  ;;  %v3742_v4 = vpop.f32.mrb[14].mxu1  ;;  %v2293_v44 = vpop.xlane.xlu0 %2292  ;;  %v2399_v9 = vsel %vm848_vm1, %v3996_v31, 0.0  ;;  %v2661_v14 = vsel %vm848_vm1, %v2505_v49, 0.0  ;;  %v2503_v34 = vmul.f32 %v3996_v31, %v6076_v53  ;;  %v7038_v31 = vld [vmem:[#allocation75_spill] sm:$0xff] }
 0x293   :  { %v3998_v24 = vpop.eup %3997  ;;  %3107 = vst.msk [vmem:[%s6759_s6 + $0x38] sm:$0xff] %vm3099_vm7, %v3042_v11  ;;  %v3039_v41 = vadd.f32 4.158883, %v2975_v26  ;;  %v2976_v48 = vsub.f32 %v2784_v61, %v2854_v2  ;;  %4011 = vrcp.f32 %v2293_v44  ;;  %2409 = vadd.xlane.f32.xlu1 %v2408_v42  ;;  %v1579_v62 = vpop.f32.mrb[15].mxu1  ;;  %v2664_v45 = vsel %vm848_vm1, %v2506_v16, 0.0 }
 0x294   :  { %1836 = vst.msk [vmem:[%s6758_s5 + $0x88] sm:$0xff] %vm1818_vm12, %v3742_v4  ;;  %4013 = vlog2.f32 %v2293_v44  ;;  %1835 = vst.msk [vmem:[%s6758_s5 + $0x80] sm:$0xff] %vm1818_vm12, %v1579_v62  ;;  %v2296_v60 = vpop.xlane.xlu1 %2295  ;;  %v2402_v52 = vsel %vm848_vm1, %v3998_v24, 0.0  ;;  %v6195_v1 = vpop.eup %3999  ;;  %v2247_v25 = vmul.f32 1.442695, %v6182_v17  ;;  %v2504_v7 = vmul.f32 %v3998_v24, %v6081_v20 }
 0x295   :  { %3104 = vst.msk [vmem:[%s6759_s6 + $0x20] sm:$0xff] %vm3099_vm7, %v3039_v41  ;;  %v3040_v63 = vadd.f32 4.158883, %v2976_v48  ;;  %4015 = vrcp.f32 %v2296_v60  ;;  %2400 = vadd.xlane.f32.xlu0 %v2399_v9  ;;  %v6205_v15 = vpop.eup %4001  ;;  %v2249_v22 = vmul.f32 1.442695, %v6190_v36  ;;  %v2655_v40 = vsel %vm848_vm1, %v2503_v34, 0.0 }
 0x296   :  { %4017 = vlog2.f32 %v2296_v60  ;;  %v3745_v0 = vpop.f32.mrb[16].mxu1  ;;  %v2555_v33 = vpop.xlane.xlu0 %2554  ;;  %v6220_v11 = vsub.f32 %v7038_v31, %v5845_v21  ;;  %v2658_v2 = vsel %vm848_vm1, %v2504_v7, 0.0  ;;  %v7039_v41 = vld [vmem:[#allocation76_spill] sm:$0xff]  ;;  %v2417_v21 = vsel %vm848_vm1, %v6195_v1, 0.0 }
 0x297   :  { %4019 = vpow2.f32 %v2235_v28  ;;  %3105 = vst.msk [vmem:[%s6759_s6 + $0x28] sm:$0xff] %vm3099_vm7, %v3040_v63  ;;  %2403 = vadd.xlane.f32.xlu1 %v2402_v52  ;;  %v1589_v10 = vpop.f32.mrb[17].mxu1  ;;  %v6225_v48 = vsub.f32 %v7039_v41, %v5850_v12  ;;  %v2420_v50 = vsel %vm848_vm1, %v6205_v15, 0.0  ;;  %v2509_v34 = vmul.f32 %v6195_v1, %v6110_v54  ;;  %v7042_v41 = vld [vmem:[#allocation40_spill] sm:$0xff] }
 0x298   :  { %1838 = vst.msk [vmem:[%s6758_s5 + $0x98] sm:$0xff] %vm1818_vm12, %v3745_v0  ;;  %1837 = vst.msk [vmem:[%s6758_s5 + $0x90] sm:$0xff] %vm1818_vm12, %v1589_v10  ;;  %v2558_v35 = vpop.xlane.xlu1 %2557  ;;  %4021 = vpow2.f32 %v2237_v56 }
 0x299   :  { %v4004_v57 = vpop.eup %4003  ;;  %2662 = vadd.xlane.f32.xlu0 %v2661_v14  ;;  %4023 = vpow2.f32 %v2247_v25  ;;  %v7040_v25 = vld [vmem:[#allocation80_spill] sm:$0xff] }
 0x29a   :  { %v4006_v39 = vpop.eup %4005  ;;  %v2789_v18 = vmul.f32 %v4004_v57, %v2555_v33  ;;  %v2549_v38 = vpop.xlane.xlu0 %2548  ;;  %4025 = vpow2.f32 %v2249_v22  ;;  %v2243_v33 = vmul.f32 1.442695, %v6220_v11  ;;  %v2245_v57 = vmul.f32 1.442695, %v6225_v48 }
 0x29b   :  { %v4008_v32 = vpop.eup %4007  ;;  %v2864_v55 = vmul.f32 0.6931472, %v4006_v39  ;;  %2665 = vadd.xlane.f32.xlu1 %v2664_v45  ;;  %v6254_v39 = vsub.f32 %v7040_v25, %v5876_v13  ;;  %v2510_v13 = vmul.f32 %v6205_v15, %v6118_v59  ;;  %v2673_v15 = vsel %vm848_vm1, %v2509_v34, 0.0 }
 0x29c   :  { %v4010_v5 = vpop.eup %4009  ;;  %v2790_v29 = vmul.f32 %v4008_v32, %v2558_v35  ;;  %v2552_v53 = vpop.xlane.xlu1 %2551 }
 0x29d   :  { %v4012_v58 = vpop.eup %4011  ;;  %v2981_v61 = vsub.f32 %v2789_v18, %v2864_v55  ;;  %v2866_v6 = vmul.f32 0.6931472, %v4010_v5  ;;  %2656 = vadd.xlane.f32.xlu0 %v2655_v40  ;;  %v7041_v18 = vld [vmem:[#allocation82_spill] sm:$0xff] }
 0x29e   :  { %v4014_v51 = vpop.eup %4013  ;;  %v2787_v20 = vmul.f32 %v4012_v58, %v2549_v38  ;;  %v2311_v26 = vpop.xlane.xlu0 %2310  ;;  %v6262_v38 = vsub.f32 %v7041_v18, %v5889_v3 }
 0x29f   :  { %v4016_v4 = vpop.eup %4015  ;;  %v3045_v44 = vadd.f32 4.158883, %v2981_v61  ;;  %v2982_v42 = vsub.f32 %v2790_v29, %v2866_v6  ;;  %v2860_v24 = vmul.f32 0.6931472, %v4014_v51  ;;  %4027 = vrcp.f32 %v2311_v26  ;;  %2659 = vadd.xlane.f32.xlu1 %v2658_v2 }
 0x2a0   :  { %v4018_v28 = vpop.eup %4017  ;;  %v2788_v62 = vmul.f32 %v4016_v4, %v2552_v53  ;;  %4029 = vlog2.f32 %v2311_v26  ;;  %v2314_v60 = vpop.xlane.xlu1 %2313  ;;  %v2255_v29 = vmul.f32 1.442695, %v6254_v39  ;;  %v2257_v40 = vmul.f32 1.442695, %v6262_v38 }
 0x2a1   :  { %v4020_v9 = vpop.eup %4019  ;;  %3110 = vst.msk [vmem:[%s6759_s6 + $0x50] sm:$0xff] %vm3099_vm7, %v3045_v44  ;;  %v3046_v49 = vadd.f32 4.158883, %v2982_v42  ;;  %v2979_v56 = vsub.f32 %v2787_v20, %v2860_v24  ;;  %v2862_v23 = vmul.f32 0.6931472, %v4018_v28  ;;  %4031 = vrcp.f32 %v2314_v60  ;;  %2418 = vadd.xlane.f32.xlu0 %v2417_v21 }
 0x2a2   :  { %4033 = vlog2.f32 %v2314_v60  ;;  %v3748_v12 = vpop.f32.mrb[18].mxu1  ;;  %v2305_v63 = vpop.xlane.xlu0 %2304  ;;  %v2411_v14 = vsel %vm848_vm1, %v4020_v9, 0.0  ;;  %v2507_v55 = vmul.f32 %v4020_v9, %v6148_v19  ;;  %v2676_v6 = vsel %vm848_vm1, %v2510_v13, 0.0  ;;  %v7045_v13 = vld [vmem:[#allocation2_spill] sm:$0xff] }
 0x2a3   :  { %v4022_v0 = vpop.eup %4021  ;;  %3111 = vst.msk [vmem:[%s6759_s6 + $0x58] sm:$0xff] %vm3099_vm7, %v3046_v49  ;;  %v3043_v52 = vadd.f32 4.158883, %v2979_v56  ;;  %v2980_v16 = vsub.f32 %v2788_v62, %v2862_v23  ;;  %4035 = vrcp.f32 %v2305_v63  ;;  %2421 = vadd.xlane.f32.xlu1 %v2420_v50  ;;  %v1599_v10 = vpop.f32.mrb[19].mxu1  ;;  %v6292_v62 = vsub.f32 %v7042_v41, %v5907_v37 }
 0x2a4   :  { %1840 = vst.msk [vmem:[%s6758_s5 + $0xa8] sm:$0xff] %vm1818_vm12, %v3748_v12  ;;  %4037 = vlog2.f32 %v2305_v63  ;;  %1839 = vst.msk [vmem:[%s6758_s5 + $0xa0] sm:$0xff] %vm1818_vm12, %v1599_v10  ;;  %v2308_v35 = vpop.xlane.xlu1 %2307  ;;  %v2414_v45 = vsel %vm848_vm1, %v4022_v0, 0.0  ;;  %v6267_v7 = vpop.eup %4023  ;;  %v2508_v51 = vmul.f32 %v4022_v0, %v6153_v43  ;;  %v2667_v4 = vsel %vm848_vm1, %v2507_v55, 0.0  ;;  %v7043_v63 = vld [vmem:[#allocation42_spill] sm:$0xff] }
 0x2a5   :  { %3108 = vst.msk [vmem:[%s6759_s6 + $0x40] sm:$0xff] %vm3099_vm7, %v3043_v52  ;;  %v3044_v22 = vadd.f32 4.158883, %v2980_v16  ;;  %4039 = vrcp.f32 %v2308_v35  ;;  %2412 = vadd.xlane.f32.xlu0 %v2411_v14  ;;  %v6277_v32 = vpop.eup %4025  ;;  %v6297_v50 = vsub.f32 %v7043_v63, %v5920_v8  ;;  %v2429_v37 = vsel %vm848_vm1, %v6267_v7, 0.0 }
 0x2a6   :  { %4041 = vlog2.f32 %v2308_v35  ;;  %v3751_v54 = vpop.f32.mrb[20].mxu1  ;;  %v2567_v1 = vpop.xlane.xlu0 %2566  ;;  %v2670_v21 = vsel %vm848_vm1, %v2508_v51, 0.0  ;;  %v2251_v8 = vmul.f32 1.442695, %v6292_v62 }
 0x2a7   :  { %4043 = vpow2.f32 %v2243_v33  ;;  %3109 = vst.msk [vmem:[%s6759_s6 + $0x48] sm:$0xff] %vm3099_vm7, %v3044_v22  ;;  %2415 = vadd.xlane.f32.xlu1 %v2414_v45  ;;  %v1609_v3 = vpop.f32.mrb[21].mxu1  ;;  %v7044_v22 = vld [vmem:[#allocation86_spill] sm:$0xff]  ;;  %v2253_v55 = vmul.f32 1.442695, %v6297_v50 }
 0x2a8   :  { %1842 = vst.msk [vmem:[%s6758_s5 + $0xb8] sm:$0xff] %vm1818_vm12, %v3751_v54  ;;  %1841 = vst.msk [vmem:[%s6758_s5 + $0xb0] sm:$0xff] %vm1818_vm12, %v1609_v3  ;;  %v2570_v59 = vpop.xlane.xlu1 %2569  ;;  %4045 = vpow2.f32 %v2245_v57  ;;  %v2432_v57 = vsel %vm848_vm1, %v6277_v32, 0.0  ;;  %v6310_v18 = vsub.f32 %v7044_v22, %v5946_v46  ;;  %v6322_v3 = vsub.f32 %v7045_v13, %v5957_v47 }
 0x2a9   :  { %v4028_v5 = vpop.eup %4027  ;;  %2674 = vadd.xlane.f32.xlu0 %v2673_v15  ;;  %4047 = vpow2.f32 %v2255_v29  ;;  %v2513_v15 = vmul.f32 %v6267_v7, %v6182_v17 }
 0x2aa   :  { %v4030_v53 = vpop.eup %4029  ;;  %v2793_v58 = vmul.f32 %v4028_v5, %v2567_v1  ;;  %v2561_v61 = vpop.xlane.xlu0 %2560  ;;  %4049 = vpow2.f32 %v2257_v40  ;;  %v7046_v5 = vld [vmem:[#allocation28_spill] sm:$0xff] }
 0x2ab   :  { %v4032_v31 = vpop.eup %4031  ;;  %v2872_v20 = vmul.f32 0.6931472, %v4030_v53  ;;  %2677 = vadd.xlane.f32.xlu1 %v2676_v6  ;;  %v6334_v29 = vsub.f32 %v7046_v5, %v5967_v27  ;;  %v7047_v53 = vld [vmem:[#allocation26_spill] sm:$0xff]  ;;  %v2514_v27 = vmul.f32 %v6277_v32, %v6190_v36  ;;  %v2263_v6 = vmul.f32 1.442695, %v6310_v18 }
 0x2ac   :  { %v4034_v26 = vpop.eup %4033  ;;  %v2794_v2 = vmul.f32 %v4032_v31, %v2570_v59  ;;  %v2564_v19 = vpop.xlane.xlu1 %2563  ;;  %v6342_v40 = vsub.f32 %v7047_v53, %v5980_v30  ;;  %v2265_v36 = vmul.f32 1.442695, %v6322_v3  ;;  %v2685_v31 = vsel %vm848_vm1, %v2513_v15, 0.0 }
 0x2ad   :  { %v4036_v44 = vpop.eup %4035  ;;  %v2985_v42 = vsub.f32 %v2793_v58, %v2872_v20  ;;  %v2874_v24 = vmul.f32 0.6931472, %v4034_v26  ;;  %2668 = vadd.xlane.f32.xlu0 %v2667_v4 }
 0x2ae   :  { %v4038_v28 = vpop.eup %4037  ;;  %v2791_v43 = vmul.f32 %v4036_v44, %v2561_v61  ;;  %v2323_v60 = vpop.xlane.xlu0 %2322  ;;  %v2261_v4 = vmul.f32 1.442695, %v6342_v40 }
 0x2af   :  { %v4040_v9 = vpop.eup %4039  ;;  %v3049_v49 = vadd.f32 4.158883, %v2985_v42  ;;  %v2986_v56 = vsub.f32 %v2794_v2, %v2874_v24  ;;  %v2868_v23 = vmul.f32 0.6931472, %v4038_v28  ;;  %4051 = vrcp.f32 %v2323_v60  ;;  %2671 = vadd.xlane.f32.xlu1 %v2670_v21 }
 0x2b0   :  { %v4042_v12 = vpop.eup %4041  ;;  %v2792_v0 = vmul.f32 %v4040_v9, %v2564_v19  ;;  %4053 = vlog2.f32 %v2323_v60  ;;  %v2326_v33 = vpop.xlane.xlu1 %2325  ;;  %v2259_v2 = vmul.f32 1.442695, %v6334_v29  ;;  %v2688_v24 = vsel %vm848_vm1, %v2514_v27, 0.0 }
 0x2b1   :  { %v4044_v52 = vpop.eup %4043  ;;  %3114 = vst.msk [vmem:[%s6759_s6 + $0x70] sm:$0xff] %vm3099_vm7, %v3049_v49  ;;  %v3050_v16 = vadd.f32 4.158883, %v2986_v56  ;;  %v2983_v10 = vsub.f32 %v2791_v43, %v2868_v23  ;;  %v2870_v35 = vmul.f32 0.6931472, %v4042_v12  ;;  %4055 = vrcp.f32 %v2326_v33  ;;  %2430 = vadd.xlane.f32.xlu0 %v2429_v37 }
 0x2b2   :  { %4057 = vlog2.f32 %v2326_v33  ;;  %v3754_v14 = vpop.f32.mrb[22].mxu1  ;;  %v2317_v34 = vpop.xlane.xlu0 %2316  ;;  %v2423_v59 = vsel %vm848_vm1, %v4044_v52, 0.0  ;;  %v2511_v20 = vmul.f32 %v4044_v52, %v6220_v11 }
 0x2b3   :  { %v4046_v25 = vpop.eup %4045  ;;  %3115 = vst.msk [vmem:[%s6759_s6 + $0x78] sm:$0xff] %vm3099_vm7, %v3050_v16  ;;  %v3047_v54 = vadd.f32 4.158883, %v2983_v10  ;;  %v2984_v1 = vsub.f32 %v2792_v0, %v2870_v35  ;;  %4059 = vrcp.f32 %v2317_v34  ;;  %2433 = vadd.xlane.f32.xlu1 %v2432_v57  ;;  %v1619_v45 = vpop.f32.mrb[23].mxu1 }
 0x2b4   :  { %1844 = vst.msk [vmem:[%s6758_s5 + $0xc8] sm:$0xff] %vm1818_vm12, %v3754_v14  ;;  %4061 = vlog2.f32 %v2317_v34  ;;  %1843 = vst.msk [vmem:[%s6758_s5 + $0xc0] sm:$0xff] %vm1818_vm12, %v1619_v45  ;;  %v2320_v46 = vpop.xlane.xlu1 %2319  ;;  %v2426_v58 = vsel %vm848_vm1, %v4046_v25, 0.0  ;;  %v6347_v61 = vpop.eup %4047  ;;  %v2512_v28 = vmul.f32 %v4046_v25, %v6225_v48  ;;  %v2679_v9 = vsel %vm848_vm1, %v2511_v20, 0.0 }
 0x2b5   :  { %3112 = vst.msk [vmem:[%s6759_s6 + $0x60] sm:$0xff] %vm3099_vm7, %v3047_v54  ;;  %v3048_v47 = vadd.f32 4.158883, %v2984_v1  ;;  %4063 = vrcp.f32 %v2320_v46  ;;  %2424 = vadd.xlane.f32.xlu0 %v2423_v59  ;;  %v6358_v51 = vpop.eup %4049  ;;  %v2441_v14 = vsel %vm848_vm1, %v6347_v61, 0.0 }
 0x2b6   :  { %4065 = vlog2.f32 %v2320_v46  ;;  %v3757_v17 = vpop.f32.mrb[24].mxu1  ;;  %v2579_v7 = vpop.xlane.xlu0 %2578  ;;  %v2682_v48 = vsel %vm848_vm1, %v2512_v28, 0.0  ;;  %v2444_v45 = vsel %vm848_vm1, %v6358_v51, 0.0 }
 0x2b7   :  { %4067 = vpow2.f32 %v2251_v8  ;;  %3113 = vst.msk [vmem:[%s6759_s6 + $0x68] sm:$0xff] %vm3099_vm7, %v3048_v47  ;;  %2427 = vadd.xlane.f32.xlu1 %v2426_v58  ;;  %v1629_v30 = vpop.f32.mrb[25].mxu1 }
 0x2b8   :  { %1846 = vst.msk [vmem:[%s6758_s5 + $0xd8] sm:$0xff] %vm1818_vm12, %v3757_v17  ;;  %1845 = vst.msk [vmem:[%s6758_s5 + $0xd0] sm:$0xff] %vm1818_vm12, %v1629_v30  ;;  %v2582_v32 = vpop.xlane.xlu1 %2581  ;;  %4069 = vpow2.f32 %v2253_v55 }
 0x2b9   :  { %v4052_v26 = vpop.eup %4051  ;;  %2686 = vadd.xlane.f32.xlu0 %v2685_v31  ;;  %4071 = vpow2.f32 %v2263_v6 }
 0x2ba   :  { %v4054_v19 = vpop.eup %4053  ;;  %v2797_v44 = vmul.f32 %v4052_v26, %v2579_v7  ;;  %v2573_v42 = vpop.xlane.xlu0 %2572  ;;  %4073 = vpow2.f32 %v2265_v36 }
 0x2bb   :  { %v4056_v41 = vpop.eup %4055  ;;  %v2880_v43 = vmul.f32 0.6931472, %v4054_v19  ;;  %2689 = vadd.xlane.f32.xlu1 %v2688_v24  ;;  %4075 = vpow2.f32 %v2259_v2 }
 0x2bc   :  { %v4058_v60 = vpop.eup %4057  ;;  %v2798_v11 = vmul.f32 %v4056_v41, %v2582_v32  ;;  %v2576_v21 = vpop.xlane.xlu1 %2575  ;;  %4077 = vpow2.f32 %v2261_v4 }
 0x2bd   :  { %v4060_v49 = vpop.eup %4059  ;;  %v2989_v56 = vsub.f32 %v2797_v44, %v2880_v43  ;;  %v2882_v23 = vmul.f32 0.6931472, %v4058_v60  ;;  %2680 = vadd.xlane.f32.xlu0 %v2679_v9 }
 0x2be   :  { %v4062_v12 = vpop.eup %4061  ;;  %v2795_v63 = vmul.f32 %v4060_v49, %v2573_v42  ;;  %v2335_v0 = vpop.xlane.xlu0 %2334 }
 0x2bf   :  { %v4064_v33 = vpop.eup %4063  ;;  %v3053_v37 = vadd.f32 4.158883, %v2989_v56  ;;  %v2990_v52 = vsub.f32 %v2798_v11, %v2882_v23  ;;  %v2876_v16 = vmul.f32 0.6931472, %v4062_v12  ;;  %4079 = vrcp.f32 %v2335_v0  ;;  %2683 = vadd.xlane.f32.xlu1 %v2682_v48 }
 0x2c0   :  { %v4066_v10 = vpop.eup %4065  ;;  %v2796_v35 = vmul.f32 %v4064_v33, %v2576_v21  ;;  %4081 = vlog2.f32 %v2335_v0  ;;  %v2338_v8 = vpop.xlane.xlu1 %2337 }
 0x2c1   :  { %v4068_v34 = vpop.eup %4067  ;;  %3118 = vst.msk [vmem:[%s6759_s6 + $0x90] sm:$0xff] %vm3099_vm7, %v3053_v37  ;;  %v3054_v57 = vadd.f32 4.158883, %v2990_v52  ;;  %v2987_v25 = vsub.f32 %v2795_v63, %v2876_v16  ;;  %v2878_v22 = vmul.f32 0.6931472, %v4066_v10  ;;  %4083 = vrcp.f32 %v2338_v8  ;;  %2442 = vadd.xlane.f32.xlu0 %v2441_v14 }
 0x2c2   :  { %4085 = vlog2.f32 %v2338_v8  ;;  %v3760_v54 = vpop.f32.mrb[26].mxu1  ;;  %v2329_v1 = vpop.xlane.xlu0 %2328  ;;  %v2435_v5 = vsel %vm848_vm1, %v4068_v34, 0.0  ;;  %v2515_v47 = vmul.f32 %v4068_v34, %v6292_v62  ;;  %v2517_v10 = vmul.f32 %v6347_v61, %v6254_v39 }
 0x2c3   :  { %v4070_v13 = vpop.eup %4069  ;;  %3119 = vst.msk [vmem:[%s6759_s6 + $0x98] sm:$0xff] %vm3099_vm7, %v3054_v57  ;;  %v3051_v46 = vadd.f32 4.158883, %v2987_v25  ;;  %v2988_v59 = vsub.f32 %v2796_v35, %v2878_v22  ;;  %4087 = vrcp.f32 %v2329_v1  ;;  %2445 = vadd.xlane.f32.xlu1 %v2444_v45  ;;  %v1639_v15 = vpop.f32.mrb[27].mxu1  ;;  %v2518_v22 = vmul.f32 %v6358_v51, %v6262_v38 }
 0x2c4   :  { %1848 = vst.msk [vmem:[%s6758_s5 + $0xe8] sm:$0xff] %vm1818_vm12, %v3760_v54  ;;  %4089 = vlog2.f32 %v2329_v1  ;;  %1847 = vst.msk [vmem:[%s6758_s5 + $0xe0] sm:$0xff] %vm1818_vm12, %v1639_v15  ;;  %v2332_v55 = vpop.xlane.xlu1 %2331  ;;  %v6395_v53 = vpop.eup %4071  ;;  %v2438_v6 = vsel %vm848_vm1, %v4070_v13, 0.0  ;;  %v2516_v30 = vmul.f32 %v4070_v13, %v6297_v50  ;;  %v2691_v31 = vsel %vm848_vm1, %v2515_v47, 0.0 }
 0x2c5   :  { %3116 = vst.msk [vmem:[%s6759_s6 + $0x80] sm:$0xff] %vm3099_vm7, %v3051_v46  ;;  %v3052_v17 = vadd.f32 4.158883, %v2988_v59  ;;  %4091 = vrcp.f32 %v2332_v55  ;;  %2436 = vadd.xlane.f32.xlu0 %v2435_v5  ;;  %v6401_v7 = vpop.eup %4073  ;;  %v2453_v43 = vsel %vm848_vm1, %v6395_v53, 0.0  ;;  %v2697_v51 = vsel %vm848_vm1, %v2517_v10, 0.0 }
 0x2c6   :  { %4093 = vlog2.f32 %v2332_v55  ;;  %v3763_v58 = vpop.f32.mrb[28].mxu1  ;;  %v2591_v27 = vpop.xlane.xlu0 %2590  ;;  %v2694_v4 = vsel %vm848_vm1, %v2516_v30, 0.0  ;;  %v2456_v23 = vsel %vm848_vm1, %v6401_v7, 0.0  ;;  %v2700_v59 = vsel %vm848_vm1, %v2518_v22, 0.0 }
 0x2c7   :  { %v6405_v62 = vpop.eup %4075  ;;  %3117 = vst.msk [vmem:[%s6759_s6 + $0x88] sm:$0xff] %vm3099_vm7, %v3052_v17  ;;  %2439 = vadd.xlane.f32.xlu1 %v2438_v6  ;;  %v1649_v36 = vpop.f32.mrb[29].mxu1  ;;  %v2521_v5 = vmul.f32 %v6395_v53, %v6310_v18  ;;  %v2522_v30 = vmul.f32 %v6401_v7, %v6322_v3 }
 0x2c8   :  { %1850 = vst.msk [vmem:[%s6758_s5 + $0xf8] sm:$0xff] %vm1818_vm12, %v3763_v58  ;;  %v6415_v32 = vpop.eup %4077  ;;  %1849 = vst.msk [vmem:[%s6758_s5 + $0xf0] sm:$0xff] %vm1818_vm12, %v1649_v36  ;;  %v2594_v50 = vpop.xlane.xlu1 %2593  ;;  %v2447_v16 = vsel %vm848_vm1, %v6405_v62, 0.0  ;;  %v2519_v1 = vmul.f32 %v6405_v62, %v6334_v29 }
 0x2c9   :  { %v4080_v20 = vpop.eup %4079  ;;  %2692 = vadd.xlane.f32.xlu0 %v2691_v31  ;;  %v2450_v25 = vsel %vm848_vm1, %v6415_v32, 0.0  ;;  %v2520_v15 = vmul.f32 %v6415_v32, %v6342_v40 }
 0x2ca   :  { %v4082_v26 = vpop.eup %4081  ;;  %v2801_v2 = vmul.f32 %v4080_v20, %v2591_v27  ;;  %v2585_v19 = vpop.xlane.xlu0 %2584  ;;  %v2703_v40 = vsel %vm848_vm1, %v2519_v1, 0.0  ;;  %v2709_v20 = vsel %vm848_vm1, %v2521_v5, 0.0 }
 0x2cb   :  { %v4084_v44 = vpop.eup %4083  ;;  %v2888_v42 = vmul.f32 0.6931472, %v4082_v26  ;;  %2695 = vadd.xlane.f32.xlu1 %v2694_v4  ;;  %v2706_v6 = vsel %vm848_vm1, %v2520_v15, 0.0 }
 0x2cc   :  { %v4086_v24 = vpop.eup %4085  ;;  %v2802_v28 = vmul.f32 %v4084_v44, %v2594_v50  ;;  %v2588_v41 = vpop.xlane.xlu1 %2587  ;;  %v2712_v44 = vsel %vm848_vm1, %v2522_v30, 0.0 }
 0x2cd   :  { %v4088_v60 = vpop.eup %4087  ;;  %v2993_v11 = vsub.f32 %v2801_v2, %v2888_v42  ;;  %v2890_v21 = vmul.f32 0.6931472, %v4086_v24  ;;  %2454 = vadd.xlane.f32.xlu0 %v2453_v43 }
 0x2ce   :  { %v4090_v9 = vpop.eup %4089  ;;  %v2799_v49 = vmul.f32 %v4088_v60, %v2585_v19  ;;  %v2347_v56 = vpop.xlane.xlu0 %2346 }
 0x2cf   :  { %v4092_v12 = vpop.eup %4091  ;;  %v3057_v63 = vadd.f32 4.158883, %v2993_v11  ;;  %v2994_v0 = vsub.f32 %v2802_v28, %v2890_v21  ;;  %v2884_v48 = vmul.f32 0.6931472, %v4090_v9  ;;  %4095 = vrcp.f32 %v2347_v56  ;;  %2457 = vadd.xlane.f32.xlu1 %v2456_v23 }
 0x2d0   :  { %v4094_v33 = vpop.eup %4093  ;;  %v2800_v37 = vmul.f32 %v4092_v12, %v2588_v41  ;;  %4097 = vlog2.f32 %v2347_v56  ;;  %v2350_v52 = vpop.xlane.xlu1 %2349 }
 0x2d1   :  { %3122 = vst.msk [vmem:[%s6759_s6 + $0xb0] sm:$0xff] %vm3099_vm7, %v3057_v63  ;;  %v3058_v35 = vadd.f32 4.158883, %v2994_v0  ;;  %v2991_v8 = vsub.f32 %v2799_v49, %v2884_v48  ;;  %v2886_v14 = vmul.f32 0.6931472, %v4094_v33  ;;  %4099 = vrcp.f32 %v2350_v52  ;;  %2448 = vadd.xlane.f32.xlu0 %v2447_v16 }
 0x2d2   :  { %4101 = vlog2.f32 %v2350_v52  ;;  %v3766_v34 = vpop.f32.mrb[30].mxu1  ;;  %v2341_v57 = vpop.xlane.xlu0 %2340 }
 0x2d3   :  { %3123 = vst.msk [vmem:[%s6759_s6 + $0xb8] sm:$0xff] %vm3099_vm7, %v3058_v35  ;;  %v3055_v39 = vadd.f32 4.158883, %v2991_v8  ;;  %v2992_v61 = vsub.f32 %v2800_v37, %v2886_v14  ;;  %4103 = vrcp.f32 %v2341_v57  ;;  %2451 = vadd.xlane.f32.xlu1 %v2450_v25  ;;  %v1659_v54 = vpop.f32.mrb[31].mxu1 }
 0x2d4   :  { %1852 = vst.msk [vmem:[%s6758_s5 + $0x108] sm:$0xff] %vm1818_vm12, %v3766_v34  ;;  %4105 = vlog2.f32 %v2341_v57  ;;  %1851 = vst.msk [vmem:[%s6758_s5 + $0x100] sm:$0xff] %vm1818_vm12, %v1659_v54  ;;  %v2344_v38 = vpop.xlane.xlu1 %2343 }
 0x2d5   :  { %3120 = vst.msk [vmem:[%s6759_s6 + $0xa0] sm:$0xff] %vm3099_vm7, %v3055_v39  ;;  %v3056_v45 = vadd.f32 4.158883, %v2992_v61  ;;  %4107 = vrcp.f32 %v2344_v38  ;;  %2698 = vadd.xlane.f32.xlu0 %v2697_v51 }
 0x2d6   :  { %4109 = vlog2.f32 %v2344_v38  ;;  %v3769_v13 = vpop.f32.mrb[32].mxu1  ;;  %v2603_v46 = vpop.xlane.xlu0 %2602 }
 0x2d7   :  { %3121 = vst.msk [vmem:[%s6759_s6 + $0xa8] sm:$0xff] %vm3099_vm7, %v3056_v45  ;;  %2701 = vadd.xlane.f32.xlu1 %v2700_v59  ;;  %v1669_v29 = vpop.f32.mrb[33].mxu1 }
 0x2d8   :  { %1854 = vst.msk [vmem:[%s6758_s5 + $0x118] sm:$0xff] %vm1818_vm12, %v3769_v13  ;;  %1853 = vst.msk [vmem:[%s6758_s5 + $0x110] sm:$0xff] %vm1818_vm12, %v1669_v29  ;;  %v2606_v55 = vpop.xlane.xlu1 %2605 }
 0x2d9   :  { %v4096_v47 = vpop.eup %4095  ;;  %2704 = vadd.xlane.f32.xlu0 %v2703_v40 }
 0x2da   :  { %v4098_v17 = vpop.eup %4097  ;;  %v2805_v58 = vmul.f32 %v4096_v47, %v2603_v46  ;;  %v2597_v27 = vpop.xlane.xlu0 %2596 }
 0x2db   :  { %v4100_v62 = vpop.eup %4099  ;;  %v2896_v36 = vmul.f32 0.6931472, %v4098_v17  ;;  %2707 = vadd.xlane.f32.xlu1 %v2706_v6 }
 0x2dc   :  { %v4102_v32 = vpop.eup %4101  ;;  %v2806_v50 = vmul.f32 %v4100_v62, %v2606_v55  ;;  %v2600_v31 = vpop.xlane.xlu1 %2599 }
 0x2dd   :  { %v4104_v26 = vpop.eup %4103  ;;  %v2997_v18 = vsub.f32 %v2805_v58, %v2896_v36  ;;  %v2898_v53 = vmul.f32 0.6931472, %v4102_v32  ;;  %2710 = vadd.xlane.f32.xlu0 %v2709_v20 }
 0x2de   :  { %v4106_v2 = vpop.eup %4105  ;;  %v2803_v19 = vmul.f32 %v4104_v26, %v2597_v27  ;;  %v2359_v4 = vpop.xlane.xlu0 %2358 }
 0x2df   :  { %v4108_v42 = vpop.eup %4107  ;;  %v3061_v24 = vadd.f32 4.158883, %v2997_v18  ;;  %v2998_v3 = vsub.f32 %v2806_v50, %v2898_v53  ;;  %v2892_v7 = vmul.f32 0.6931472, %v4106_v2  ;;  %4111 = vrcp.f32 %v2359_v4  ;;  %2713 = vadd.xlane.f32.xlu1 %v2712_v44 }
 0x2e0   :  { %v4110_v28 = vpop.eup %4109  ;;  %v2804_v41 = vmul.f32 %v4108_v42, %v2600_v31  ;;  %4113 = vlog2.f32 %v2359_v4  ;;  %v2362_v43 = vpop.xlane.xlu1 %2361 }
 0x2e1   :  { %3126 = vst.msk [vmem:[%s6759_s6 + $0xd0] sm:$0xff] %vm3099_vm7, %v3061_v24  ;;  %v3062_v60 = vadd.f32 4.158883, %v2998_v3  ;;  %v2995_v11 = vsub.f32 %v2803_v19, %v2892_v7  ;;  %v2894_v21 = vmul.f32 0.6931472, %v4110_v28  ;;  %4115 = vrcp.f32 %v2362_v43 }
 0x2e2   :  { %4117 = vlog2.f32 %v2362_v43  ;;  %v3772_v9 = vpop.f32.mrb[34].mxu1  ;;  %v2353_v49 = vpop.xlane.xlu0 %2352 }
 0x2e3   :  { %3127 = vst.msk [vmem:[%s6759_s6 + $0xd8] sm:$0xff] %vm3099_vm7, %v3062_v60  ;;  %v3059_v56 = vadd.f32 4.158883, %v2995_v11  ;;  %v2996_v23 = vsub.f32 %v2804_v41, %v2894_v21  ;;  %4119 = vrcp.f32 %v2353_v49  ;;  %v1679_v12 = vpop.f32.mrb[35].mxu1 }
 0x2e4   :  { %1856 = vst.msk [vmem:[%s6758_s5 + $0x128] sm:$0xff] %vm1818_vm12, %v3772_v9  ;;  %4121 = vlog2.f32 %v2353_v49  ;;  %1855 = vst.msk [vmem:[%s6758_s5 + $0x120] sm:$0xff] %vm1818_vm12, %v1679_v12  ;;  %v2356_v63 = vpop.xlane.xlu1 %2355 }
 0x2e5   :  { %3124 = vst.msk [vmem:[%s6759_s6 + $0xc0] sm:$0xff] %vm3099_vm7, %v3059_v56  ;;  %v3060_v0 = vadd.f32 4.158883, %v2996_v23  ;;  %4123 = vrcp.f32 %v2356_v63 }
 0x2e6   :  { %4125 = vlog2.f32 %v2356_v63  ;;  %v3775_v48 = vpop.f32.mrb[36].mxu1  ;;  %v2615_v33 = vpop.xlane.xlu0 %2614 }
 0x2e7   :  { %3125 = vst.msk [vmem:[%s6759_s6 + $0xc8] sm:$0xff] %vm3099_vm7, %v3060_v0  ;;  %v1689_v37 = vpop.f32.mrb[37].mxu1 }
 0x2e8   :  { %1858 = vst.msk [vmem:[%s6758_s5 + $0x138] sm:$0xff] %vm1818_vm12, %v3775_v48  ;;  %1857 = vst.msk [vmem:[%s6758_s5 + $0x130] sm:$0xff] %vm1818_vm12, %v1689_v37  ;;  %v2618_v52 = vpop.xlane.xlu1 %2617 }
 0x2e9   :  { %v4112_v16 = vpop.eup %4111 }
 0x2ea   :  { %v4114_v10 = vpop.eup %4113  ;;  %v2809_v35 = vmul.f32 %v4112_v16, %v2615_v33  ;;  %v2609_v8 = vpop.xlane.xlu0 %2608 }
 0x2eb   :  { %v4116_v14 = vpop.eup %4115  ;;  %v2904_v34 = vmul.f32 0.6931472, %v4114_v10 }
 0x2ec   :  { %v4118_v57 = vpop.eup %4117  ;;  %v2810_v25 = vmul.f32 %v4116_v14, %v2618_v52  ;;  %v2612_v22 = vpop.xlane.xlu1 %2611 }
 0x2ed   :  { %v4120_v39 = vpop.eup %4119  ;;  %v3001_v61 = vsub.f32 %v2809_v35, %v2904_v34  ;;  %v2906_v54 = vmul.f32 0.6931472, %v4118_v57 }
 0x2ee   :  { %v4122_v38 = vpop.eup %4121  ;;  %v2807_v51 = vmul.f32 %v4120_v39, %v2609_v8  ;;  %v2371_v1 = vpop.xlane.xlu0 %2370 }
 0x2ef   :  { %v4124_v45 = vpop.eup %4123  ;;  %v3065_v13 = vadd.f32 4.158883, %v3001_v61  ;;  %v3002_v46 = vsub.f32 %v2810_v25, %v2906_v54  ;;  %v2900_v59 = vmul.f32 0.6931472, %v4122_v38  ;;  %4127 = vrcp.f32 %v2371_v1 }
 0x2f0   :  { %v4126_v15 = vpop.eup %4125  ;;  %v2808_v29 = vmul.f32 %v4124_v45, %v2612_v22  ;;  %4129 = vlog2.f32 %v2371_v1  ;;  %v2374_v55 = vpop.xlane.xlu1 %2373 }
 0x2f1   :  { %3130 = vst.msk [vmem:[%s6759_s6 + $0xf0] sm:$0xff] %vm3099_vm7, %v3065_v13  ;;  %v3066_v40 = vadd.f32 4.158883, %v3002_v46  ;;  %v2999_v5 = vsub.f32 %v2807_v51, %v2900_v59  ;;  %v2902_v47 = vmul.f32 0.6931472, %v4126_v15  ;;  %4131 = vrcp.f32 %v2374_v55 }
 0x2f2   :  { %4133 = vlog2.f32 %v2374_v55  ;;  %v3778_v17 = vpop.f32.mrb[38].mxu1  ;;  %v2365_v58 = vpop.xlane.xlu0 %2364 }
 0x2f3   :  { %3131 = vst.msk [vmem:[%s6759_s6 + $0xf8] sm:$0xff] %vm3099_vm7, %v3066_v40  ;;  %v3063_v27 = vadd.f32 4.158883, %v2999_v5  ;;  %v3000_v6 = vsub.f32 %v2808_v29, %v2902_v47  ;;  %4135 = vrcp.f32 %v2365_v58  ;;  %v1699_v30 = vpop.f32.mrb[39].mxu1 }
 0x2f4   :  { %1860 = vst.msk [vmem:[%s6758_s5 + $0x148] sm:$0xff] %vm1818_vm12, %v3778_v17  ;;  %4137 = vlog2.f32 %v2365_v58  ;;  %1859 = vst.msk [vmem:[%s6758_s5 + $0x140] sm:$0xff] %vm1818_vm12, %v1699_v30  ;;  %v2368_v62 = vpop.xlane.xlu1 %2367 }
 0x2f5   :  { %3128 = vst.msk [vmem:[%s6759_s6 + $0xe0] sm:$0xff] %vm3099_vm7, %v3063_v27  ;;  %v3064_v36 = vadd.f32 4.158883, %v3000_v6  ;;  %4139 = vrcp.f32 %v2368_v62 }
 0x2f6   :  { %4141 = vlog2.f32 %v2368_v62  ;;  %v3781_v32 = vpop.f32.mrb[40].mxu1  ;;  %v2627_v50 = vpop.xlane.xlu0 %2626 }
 0x2f7   :  { %3129 = vst.msk [vmem:[%s6759_s6 + $0xe8] sm:$0xff] %vm3099_vm7, %v3064_v36  ;;  %v1709_v31 = vpop.f32.mrb[41].mxu1 }
 0x2f8   :  { %1862 = vst.msk [vmem:[%s6758_s5 + $0x158] sm:$0xff] %vm1818_vm12, %v3781_v32  ;;  %1861 = vst.msk [vmem:[%s6758_s5 + $0x150] sm:$0xff] %vm1818_vm12, %v1709_v31  ;;  %v2630_v20 = vpop.xlane.xlu1 %2629 }
 0x2f9   :  { %v4128_v26 = vpop.eup %4127 }
 0x2fa   :  { %v4130_v18 = vpop.eup %4129  ;;  %v2813_v53 = vmul.f32 %v4128_v26, %v2627_v50  ;;  %v2621_v2 = vpop.xlane.xlu0 %2620 }
 0x2fb   :  { %v4132_v19 = vpop.eup %4131  ;;  %v2912_v4 = vmul.f32 0.6931472, %v4130_v18 }
 0x2fc   :  { %v4134_v44 = vpop.eup %4133  ;;  %v2814_v42 = vmul.f32 %v4132_v19, %v2630_v20  ;;  %v2624_v24 = vpop.xlane.xlu1 %2623 }
 0x2fd   :  { %v4136_v3 = vpop.eup %4135  ;;  %v3005_v7 = vsub.f32 %v2813_v53, %v2912_v4  ;;  %v2914_v28 = vmul.f32 0.6931472, %v4134_v44 }
 0x2fe   :  { %v4138_v41 = vpop.eup %4137  ;;  %v2811_v43 = vmul.f32 %v4136_v3, %v2621_v2  ;;  %v2383_v60 = vpop.xlane.xlu0 %2382 }
 0x2ff   :  { %v4140_v11 = vpop.eup %4139  ;;  %v3069_v21 = vadd.f32 4.158883, %v3005_v7  ;;  %v3006_v9 = vsub.f32 %v2814_v42, %v2914_v28  ;;  %v2908_v49 = vmul.f32 0.6931472, %v4138_v41  ;;  %4143 = vrcp.f32 %v2383_v60 }
 0x300   :  { %v4142_v56 = vpop.eup %4141  ;;  %v2812_v23 = vmul.f32 %v4140_v11, %v2624_v24  ;;  %4145 = vlog2.f32 %v2383_v60  ;;  %v2386_v12 = vpop.xlane.xlu1 %2385 }
 0x301   :  { %3134 = vst.msk [vmem:[%s6759_s6 + $0x110] sm:$0xff] %vm3099_vm7, %v3069_v21  ;;  %v3070_v63 = vadd.f32 4.158883, %v3006_v9  ;;  %v3003_v0 = vsub.f32 %v2811_v43, %v2908_v49  ;;  %v2910_v48 = vmul.f32 0.6931472, %v4142_v56  ;;  %4147 = vrcp.f32 %v2386_v12 }
 0x302   :  { %4149 = vlog2.f32 %v2386_v12  ;;  %v3784_v33 = vpop.f32.mrb[42].mxu1  ;;  %v2377_v37 = vpop.xlane.xlu0 %2376 }
 0x303   :  { %3135 = vst.msk [vmem:[%s6759_s6 + $0x118] sm:$0xff] %vm3099_vm7, %v3070_v63  ;;  %v3067_v52 = vadd.f32 4.158883, %v3003_v0  ;;  %v3004_v16 = vsub.f32 %v2812_v23, %v2910_v48  ;;  %4151 = vrcp.f32 %v2377_v37  ;;  %v1719_v10 = vpop.f32.mrb[43].mxu1 }
 0x304   :  { %1864 = vst.msk [vmem:[%s6758_s5 + $0x168] sm:$0xff] %vm1818_vm12, %v3784_v33  ;;  %4153 = vlog2.f32 %v2377_v37  ;;  %1863 = vst.msk [vmem:[%s6758_s5 + $0x160] sm:$0xff] %vm1818_vm12, %v1719_v10  ;;  %v2380_v35 = vpop.xlane.xlu1 %2379 }
 0x305   :  { %3132 = vst.msk [vmem:[%s6759_s6 + $0x100] sm:$0xff] %vm3099_vm7, %v3067_v52  ;;  %v3068_v8 = vadd.f32 4.158883, %v3004_v16  ;;  %4155 = vrcp.f32 %v2380_v35 }
 0x306   :  { %4157 = vlog2.f32 %v2380_v35  ;;  %v3787_v14 = vpop.f32.mrb[44].mxu1  ;;  %v2639_v34 = vpop.xlane.xlu0 %2638 }
 0x307   :  { %3133 = vst.msk [vmem:[%s6759_s6 + $0x108] sm:$0xff] %vm3099_vm7, %v3068_v8  ;;  %v1729_v57 = vpop.f32.mrb[45].mxu1 }
 0x308   :  { %1866 = vst.msk [vmem:[%s6758_s5 + $0x178] sm:$0xff] %vm1818_vm12, %v3787_v14  ;;  %1865 = vst.msk [vmem:[%s6758_s5 + $0x170] sm:$0xff] %vm1818_vm12, %v1729_v57  ;;  %v2642_v25 = vpop.xlane.xlu1 %2641 }
 0x309   :  { %v4144_v22 = vpop.eup %4143 }
 0x30a   :  { %v4146_v39 = vpop.eup %4145  ;;  %v2817_v61 = vmul.f32 %v4144_v22, %v2639_v34  ;;  %v2633_v54 = vpop.xlane.xlu0 %2632 }
 0x30b   :  { %v4148_v38 = vpop.eup %4147  ;;  %v2920_v51 = vmul.f32 0.6931472, %v4146_v39 }
 0x30c   :  { %v4150_v1 = vpop.eup %4149  ;;  %v2818_v45 = vmul.f32 %v4148_v38, %v2642_v25  ;;  %v2636_v13 = vpop.xlane.xlu1 %2635 }
 0x30d   :  { %v4152_v46 = vpop.eup %4151  ;;  %v3009_v59 = vsub.f32 %v2817_v61, %v2920_v51  ;;  %v2922_v15 = vmul.f32 0.6931472, %v4150_v1 }
 0x30e   :  { %v4154_v29 = vpop.eup %4153  ;;  %v2815_v55 = vmul.f32 %v4152_v46, %v2633_v54  ;;  %v2395_v40 = vpop.xlane.xlu0 %2394 }
 0x30f   :  { %v4156_v5 = vpop.eup %4155  ;;  %v3073_v47 = vadd.f32 4.158883, %v3009_v59  ;;  %v3010_v17 = vsub.f32 %v2818_v45, %v2922_v15  ;;  %v2916_v58 = vmul.f32 0.6931472, %v4154_v29  ;;  %4159 = vrcp.f32 %v2395_v40 }
 0x310   :  { %v4158_v27 = vpop.eup %4157  ;;  %v2816_v6 = vmul.f32 %v4156_v5, %v2636_v13  ;;  %4161 = vlog2.f32 %v2395_v40  ;;  %v2398_v30 = vpop.xlane.xlu1 %2397 }
 0x311   :  { %3138 = vst.msk [vmem:[%s6759_s6 + $0x130] sm:$0xff] %vm3099_vm7, %v3073_v47  ;;  %v3074_v62 = vadd.f32 4.158883, %v3010_v17  ;;  %v3007_v36 = vsub.f32 %v2815_v55, %v2916_v58  ;;  %v2918_v32 = vmul.f32 0.6931472, %v4158_v27  ;;  %4163 = vrcp.f32 %v2398_v30 }
 0x312   :  { %4165 = vlog2.f32 %v2398_v30  ;;  %v3790_v50 = vpop.f32.mrb[46].mxu1  ;;  %v2389_v31 = vpop.xlane.xlu0 %2388 }
 0x313   :  { %3139 = vst.msk [vmem:[%s6759_s6 + $0x138] sm:$0xff] %vm3099_vm7, %v3074_v62  ;;  %v3071_v20 = vadd.f32 4.158883, %v3007_v36  ;;  %v3008_v26 = vsub.f32 %v2816_v6, %v2918_v32  ;;  %4167 = vrcp.f32 %v2389_v31  ;;  %v1739_v18 = vpop.f32.mrb[47].mxu1 }
 0x314   :  { %1868 = vst.msk [vmem:[%s6758_s5 + $0x188] sm:$0xff] %vm1818_vm12, %v3790_v50  ;;  %4169 = vlog2.f32 %v2389_v31  ;;  %1867 = vst.msk [vmem:[%s6758_s5 + $0x180] sm:$0xff] %vm1818_vm12, %v1739_v18  ;;  %v2392_v53 = vpop.xlane.xlu1 %2391 }
 0x315   :  { %3136 = vst.msk [vmem:[%s6759_s6 + $0x120] sm:$0xff] %vm3099_vm7, %v3071_v20  ;;  %v3072_v2 = vadd.f32 4.158883, %v3008_v26  ;;  %4171 = vrcp.f32 %v2392_v53 }
 0x316   :  { %4173 = vlog2.f32 %v2392_v53  ;;  %v3793_v19 = vpop.f32.mrb[48].mxu1  ;;  %v2651_v4 = vpop.xlane.xlu0 %2650 }
 0x317   :  { %3137 = vst.msk [vmem:[%s6759_s6 + $0x128] sm:$0xff] %vm3099_vm7, %v3072_v2  ;;  %v1749_v44 = vpop.f32.mrb[49].mxu1 }
 0x318   :  { %1870 = vst.msk [vmem:[%s6758_s5 + $0x198] sm:$0xff] %vm1818_vm12, %v3793_v19  ;;  %1869 = vst.msk [vmem:[%s6758_s5 + $0x190] sm:$0xff] %vm1818_vm12, %v1749_v44  ;;  %v2654_v42 = vpop.xlane.xlu1 %2653 }
 0x319   :  { %v4160_v24 = vpop.eup %4159 }
 0x31a   :  { %v4162_v3 = vpop.eup %4161  ;;  %v2821_v7 = vmul.f32 %v4160_v24, %v2651_v4  ;;  %v2645_v28 = vpop.xlane.xlu0 %2644 }
 0x31b   :  { %v4164_v41 = vpop.eup %4163  ;;  %v2928_v43 = vmul.f32 0.6931472, %v4162_v3 }
 0x31c   :  { %v4166_v60 = vpop.eup %4165  ;;  %v2822_v11 = vmul.f32 %v4164_v41, %v2654_v42  ;;  %v2648_v21 = vpop.xlane.xlu1 %2647 }
 0x31d   :  { %v4168_v9 = vpop.eup %4167  ;;  %v3013_v49 = vsub.f32 %v2821_v7, %v2928_v43  ;;  %v2930_v56 = vmul.f32 0.6931472, %v4166_v60 }
 0x31e   :  { %v4170_v23 = vpop.eup %4169  ;;  %v2819_v12 = vmul.f32 %v4168_v9, %v2645_v28  ;;  %v2407_v63 = vpop.xlane.xlu0 %2406 }
 0x31f   :  { %v4172_v0 = vpop.eup %4171  ;;  %v3077_v48 = vadd.f32 4.158883, %v3013_v49  ;;  %v3014_v33 = vsub.f32 %v2822_v11, %v2930_v56  ;;  %v2924_v37 = vmul.f32 0.6931472, %v4170_v23  ;;  %4175 = vrcp.f32 %v2407_v63 }
 0x320   :  { %v4174_v52 = vpop.eup %4173  ;;  %v2820_v16 = vmul.f32 %v4172_v0, %v2648_v21  ;;  %4177 = vlog2.f32 %v2407_v63  ;;  %v2410_v10 = vpop.xlane.xlu1 %2409 }
 0x321   :  { %3142 = vst.msk [vmem:[%s6759_s6 + $0x150] sm:$0xff] %vm3099_vm7, %v3077_v48  ;;  %v3078_v35 = vadd.f32 4.158883, %v3014_v33  ;;  %v3011_v8 = vsub.f32 %v2819_v12, %v2924_v37  ;;  %v2926_v14 = vmul.f32 0.6931472, %v4174_v52  ;;  %4179 = vrcp.f32 %v2410_v10 }
 0x322   :  { %4181 = vlog2.f32 %v2410_v10  ;;  %v3796_v34 = vpop.f32.mrb[50].mxu1  ;;  %v2401_v57 = vpop.xlane.xlu0 %2400 }
 0x323   :  { %3143 = vst.msk [vmem:[%s6759_s6 + $0x158] sm:$0xff] %vm3099_vm7, %v3078_v35  ;;  %v3075_v25 = vadd.f32 4.158883, %v3011_v8  ;;  %v3012_v22 = vsub.f32 %v2820_v16, %v2926_v14  ;;  %4183 = vrcp.f32 %v2401_v57  ;;  %v1759_v39 = vpop.f32.mrb[51].mxu1 }
 0x324   :  { %1872 = vst.msk [vmem:[%s6758_s5 + $0x1a8] sm:$0xff] %vm1818_vm12, %v3796_v34  ;;  %4185 = vlog2.f32 %v2401_v57  ;;  %1871 = vst.msk [vmem:[%s6758_s5 + $0x1a0] sm:$0xff] %vm1818_vm12, %v1759_v39  ;;  %v2404_v61 = vpop.xlane.xlu1 %2403 }
 0x325   :  { %3140 = vst.msk [vmem:[%s6759_s6 + $0x140] sm:$0xff] %vm3099_vm7, %v3075_v25  ;;  %v3076_v54 = vadd.f32 4.158883, %v3012_v22  ;;  %4187 = vrcp.f32 %v2404_v61 }
 0x326   :  { %4189 = vlog2.f32 %v2404_v61  ;;  %v3799_v38 = vpop.f32.mrb[52].mxu1  ;;  %v2663_v51 = vpop.xlane.xlu0 %2662 }
 0x327   :  { %3141 = vst.msk [vmem:[%s6759_s6 + $0x148] sm:$0xff] %vm3099_vm7, %v3076_v54  ;;  %v1769_v1 = vpop.f32.mrb[53].mxu1 }
 0x328   :  { %1874 = vst.msk [vmem:[%s6758_s5 + $0x1b8] sm:$0xff] %vm1818_vm12, %v3799_v38  ;;  %1873 = vst.msk [vmem:[%s6758_s5 + $0x1b0] sm:$0xff] %vm1818_vm12, %v1769_v1  ;;  %v2666_v45 = vpop.xlane.xlu1 %2665 }
 0x329   :  { %v4176_v13 = vpop.eup %4175 }
 0x32a   :  { %v4178_v46 = vpop.eup %4177  ;;  %v2825_v59 = vmul.f32 %v4176_v13, %v2663_v51  ;;  %v2657_v15 = vpop.xlane.xlu0 %2656 }
 0x32b   :  { %v4180_v29 = vpop.eup %4179  ;;  %v2936_v55 = vmul.f32 0.6931472, %v4178_v46 }
 0x32c   :  { %v4182_v40 = vpop.eup %4181  ;;  %v2826_v5 = vmul.f32 %v4180_v29, %v2666_v45  ;;  %v2660_v47 = vpop.xlane.xlu1 %2659 }
 0x32d   :  { %v4184_v17 = vpop.eup %4183  ;;  %v3017_v58 = vsub.f32 %v2825_v59, %v2936_v55  ;;  %v2938_v27 = vmul.f32 0.6931472, %v4182_v40 }
 0x32e   :  { %v4186_v6 = vpop.eup %4185  ;;  %v2823_v30 = vmul.f32 %v4184_v17, %v2657_v15  ;;  %v2419_v62 = vpop.xlane.xlu0 %2418 }
 0x32f   :  { %v4188_v36 = vpop.eup %4187  ;;  %v3081_v32 = vadd.f32 4.158883, %v3017_v58  ;;  %v3018_v50 = vsub.f32 %v2826_v5, %v2938_v27  ;;  %v2932_v31 = vmul.f32 0.6931472, %v4186_v6  ;;  %4191 = vrcp.f32 %v2419_v62 }
 0x330   :  { %v4190_v20 = vpop.eup %4189  ;;  %v2824_v26 = vmul.f32 %v4188_v36, %v2660_v47  ;;  %4193 = vlog2.f32 %v2419_v62  ;;  %v2422_v18 = vpop.xlane.xlu1 %2421 }
 0x331   :  { %3146 = vst.msk [vmem:[%s6759_s6 + $0x170] sm:$0xff] %vm3099_vm7, %v3081_v32  ;;  %v3082_v53 = vadd.f32 4.158883, %v3018_v50  ;;  %v3015_v2 = vsub.f32 %v2823_v30, %v2932_v31  ;;  %v2934_v19 = vmul.f32 0.6931472, %v4190_v20  ;;  %4195 = vrcp.f32 %v2422_v18 }
 0x332   :  { %4197 = vlog2.f32 %v2422_v18  ;;  %v3802_v4 = vpop.f32.mrb[54].mxu1  ;;  %v2413_v44 = vpop.xlane.xlu0 %2412 }
 0x333   :  { %3147 = vst.msk [vmem:[%s6759_s6 + $0x178] sm:$0xff] %vm3099_vm7, %v3082_v53  ;;  %v3079_v42 = vadd.f32 4.158883, %v3015_v2  ;;  %v3016_v24 = vsub.f32 %v2824_v26, %v2934_v19  ;;  %4199 = vrcp.f32 %v2413_v44  ;;  %v1779_v3 = vpop.f32.mrb[55].mxu1 }
 0x334   :  { %1876 = vst.msk [vmem:[%s6758_s5 + $0x1c8] sm:$0xff] %vm1818_vm12, %v3802_v4  ;;  %4201 = vlog2.f32 %v2413_v44  ;;  %1875 = vst.msk [vmem:[%s6758_s5 + $0x1c0] sm:$0xff] %vm1818_vm12, %v1779_v3  ;;  %v2416_v7 = vpop.xlane.xlu1 %2415 }
 0x335   :  { %3144 = vst.msk [vmem:[%s6759_s6 + $0x160] sm:$0xff] %vm3099_vm7, %v3079_v42  ;;  %v3080_v28 = vadd.f32 4.158883, %v3016_v24  ;;  %4203 = vrcp.f32 %v2416_v7 }
 0x336   :  { %4205 = vlog2.f32 %v2416_v7  ;;  %v3805_v41 = vpop.f32.mrb[56].mxu1  ;;  %v2675_v43 = vpop.xlane.xlu0 %2674 }
 0x337   :  { %3145 = vst.msk [vmem:[%s6759_s6 + $0x168] sm:$0xff] %vm3099_vm7, %v3080_v28  ;;  %v1789_v60 = vpop.f32.mrb[57].mxu1 }
 0x338   :  { %1878 = vst.msk [vmem:[%s6758_s5 + $0x1d8] sm:$0xff] %vm1818_vm12, %v3805_v41  ;;  %1877 = vst.msk [vmem:[%s6758_s5 + $0x1d0] sm:$0xff] %vm1818_vm12, %v1789_v60  ;;  %v2678_v11 = vpop.xlane.xlu1 %2677 }
 0x339   :  { %v4192_v21 = vpop.eup %4191 }
 0x33a   :  { %v4194_v9 = vpop.eup %4193  ;;  %v2829_v49 = vmul.f32 %v4192_v21, %v2675_v43  ;;  %v2669_v56 = vpop.xlane.xlu0 %2668 }
 0x33b   :  { %v4196_v23 = vpop.eup %4195  ;;  %v2944_v12 = vmul.f32 0.6931472, %v4194_v9 }
 0x33c   :  { %v4198_v63 = vpop.eup %4197  ;;  %v2830_v0 = vmul.f32 %v4196_v23, %v2678_v11  ;;  %v2672_v48 = vpop.xlane.xlu1 %2671 }
 0x33d   :  { %v4200_v33 = vpop.eup %4199  ;;  %v3021_v37 = vsub.f32 %v2829_v49, %v2944_v12  ;;  %v2946_v52 = vmul.f32 0.6931472, %v4198_v63 }
 0x33e   :  { %v4202_v16 = vpop.eup %4201  ;;  %v2827_v10 = vmul.f32 %v4200_v33, %v2669_v56  ;;  %v2431_v35 = vpop.xlane.xlu0 %2430 }
 0x33f   :  { %v4204_v8 = vpop.eup %4203  ;;  %v3085_v14 = vadd.f32 4.158883, %v3021_v37  ;;  %v3022_v34 = vsub.f32 %v2830_v0, %v2946_v52  ;;  %v2940_v57 = vmul.f32 0.6931472, %v4202_v16  ;;  %4207 = vrcp.f32 %v2431_v35 }
 0x340   :  { %v4206_v25 = vpop.eup %4205  ;;  %v2828_v22 = vmul.f32 %v4204_v8, %v2672_v48  ;;  %4209 = vlog2.f32 %v2431_v35  ;;  %v2434_v39 = vpop.xlane.xlu1 %2433 }
 0x341   :  { %3150 = vst.msk [vmem:[%s6759_s6 + $0x190] sm:$0xff] %vm3099_vm7, %v3085_v14  ;;  %v3086_v61 = vadd.f32 4.158883, %v3022_v34  ;;  %v3019_v54 = vsub.f32 %v2827_v10, %v2940_v57  ;;  %v2942_v38 = vmul.f32 0.6931472, %v4206_v25  ;;  %4211 = vrcp.f32 %v2434_v39 }
 0x342   :  { %4213 = vlog2.f32 %v2434_v39  ;;  %v3808_v51 = vpop.f32.mrb[58].mxu1  ;;  %v2425_v1 = vpop.xlane.xlu0 %2424 }
 0x343   :  { %3151 = vst.msk [vmem:[%s6759_s6 + $0x198] sm:$0xff] %vm3099_vm7, %v3086_v61  ;;  %v3083_v45 = vadd.f32 4.158883, %v3019_v54  ;;  %v3020_v13 = vsub.f32 %v2828_v22, %v2942_v38  ;;  %4215 = vrcp.f32 %v2425_v1  ;;  %v1799_v46 = vpop.f32.mrb[59].mxu1 }
 0x344   :  { %1880 = vst.msk [vmem:[%s6758_s5 + $0x1e8] sm:$0xff] %vm1818_vm12, %v3808_v51  ;;  %4217 = vlog2.f32 %v2425_v1  ;;  %1879 = vst.msk [vmem:[%s6758_s5 + $0x1e0] sm:$0xff] %vm1818_vm12, %v1799_v46  ;;  %v2428_v59 = vpop.xlane.xlu1 %2427 }
 0x345   :  { %3148 = vst.msk [vmem:[%s6759_s6 + $0x180] sm:$0xff] %vm3099_vm7, %v3083_v45  ;;  %v3084_v15 = vadd.f32 4.158883, %v3020_v13  ;;  %4219 = vrcp.f32 %v2428_v59 }
 0x346   :  { %4221 = vlog2.f32 %v2428_v59  ;;  %v3811_v29 = vpop.f32.mrb[60].mxu1  ;;  %v2687_v55 = vpop.xlane.xlu0 %2686 }
 0x347   :  { %3149 = vst.msk [vmem:[%s6759_s6 + $0x188] sm:$0xff] %vm3099_vm7, %v3084_v15  ;;  %v1809_v40 = vpop.f32.mrb[61].mxu1 }
 0x348   :  { %1882 = vst.msk [vmem:[%s6758_s5 + $0x1f8] sm:$0xff] %vm1818_vm12, %v3811_v29  ;;  %1881 = vst.msk [vmem:[%s6758_s5 + $0x1f0] sm:$0xff] %vm1818_vm12, %v1809_v40  ;;  %v2690_v5 = vpop.xlane.xlu1 %2689 }
 0x349   :  { %v4208_v47 = vpop.eup %4207 }
 0x34a   :  { %v4210_v17 = vpop.eup %4209  ;;  %v2833_v58 = vmul.f32 %v4208_v47, %v2687_v55  ;;  %v2681_v27 = vpop.xlane.xlu0 %2680 }
 0x34b   :  { %v4212_v6 = vpop.eup %4211  ;;  %v2952_v30 = vmul.f32 0.6931472, %v4210_v17 }
 0x34c   :  { %v4214_v62 = vpop.eup %4213  ;;  %v2834_v36 = vmul.f32 %v4212_v6, %v2690_v5  ;;  %v2684_v32 = vpop.xlane.xlu1 %2683 }
 0x34d   :  { %v4216_v50 = vpop.eup %4215  ;;  %v3025_v31 = vsub.f32 %v2833_v58, %v2952_v30  ;;  %v2954_v20 = vmul.f32 0.6931472, %v4214_v62 }
 0x34e   :  { %v4218_v26 = vpop.eup %4217  ;;  %v2831_v18 = vmul.f32 %v4216_v50, %v2681_v27  ;;  %v2443_v53 = vpop.xlane.xlu0 %2442 }
 0x34f   :  { %v4220_v2 = vpop.eup %4219  ;;  %v3089_v19 = vadd.f32 4.158883, %v3025_v31  ;;  %v3026_v4 = vsub.f32 %v2834_v36, %v2954_v20  ;;  %v2948_v44 = vmul.f32 0.6931472, %v4218_v26  ;;  %4223 = vlog2.f32 %v2443_v53 }
 0x350   :  { %v4222_v42 = vpop.eup %4221  ;;  %v2832_v24 = vmul.f32 %v4220_v2, %v2684_v32  ;;  %v2446_v3 = vpop.xlane.xlu1 %2445 }
 0x351   :  { %3154 = vst.msk [vmem:[%s6759_s6 + $0x1b0] sm:$0xff] %vm3099_vm7, %v3089_v19  ;;  %v3090_v7 = vadd.f32 4.158883, %v3026_v4  ;;  %v3023_v28 = vsub.f32 %v2831_v18, %v2948_v44  ;;  %v2950_v41 = vmul.f32 0.6931472, %v4222_v42 }
 0x352   :  { %v2437_v43 = vpop.xlane.xlu0 %2436 }
 0x353   :  { %3155 = vst.msk [vmem:[%s6759_s6 + $0x1b8] sm:$0xff] %vm3099_vm7, %v3090_v7  ;;  %v3087_v60 = vadd.f32 4.158883, %v3023_v28  ;;  %v3024_v11 = vsub.f32 %v2832_v24, %v2950_v41  ;;  %4225 = vrcp.f32 %v2437_v43 }
 0x354   :  { %4227 = vlog2.f32 %v2437_v43  ;;  %v2440_v21 = vpop.xlane.xlu1 %2439 }
 0x355   :  { %3152 = vst.msk [vmem:[%s6759_s6 + $0x1a0] sm:$0xff] %vm3099_vm7, %v3087_v60  ;;  %v3088_v9 = vadd.f32 4.158883, %v3024_v11  ;;  %4229 = vrcp.f32 %v2440_v21 }
 0x356   :  { %4231 = vlog2.f32 %v2440_v21  ;;  %v2693_v49 = vpop.xlane.xlu0 %2692 }
 0x357   :  { %3153 = vst.msk [vmem:[%s6759_s6 + $0x1a8] sm:$0xff] %vm3099_vm7, %v3088_v9  ;;  %4233 = vrcp.f32 %v2443_v53 }
 0x358   :  { %4235 = vlog2.f32 %v2446_v3  ;;  %v2696_v56 = vpop.xlane.xlu1 %2695 }
 0x359   :  { %4237 = vrcp.f32 %v2446_v3  ;;  %v4224_v12 = vpop.eup %4223 }
 0x35a   :  { %v2455_v23 = vpop.xlane.xlu0 %2454  ;;  %v2960_v54 = vmul.f32 0.6931472, %v4224_v12 }
 0x35b   :  { %4239 = vrcp.f32 %v2455_v23 }
 0x35c   :  { %4241 = vlog2.f32 %v2455_v23  ;;  %v2458_v63 = vpop.xlane.xlu1 %2457 }
 0x35d   :  { %v4226_v0 = vpop.eup %4225  ;;  %4243 = vrcp.f32 %v2458_v63 }
 0x35e   :  { %v4228_v48 = vpop.eup %4227  ;;  %v2835_v33 = vmul.f32 %v4226_v0, %v2693_v49  ;;  %4245 = vlog2.f32 %v2458_v63  ;;  %v2449_v37 = vpop.xlane.xlu0 %2448 }
 0x35f   :  { %v4230_v52 = vpop.eup %4229  ;;  %v2956_v16 = vmul.f32 0.6931472, %v4228_v48  ;;  %4247 = vrcp.f32 %v2449_v37 }
 0x360   :  { %v4232_v10 = vpop.eup %4231  ;;  %v2836_v35 = vmul.f32 %v4230_v52, %v2696_v56  ;;  %4249 = vlog2.f32 %v2449_v37  ;;  %v2452_v8 = vpop.xlane.xlu1 %2451 }
 0x361   :  { %v4234_v14 = vpop.eup %4233  ;;  %v3027_v34 = vsub.f32 %v2835_v33, %v2956_v16  ;;  %v2958_v57 = vmul.f32 0.6931472, %v4232_v10  ;;  %4251 = vrcp.f32 %v2452_v8 }
 0x362   :  { %v4236_v25 = vpop.eup %4235  ;;  %4253 = vlog2.f32 %v2452_v8  ;;  %v2699_v22 = vpop.xlane.xlu0 %2698 }
 0x363   :  { %v3091_v39 = vadd.f32 4.158883, %v3027_v34  ;;  %v3028_v61 = vsub.f32 %v2836_v35, %v2958_v57  ;;  %v2837_v38 = vmul.f32 %v4234_v14, %v2699_v22  ;;  %v4238_v51 = vpop.eup %4237  ;;  %v2962_v59 = vmul.f32 0.6931472, %v4236_v25 }
 0x364   :  { %v2702_v1 = vpop.xlane.xlu1 %2701 }
 0x365   :  { %v4240_v45 = vpop.eup %4239  ;;  %3156 = vst.msk [vmem:[%s6759_s6 + $0x1c0] sm:$0xff] %vm3099_vm7, %v3091_v39  ;;  %v3092_v13 = vadd.f32 4.158883, %v3028_v61  ;;  %v3029_v46 = vsub.f32 %v2837_v38, %v2960_v54  ;;  %v2838_v15 = vmul.f32 %v4238_v51, %v2702_v1 }
 0x366   :  { %v4242_v29 = vpop.eup %4241  ;;  %v2705_v55 = vpop.xlane.xlu0 %2704 }
 0x367   :  { %v4244_v40 = vpop.eup %4243  ;;  %3157 = vst.msk [vmem:[%s6759_s6 + $0x1c8] sm:$0xff] %vm3099_vm7, %v3092_v13  ;;  %v3093_v5 = vadd.f32 4.158883, %v3029_v46  ;;  %v3030_v47 = vsub.f32 %v2838_v15, %v2962_v59  ;;  %v2968_v31 = vmul.f32 0.6931472, %v4242_v29 }
 0x368   :  { %v4246_v17 = vpop.eup %4245  ;;  %v2708_v58 = vpop.xlane.xlu1 %2707 }
 0x369   :  { %v4248_v27 = vpop.eup %4247  ;;  %3158 = vst.msk [vmem:[%s6759_s6 + $0x1d0] sm:$0xff] %vm3099_vm7, %v3093_v5  ;;  %v3094_v6 = vadd.f32 4.158883, %v3030_v47  ;;  %v2970_v53 = vmul.f32 0.6931472, %v4246_v17 }
 0x36a   :  { %v4250_v30 = vpop.eup %4249  ;;  %v2839_v62 = vmul.f32 %v4248_v27, %v2705_v55  ;;  %v2711_v36 = vpop.xlane.xlu0 %2710 }
 0x36b   :  { %v4252_v32 = vpop.eup %4251  ;;  %3159 = vst.msk [vmem:[%s6759_s6 + $0x1d8] sm:$0xff] %vm3099_vm7, %v3094_v6  ;;  %v2964_v50 = vmul.f32 0.6931472, %v4250_v30  ;;  %v2841_v20 = vmul.f32 %v4240_v45, %v2711_v36 }
 0x36c   :  { %v4254_v26 = vpop.eup %4253  ;;  %v2840_v18 = vmul.f32 %v4252_v32, %v2708_v58  ;;  %v2714_v2 = vpop.xlane.xlu1 %2713 }
 0x36d   :  { %v3031_v19 = vsub.f32 %v2839_v62, %v2964_v50  ;;  %v2966_v4 = vmul.f32 0.6931472, %v4254_v26  ;;  %v3033_v44 = vsub.f32 %v2841_v20, %v2968_v31  ;;  %v2842_v42 = vmul.f32 %v4244_v40, %v2714_v2 }
 0x36f   :  { %v3095_v24 = vadd.f32 4.158883, %v3031_v19  ;;  %v3032_v3 = vsub.f32 %v2840_v18, %v2966_v4  ;;  %v3097_v7 = vadd.f32 4.158883, %v3033_v44  ;;  %v3034_v28 = vsub.f32 %v2842_v42, %v2970_v53 }
 0x371   :  { %3160 = vst.msk [vmem:[%s6759_s6 + $0x1e0] sm:$0xff] %vm3099_vm7, %v3095_v24  ;;  %v3096_v41 = vadd.f32 4.158883, %v3032_v3  ;;  %3162 = vst.msk [vmem:[%s6759_s6 + $0x1f0] sm:$0xff] %vm3099_vm7, %v3097_v7  ;;  %v3098_v43 = vadd.f32 4.158883, %v3034_v28 }
 0x373   :  { %3161 = vst.msk [vmem:[%s6759_s6 + $0x1e8] sm:$0xff] %vm3099_vm7, %v3096_v41  ;;  %3163 = vst.msk [vmem:[%s6759_s6 + $0x1f8] sm:$0xff] %vm3099_vm7, %v3098_v43 }

</bundles_post_ra>
